<compile_context>
chip_gen: v6e
topology: v6e:2x2x1
jax: 0.10.0
libtpu: 0.0.40
codegen_flags: <defaults>
</compile_context>

<pallas_src>
import functools

import jax
import jax.numpy as jnp
from jax.experimental import pallas as pl
from jax.experimental.pallas import tpu as pltpu

MIN_DENOMINATOR = 1e-12


def _round_up(x, m):
    return ((x + m - 1) // m) * m


def _pick_vmem_limit():
    # ~3/4 of physical VMEM: 96 MiB on v5e/v6e (128 MiB physical), 48 MiB on v7x (64 MiB).
    try:
        cap = int(pltpu.get_tpu_info().vmem_capacity_bytes)
    except Exception:
        return 64 * 1024 * 1024
    return int(min(96 * 1024 * 1024, max(32 * 1024 * 1024, (cap * 3) // 4)))


def _voxel_scatter_kernel(shift_ref, invd_ref, coords_ref, feats_ref, out_ref, *, w, n_valid):
    """Per (batch, voxel-tile, point-chunk) voxelization scatter-mean.

    shift_ref / invd_ref : (B, 3) f32 in SMEM (scalar prefetch)  [bb_min - res, 1/(res+eps)]
    coords_ref           : (3, n_chunk) f32  channels-first point coords
    feats_ref            : (F, n_chunk) f32  channels-first point features
    out_ref              : (vfs, V_TILE) f32 resident accumulator / output for this voxel tile
    """
    b = pl.program_id(0)
    v = pl.program_id(1)
    n = pl.program_id(2)
    nc = coords_ref.shape[1]
    vt = out_ref.shape[1]
    vfs = out_ref.shape[0]

    @pl.when(n == 0)
    def _():
        out_ref[...] = jnp.zeros_like(out_ref)

    c = coords_ref[...]                                     # (3, nc) f32, lane-dense
    f = feats_ref[...]                                      # (F, nc) f32, lane-dense

    # voxel index per axis: floor((xyz - (bb_min - res)) * 1/(res+eps)), clamped to [0, w-1]
    def axis_idx(row, a):
        s = shift_ref[b, a]
        inv = invd_ref[b, a]
        fl = jnp.floor((row - s) * inv)
        return jnp.clip(fl, 0.0, float(w - 1)).astype(jnp.int32)

    ix = axis_idx(c[0:1, :], 0)
    iy = axis_idx(c[1:2, :], 1)
    iz = axis_idx(c[2:3, :], 2)
    flat_row = ix * (w * w) + iy * w + iz                   # (1, nc) i32, points on lanes

    # Move the per-point flat indices onto sublanes.  Broadcast to 8 sublanes first so the
    # XLU transpose operates on a well-aligned (8, nc) 32-bit tile, then keep lane 0.
    flat8 = jnp.broadcast_to(flat_row, (8, nc))
    flat_col = jnp.transpose(flat8, (1, 0))[:, 0:1]          # (nc, 1) i32

    # Valid-point mask: zero-padded tail points must contribute to neither sums nor counts.
    lane = jax.lax.broadcasted_iota(jnp.int32, (1, nc), 1)
    valid = ((n * nc + lane) < n_valid).astype(jnp.float32)  # (1, nc)

    # One-hot only for the current voxel tile (bf16: 0/1 exact, half the VMEM / vst traffic,
    # and enables the bf16 MXU rate on v6e/v7x).
    col = jax.lax.broadcasted_iota(jnp.int32, (1, vt), 1) + v * vt
    one_hot = (flat_col == col).astype(jnp.bfloat16)         # (nc, vt)

    # Channels-first LHS [xyz | feat | valid].  Split f32 -> bf16 hi/lo so the two MXU passes
    # are bf16 x bf16 (fast) while hi+lo recovers ~f32 accuracy; the count row stays exact.
    lhs = jnp.concatenate([c, f, valid], axis=0)             # (vfs, nc) f32
    hi = lhs.astype(jnp.bfloat16)
    lo = (lhs - hi.astype(jnp.float32)).astype(jnp.bfloat16)
    dims = (((1,), (0,)), ((), ()))
    part = jax.lax.dot_general(hi, one_hot, dims, preferred_element_type=jnp.float32)
    part = part + jax.lax.dot_general(lo, one_hot, dims, preferred_element_type=jnp.float32)
    out_ref[...] += part                                     # accumulate directly in out block

    # scatter-MEAN on the last chunk: one reciprocal of the count row, broadcast-multiply.
    @pl.when(n == pl.num_programs(2) - 1)
    def _():
        count = out_ref[vfs - 1:vfs, :]                      # (1, vt) trailing "ones" channel
        inv_cnt = 1.0 / jnp.maximum(count, 1.0)              # exact (matches torch scatter_mean)
        out_ref[...] = out_ref[...] * inv_cnt


def voxelize_pallas(coords_cf, feats_cf, bounds, *, voxel_size, n_chunk=512, v_tile=2048):
    """coords_cf (B,3,N), feats_cf (B,F,N) channels-first, bounds (B,6) or (1,6)
    -> channels-first padded grid (B, 4+F, vs+2, vs+2, vs+2)."""
    B, _, N = coords_cf.shape
    F = feats_cf.shape[1]
    vfs = 4 + F
    w = voxel_size + 2
    V = w * w * w

    # 256-multiple tiles (v6e/v7x MXU is 256-wide); V tiling bounds VMEM independent of vs.
    v_tile = min(_round_up(max(256, v_tile), 256), _round_up(V, 256))
    V_pad = _round_up(V, v_tile)
    n_vtiles = V_pad // v_tile

    n_chunk = _round_up(max(1, min(n_chunk, N)), 256)
    N_pad = _round_up(N, n_chunk)
    n_chunks = N_pad // n_chunk

    bounds = jnp.asarray(bounds, jnp.float32)
    if bounds.ndim == 1:
        bounds = bounds[None]
    if bounds.shape[0] != B:                                  # (1,6) bounds with B>1
        bounds = jnp.broadcast_to(bounds, (B, 6))
    bb_mins = bounds[:, 0:3]
    bb_maxs = bounds[:, 3:6]
    res = (bb_maxs - bb_mins) / (float(voxel_size) + MIN_DENOMINATOR)
    shift = (bb_mins - res).astype(jnp.float32)                       # (B, 3)
    inv_denom = (1.0 / (res + MIN_DENOMINATOR)).astype(jnp.float32)   # (B, 3)

    coords_cf = coords_cf.astype(jnp.float32)
    feats_cf = feats_cf.astype(jnp.float32)
    if N_pad != N:
        coords_cf = jnp.pad(coords_cf, ((0, 0), (0, 0), (0, N_pad - N)))
        feats_cf = jnp.pad(feats_cf, ((0, 0), (0, 0), (0, N_pad - N)))

    kernel = functools.partial(_voxel_scatter_kernel, w=w, n_valid=N)
    grid_spec = pltpu.PrefetchScalarGridSpec(
        num_scalar_prefetch=2,          # shift, inv_denom -> SMEM scalars
        grid=(B, n_vtiles, n_chunks),   # B and V-tiles parallel, point-chunk reduction last
        in_specs=[
            pl.BlockSpec((None, 3, n_chunk), lambda b, v, n, shift, invd: (b, 0, n)),
            pl.BlockSpec((None, F, n_chunk), lambda b, v, n, shift, invd: (b, 0, n)),
        ],
        out_specs=pl.BlockSpec((None, vfs, v_tile), lambda b, v, n, shift, invd: (b, 0, v)),
    )
    flops = 4 * B * N_pad * V_pad * vfs          # two bf16 MXU passes (hi/lo)
    bytes_accessed = int((3 + F) * B * N_pad * 4 * n_vtiles + B * vfs * V_pad * 4 + 2 * B * 3 * 4)
    scattered = pl.pallas_call(
        kernel,
        out_shape=jax.ShapeDtypeStruct((B, vfs, V_pad), jnp.float32),
        grid_spec=grid_spec,
        compiler_params=pltpu.CompilerParams(
            dimension_semantics=("parallel", "parallel", "arbitrary"),
            vmem_limit_bytes=_pick_vmem_limit()),
        cost_estimate=pl.CostEstimate(
            flops=flops, transcendentals=0, bytes_accessed=bytes_accessed),
    )(shift, inv_denom, coords_cf, feats_cf)
    # drop lane padding, reshape straight to channels-first (B, vfs, w, w, w)
    return scattered[:, :, :V].reshape(B, vfs, w, w, w)


class VoxelGridJAX:
    """JAX/Pallas equivalent of VoxelGrid.coords_to_bounding_voxel_grid.

    Returns the voxel grid channels-first (B, C, D, H, W) directly (the PyTorch module
    returns channels-last and QFunction permutes; fusing the permute into the kernel's
    output layout keeps identical end-to-end semantics with no extra transpose).
    Only the INCLUDE_PER_VOXEL_COORD=False path of the original is implemented."""

    def __init__(self, coord_bounds, voxel_size, batch_size, feature_size, max_num_coords):
        self._voxel_size = voxel_size
        self._voxel_d = float(voxel_size)
        self._coord_bounds = jnp.asarray(coord_bounds, jnp.float32).reshape(1, 6)
        self._batch_size = batch_size
        self._feature_size = feature_size
        self._num_coords = max_num_coords

    def coords_to_bounding_voxel_grid(self, coords, coord_features=None, coord_bounds=None,
                                      channels_first=False):
        assert coord_features is not None, "coord_features is required"
        bounds = self._coord_bounds if coord_bounds is None else coord_bounds
        if not channels_first:          # PyTorch-style (B, N, 3) / (B, N, F) inputs
            coords = jnp.swapaxes(coords, 1, 2)
            coord_features = jnp.swapaxes(coord_features, 1, 2)
        scattered = voxelize_pallas(coords, coord_features, bounds,
                                    voxel_size=self._voxel_size)      # (B, 4+F, w, w, w)
        # crop the 1-voxel padding: (B, 4+F, vs, vs, vs)
        vox = scattered[:, :, 1:-1, 1:-1, 1:-1]
        occupied = (vox[:, -1:] > 0).astype(jnp.float32)              # (B, 1, vs, vs, vs)
        vs = self._voxel_size
        B = vox.shape[0]
        ar = jnp.arange(vs, dtype=jnp.float32)
        gx, gy, gz = jnp.meshgrid(ar, ar, ar, indexing="ij")
        index_grid = jnp.stack([gx, gy, gz], axis=0) / self._voxel_d  # (3, vs, vs, vs)
        index_grid = jnp.broadcast_to(index_grid[None], (B, 3, vs, vs, vs))
        # channels: [mean xyz | mean feat | normalized index grid | occupancy]
        return jnp.concatenate([vox[:, :-1], index_grid, occupied], axis=1)


class QFunctionJAX:
    """JAX/Pallas equivalent of QFunction.forward (voxelization path)."""

    def __init__(self, voxel_grid, rotation_resolution=5.0):
        self._rotation_resolution = rotation_resolution
        self._voxel_grid = voxel_grid
        # TODO(synk): `self._qnet` is an externally injected perceiver encoder nn.Module
        # (not defined in the reference file); its forward pass cannot be reproduced here.

    def __call__(self, obs, proprio, pcd, lang_goal_embs, bounds=None):
        bs = obs[0][0].shape[0]
        # NCHW -> (B, C, H*W): pure reshape, no transposes, concat across cameras.
        pcd_cf = jnp.concatenate([p.reshape(bs, 3, -1) for p in pcd], axis=-1)
        image_features = [o[0] for o in obs]
        feat_size = image_features[0].shape[1]
        feats_cf = jnp.concatenate([p.reshape(bs, feat_size, -1) for p in image_features],
                                   axis=-1)
        # broadcast bounds to the batch BEFORE voxelization (per-batch SMEM scalars).
        if bounds is not None and bounds.shape[0] != bs:
            bounds = jnp.broadcast_to(bounds, (bs, bounds.shape[-1]))
        # already channels-first (B, C, D, H, W): no permute(0, 4, 1, 2, 3) needed.
        voxel_grid = self._voxel_grid.coords_to_bounding_voxel_grid(
            pcd_cf, coord_features=feats_cf, coord_bounds=bounds, channels_first=True)
        # TODO(synk): q_trans / rot_and_grip_q / collision_q come from the injected _qnet.
        q_trans, rot_and_grip_q, collision_q = None, None, None
        return q_trans, rot_and_grip_q, collision_q, voxel_grid


def _reference_voxelize(coords, feats, bounds, voxel_size):
    """Pure-JAX reference of the scatter-mean (same index math: multiply by 1/denom).
    coords (B,N,3), feats (B,N,F) channels-last."""
    B, N, _ = coords.shape
    w = voxel_size + 2
    vfs = 4 + feats.shape[-1]
    bb_mins = bounds[:, 0:3]
    bb_maxs = bounds[:, 3:6]
    res = (bb_maxs - bb_mins) / (float(voxel_size) + MIN_DENOMINATOR)
    inv = 1.0 / (res + MIN_DENOMINATOR)
    shift = bb_mins - res
    idx = jnp.clip(jnp.floor((coords - shift[:, None]) * inv[:, None]), 0, w - 1).astype(jnp.int32)
    flat = idx[..., 0] * w * w + idx[..., 1] * w + idx[..., 2]
    vals = jnp.concatenate([coords, feats, jnp.ones((B, N, 1), jnp.float32)], -1)

    def one(fi, v):
        s = jnp.zeros((w ** 3, vfs), jnp.float32).at[fi].add(v)
        return (s / jnp.maximum(s[:, -1:], 1.0)).T                    # (vfs, V)

    return jax.vmap(one)(flat, vals).reshape(B, vfs, w, w, w)


if __name__ == "__main__":
    key = jax.random.PRNGKey(0)
    B = 2
    VOXEL_SIZE = 8        # voxel grid is VOXEL_SIZE^3 (padded grid is (vs+2)^3 internally)
    FEAT = 8              # per-point image-feature channels
    H = W = 16
    NUM_CAMS = 2
    N = NUM_CAMS * H * W  # total points per batch element (512)

    k1, k2, k3, k4 = jax.random.split(key, 4)
    pcd = [jax.random.uniform(k, (B, 3, H, W), minval=-0.9, maxval=0.9, dtype=jnp.float32)
           for k in jax.random.split(k1, NUM_CAMS)]
    obs = [(jax.random.normal(k, (B, FEAT, H, W), dtype=jnp.float32),)
           for k in jax.random.split(k2, NUM_CAMS)]
    proprio = jax.random.normal(k3, (B, 4), dtype=jnp.float32)
    lang_goal_embs = jax.random.normal(k4, (B, 77, 32), dtype=jnp.float32)
    bounds = jnp.tile(jnp.array([[-1.0, -1.0, -1.0, 1.0, 1.0, 1.0]], jnp.float32), (B, 1))

    vgrid = VoxelGridJAX(
        coord_bounds=[-1.0, -1.0, -1.0, 1.0, 1.0, 1.0],
        voxel_size=VOXEL_SIZE, batch_size=B, feature_size=FEAT, max_num_coords=N)
    qf = QFunctionJAX(vgrid, rotation_resolution=5.0)

    q_trans, rot_and_grip_q, collision_q, voxel_grid = qf(obs, proprio, pcd, lang_goal_embs, bounds)
    voxel_grid = jax.block_until_ready(voxel_grid)

    # shape check: channels = 3 (mean xyz) + FEAT (mean feats) + 3 (index grid) + 1 (occupancy)
    assert voxel_grid.shape == (B, 3 + FEAT + 3 + 1, VOXEL_SIZE, VOXEL_SIZE, VOXEL_SIZE), \
        voxel_grid.shape
    assert voxel_grid.dtype == jnp.float32

    # (1, 6) bounds with B > 1 must broadcast correctly (fixed correctness concern)
    vg_b1 = qf(obs, proprio, pcd, lang_goal_embs, bounds[:1])[3]
    vg_b1 = jax.block_until_ready(vg_b1)
    assert bool(jnp.allclose(vg_b1, voxel_grid, atol=1e-5, rtol=1e-5)), "bounds broadcast mismatch"

    # cross-check the Pallas scatter-mean against a plain-JAX scatter reference, exercising
    # both the multi-chunk point reduction and the multi-V-tile grid axis
    coords_cf = jnp.concatenate([p.reshape(B, 3, -1) for p in pcd], axis=-1)
    feats_cf = jnp.concatenate([o[0].reshape(B, FEAT, -1) for o in obs], axis=-1)
    got = voxelize_pallas(coords_cf, feats_cf, bounds, voxel_size=VOXEL_SIZE,
                          n_chunk=256, v_tile=256)
    got = jax.block_until_ready(got)
    want = _reference_voxelize(jnp.swapaxes(coords_cf, 1, 2), jnp.swapaxes(feats_cf, 1, 2),
                               bounds, VOXEL_SIZE)
    assert bool(jnp.allclose(got, want, atol=5e-4, rtol=5e-4)), "Pallas scatter-mean mismatch"

    print("KERNEL_OK")
</pallas_src>

<mosaic_0001>
module attributes {stable_mosaic.version = 11 : i64} {
  func.func @_voxel_scatter_kernel(%arg0: i32, %arg1: i32, %arg2: i32, %arg3: memref<2x3xf32, #tpu.memory_space<smem>>, %arg4: memref<2x3xf32, #tpu.memory_space<smem>>, %arg5: memref<1x3x512xf32, #tpu.memory_space<vmem>>, %arg6: memref<1x8x512xf32, #tpu.memory_space<vmem>>, %arg7: memref<1x12x1024xf32, #tpu.memory_space<vmem>>) attributes {dimension_semantics = [#tpu.dimension_semantics<parallel>, #tpu.dimension_semantics<parallel>, #tpu.dimension_semantics<arbitrary>], iteration_bounds = array<i64: 2, 1, 1>, scalar_prefetch = 2 : i64, scratch_operands = 0 : i64, tpu.core_type = #tpu.core_type<tc>, window_params = [{transform_indices = @transform_0, window_bounds = array<i64: 1, 3, 512>}, {transform_indices = @transform_1, window_bounds = array<i64: 1, 8, 512>}, {transform_indices = @transform_2, window_bounds = array<i64: 1, 12, 1024>}]} {
    %c0_i32 = arith.constant 0 : i32
    %0 = arith.cmpi eq, %arg2, %c0_i32 : i32
    %1 = arith.extui %0 : i1 to i32
    %c0_i32_0 = arith.constant 0 : i32
    %2 = arith.cmpi ne, %1, %c0_i32_0 : i32
    scf.if %2 {
      %cst_26 = arith.constant 0.000000e+00 : f32
      %97 = vector.broadcast %cst_26 : f32 to vector<12x1024xf32>
      %c0_27 = arith.constant 0 : index
      %c0_28 = arith.constant 0 : index
      %c0_29 = arith.constant 0 : index
      %98 = vector.load %arg7[%c0_27, %c0_28, %c0_29] : memref<1x12x1024xf32, #tpu.memory_space<vmem>>, vector<1x12x1024xf32>
      %99 = vector.shape_cast %98 : vector<1x12x1024xf32> to vector<12x1024xf32>
      %100 = vector.shape_cast %97 : vector<12x1024xf32> to vector<1x12x1024xf32>
      tpu.vector_store %arg7[%c0_27, %c0_28, %c0_29], %100 {strides = array<i32>} : memref<1x12x1024xf32, #tpu.memory_space<vmem>>, vector<1x12x1024xf32>,
    } else {
    }
    %c0 = arith.constant 0 : index
    %c0_1 = arith.constant 0 : index
    %c0_2 = arith.constant 0 : index
    %3 = vector.load %arg5[%c0, %c0_1, %c0_2] : memref<1x3x512xf32, #tpu.memory_space<vmem>>, vector<1x3x512xf32>
    %4 = vector.shape_cast %3 : vector<1x3x512xf32> to vector<3x512xf32>
    %c0_3 = arith.constant 0 : index
    %c0_4 = arith.constant 0 : index
    %c0_5 = arith.constant 0 : index
    %5 = vector.load %arg6[%c0_3, %c0_4, %c0_5] : memref<1x8x512xf32, #tpu.memory_space<vmem>>, vector<1x8x512xf32>
    %6 = vector.shape_cast %5 : vector<1x8x512xf32> to vector<8x512xf32>
    %7 = vector.extract_strided_slice %4 {offsets = [0, 0], sizes = [1, 512], strides = [1, 1]} : vector<3x512xf32> to vector<1x512xf32>
    %8 = arith.index_cast %arg0 : i32 to index
    %c0_6 = arith.constant 0 : index
    %9 = memref.load %arg3[%8, %c0_6] : memref<2x3xf32, #tpu.memory_space<smem>>
    %10 = arith.index_cast %arg0 : i32 to index
    %c0_7 = arith.constant 0 : index
    %11 = memref.load %arg4[%10, %c0_7] : memref<2x3xf32, #tpu.memory_space<smem>>
    %12 = vector.broadcast %9 : f32 to vector<1x512xf32>
    %13 = arith.subf %7, %12 : vector<1x512xf32>
    %14 = vector.broadcast %11 : f32 to vector<1x512xf32>
    %15 = arith.mulf %13, %14 : vector<1x512xf32>
    %16 = math.floor %15 : vector<1x512xf32>
    %cst = arith.constant 0.000000e+00 : f32
    %cst_8 = arith.constant 9.000000e+00 : f32
    %17 = vector.broadcast %cst : f32 to vector<1x512xf32>
    %18 = arith.maximumf %17, %16 : vector<1x512xf32>
    %19 = vector.broadcast %cst_8 : f32 to vector<1x512xf32>
    %20 = arith.minimumf %19, %18 : vector<1x512xf32>
    %21 = arith.fptosi %20 : vector<1x512xf32> to vector<1x512xi32>
    %22 = vector.extract_strided_slice %4 {offsets = [1, 0], sizes = [1, 512], strides = [1, 1]} : vector<3x512xf32> to vector<1x512xf32>
    %23 = arith.index_cast %arg0 : i32 to index
    %c1 = arith.constant 1 : index
    %24 = memref.load %arg3[%23, %c1] : memref<2x3xf32, #tpu.memory_space<smem>>
    %25 = arith.index_cast %arg0 : i32 to index
    %c1_9 = arith.constant 1 : index
    %26 = memref.load %arg4[%25, %c1_9] : memref<2x3xf32, #tpu.memory_space<smem>>
    %27 = vector.broadcast %24 : f32 to vector<1x512xf32>
    %28 = arith.subf %22, %27 : vector<1x512xf32>
    %29 = vector.broadcast %26 : f32 to vector<1x512xf32>
    %30 = arith.mulf %28, %29 : vector<1x512xf32>
    %31 = math.floor %30 : vector<1x512xf32>
    %cst_10 = arith.constant 0.000000e+00 : f32
    %cst_11 = arith.constant 9.000000e+00 : f32
    %32 = vector.broadcast %cst_10 : f32 to vector<1x512xf32>
    %33 = arith.maximumf %32, %31 : vector<1x512xf32>
    %34 = vector.broadcast %cst_11 : f32 to vector<1x512xf32>
    %35 = arith.minimumf %34, %33 : vector<1x512xf32>
    %36 = arith.fptosi %35 : vector<1x512xf32> to vector<1x512xi32>
    %37 = vector.extract_strided_slice %4 {offsets = [2, 0], sizes = [1, 512], strides = [1, 1]} : vector<3x512xf32> to vector<1x512xf32>
    %38 = arith.index_cast %arg0 : i32 to index
    %c2 = arith.constant 2 : index
    %39 = memref.load %arg3[%38, %c2] : memref<2x3xf32, #tpu.memory_space<smem>>
    %40 = arith.index_cast %arg0 : i32 to index
    %c2_12 = arith.constant 2 : index
    %41 = memref.load %arg4[%40, %c2_12] : memref<2x3xf32, #tpu.memory_space<smem>>
    %42 = vector.broadcast %39 : f32 to vector<1x512xf32>
    %43 = arith.subf %37, %42 : vector<1x512xf32>
    %44 = vector.broadcast %41 : f32 to vector<1x512xf32>
    %45 = arith.mulf %43, %44 : vector<1x512xf32>
    %46 = math.floor %45 : vector<1x512xf32>
    %cst_13 = arith.constant 0.000000e+00 : f32
    %cst_14 = arith.constant 9.000000e+00 : f32
    %47 = vector.broadcast %cst_13 : f32 to vector<1x512xf32>
    %48 = arith.maximumf %47, %46 : vector<1x512xf32>
    %49 = vector.broadcast %cst_14 : f32 to vector<1x512xf32>
    %50 = arith.minimumf %49, %48 : vector<1x512xf32>
    %51 = arith.fptosi %50 : vector<1x512xf32> to vector<1x512xi32>
    %c100_i32 = arith.constant 100 : i32
    %52 = vector.broadcast %c100_i32 : i32 to vector<1x512xi32>
    %53 = arith.muli %21, %52 : vector<1x512xi32>
    %c10_i32 = arith.constant 10 : i32
    %54 = vector.broadcast %c10_i32 : i32 to vector<1x512xi32>
    %55 = arith.muli %36, %54 : vector<1x512xi32>
    %56 = arith.addi %53, %55 : vector<1x512xi32>
    %57 = arith.addi %56, %51 : vector<1x512xi32>
    %58 = vector.shape_cast %57 : vector<1x512xi32> to vector<1x512xi32>
    %59 = vector.broadcast %58 : vector<1x512xi32> to vector<8x512xi32>
    %60 = tpu.transpose %59, [1, 0] : vector<8x512xi32> -> vector<512x8xi32>
    %61 = vector.extract_strided_slice %60 {offsets = [0, 0], sizes = [512, 1], strides = [1, 1]} : vector<512x8xi32> to vector<512x1xi32>
    %62 = tpu.iota {dimensions = array<i32: 1>} : vector<1x512xi32>
    %c512_i32 = arith.constant 512 : i32
    %63 = arith.muli %arg2, %c512_i32 : i32
    %64 = vector.broadcast %63 : i32 to vector<1x512xi32>
    %65 = arith.addi %64, %62 : vector<1x512xi32>
    %c512_i32_15 = arith.constant 512 : i32
    %66 = vector.broadcast %c512_i32_15 : i32 to vector<1x512xi32>
    %67 = arith.cmpi slt, %65, %66 : vector<1x512xi32>
    %68 = arith.extui %67 : vector<1x512xi1> to vector<1x512xi32>
    %69 = arith.sitofp %68 : vector<1x512xi32> to vector<1x512xf32>
    %70 = tpu.iota {dimensions = array<i32: 1>} : vector<1x1024xi32>
    %c1024_i32 = arith.constant 1024 : i32
    %71 = arith.muli %arg1, %c1024_i32 : i32
    %72 = vector.broadcast %71 : i32 to vector<1x1024xi32>
    %73 = arith.addi %70, %72 : vector<1x1024xi32>
    %74 = vector.broadcast %61 : vector<512x1xi32> to vector<512x1024xi32>
    %75 = vector.broadcast %73 : vector<1x1024xi32> to vector<512x1024xi32>
    %76 = arith.cmpi eq, %74, %75 : vector<512x1024xi32>
    %77 = arith.extui %76 : vector<512x1024xi1> to vector<512x1024xi32>
    %78 = arith.sitofp %77 : vector<512x1024xi32> to vector<512x1024xf32>
    %79 = arith.truncf %78 : vector<512x1024xf32> to vector<512x1024xbf16>
    %80 = tpu.concatenate %4, %6, %69 in 0 : vector<3x512xf32>, vector<8x512xf32>, vector<1x512xf32> -> vector<12x512xf32>
    %81 = arith.truncf %80 : vector<12x512xf32> to vector<12x512xbf16>
    %82 = arith.extf %81 : vector<12x512xbf16> to vector<12x512xf32>
    %83 = arith.subf %80, %82 : vector<12x512xf32>
    %84 = arith.truncf %83 : vector<12x512xf32> to vector<12x512xbf16>
    %cst_16 = arith.constant dense<0.000000e+00> : vector<12x1024xf32>
    %85 = tpu.matmul %81, %79, %cst_16 {dimension_numbers = #tpu.dot_dimension_numbers<[1], [0], [0], [1], [0, 0, 1, 1], [], []>} : vector<12x512xbf16>, vector<512x1024xbf16>, vector<12x1024xf32> -> vector<12x1024xf32>
    %cst_17 = arith.constant dense<0.000000e+00> : vector<12x1024xf32>
    %86 = tpu.matmul %84, %79, %cst_17 {dimension_numbers = #tpu.dot_dimension_numbers<[1], [0], [0], [1], [0, 0, 1, 1], [], []>} : vector<12x512xbf16>, vector<512x1024xbf16>, vector<12x1024xf32> -> vector<12x1024xf32>
    %87 = arith.addf %85, %86 : vector<12x1024xf32>
    %c0_18 = arith.constant 0 : index
    %c0_19 = arith.constant 0 : index
    %c0_20 = arith.constant 0 : index
    %88 = vector.load %arg7[%c0_18, %c0_19, %c0_20] : memref<1x12x1024xf32, #tpu.memory_space<vmem>>, vector<1x12x1024xf32>
    %89 = vector.shape_cast %88 : vector<1x12x1024xf32> to vector<12x1024xf32>
    %90 = arith.addf %89, %87 : vector<12x1024xf32>
    %c0_21 = arith.constant 0 : index
    %c0_22 = arith.constant 0 : index
    %c0_23 = arith.constant 0 : index
    %91 = vector.load %arg7[%c0_21, %c0_22, %c0_23] : memref<1x12x1024xf32, #tpu.memory_space<vmem>>, vector<1x12x1024xf32>
    %92 = vector.shape_cast %91 : vector<1x12x1024xf32> to vector<12x1024xf32>
    %93 = vector.shape_cast %90 : vector<12x1024xf32> to vector<1x12x1024xf32>
    tpu.vector_store %arg7[%c0_21, %c0_22, %c0_23], %93 {strides = array<i32>} : memref<1x12x1024xf32, #tpu.memory_space<vmem>>, vector<1x12x1024xf32>,
    %c0_i32_24 = arith.constant 0 : i32
    %94 = arith.cmpi eq, %arg2, %c0_i32_24 : i32
    %95 = arith.extui %94 : i1 to i32
    %c0_i32_25 = arith.constant 0 : i32
    %96 = arith.cmpi ne, %95, %c0_i32_25 : i32
    scf.if %96 {
      %c0_26 = arith.constant 0 : index
      %c11 = arith.constant 11 : index
      %c0_27 = arith.constant 0 : index
      %97 = vector.load %arg7[%c0_26, %c11, %c0_27] : memref<1x12x1024xf32, #tpu.memory_space<vmem>>, vector<1x1x1024xf32>
      %98 = vector.shape_cast %97 : vector<1x1x1024xf32> to vector<1x1024xf32>
      %cst_28 = arith.constant 1.000000e+00 : f32
      %99 = vector.broadcast %cst_28 : f32 to vector<1x1024xf32>
      %100 = arith.maximumf %98, %99 : vector<1x1024xf32>
      %cst_29 = arith.constant 1.000000e+00 : f32
      %101 = vector.broadcast %cst_29 : f32 to vector<1x1024xf32>
      %102 = arith.divf %101, %100 : vector<1x1024xf32>
      %c0_30 = arith.constant 0 : index
      %c0_31 = arith.constant 0 : index
      %c0_32 = arith.constant 0 : index
      %103 = vector.load %arg7[%c0_30, %c0_31, %c0_32] : memref<1x12x1024xf32, #tpu.memory_space<vmem>>, vector<1x12x1024xf32>
      %104 = vector.shape_cast %103 : vector<1x12x1024xf32> to vector<12x1024xf32>
      %105 = vector.broadcast %102 : vector<1x1024xf32> to vector<12x1024xf32>
      %106 = arith.mulf %104, %105 : vector<12x1024xf32>
      %c0_33 = arith.constant 0 : index
      %c0_34 = arith.constant 0 : index
      %c0_35 = arith.constant 0 : index
      %107 = vector.load %arg7[%c0_33, %c0_34, %c0_35] : memref<1x12x1024xf32, #tpu.memory_space<vmem>>, vector<1x12x1024xf32>
      %108 = vector.shape_cast %107 : vector<1x12x1024xf32> to vector<12x1024xf32>
      %109 = vector.shape_cast %106 : vector<12x1024xf32> to vector<1x12x1024xf32>
      tpu.vector_store %arg7[%c0_33, %c0_34, %c0_35], %109 {strides = array<i32>} : memref<1x12x1024xf32, #tpu.memory_space<vmem>>, vector<1x12x1024xf32>,
    } else {
    }
    return
  }
  func.func @transform_0(%arg0: i32, %arg1: i32, %arg2: i32, %arg3: memref<2x3xf32, #tpu.memory_space<smem>>, %arg4: memref<2x3xf32, #tpu.memory_space<smem>>) -> (i32, i32, i32) {
    %c0_i32 = arith.constant 0 : i32
    %c0_i32_0 = arith.constant 0 : i32
    return %arg0, %c0_i32, %arg2 : i32, i32, i32
  }
  func.func @transform_1(%arg0: i32, %arg1: i32, %arg2: i32, %arg3: memref<2x3xf32, #tpu.memory_space<smem>>, %arg4: memref<2x3xf32, #tpu.memory_space<smem>>) -> (i32, i32, i32) {
    %c0_i32 = arith.constant 0 : i32
    %c0_i32_0 = arith.constant 0 : i32
    return %arg0, %c0_i32, %arg2 : i32, i32, i32
  }
  func.func @transform_2(%arg0: i32, %arg1: i32, %arg2: i32, %arg3: memref<2x3xf32, #tpu.memory_space<smem>>, %arg4: memref<2x3xf32, #tpu.memory_space<smem>>) -> (i32, i32, i32) {
    %c0_i32 = arith.constant 0 : i32
    %c0_i32_0 = arith.constant 0 : i32
    return %arg0, %c0_i32, %arg1 : i32, i32, i32
  }
}

</mosaic_0001>

<bundles_post_ra>
// kernel: tpu_custom_call.1
= control target key start
LH: loop header
LB: loop body
LE: loop exit
PB: predicated region body
PF: predicated region fallthrough
CT: control target
= control target key end

     0   :  { %s9498_s0 = inlined_call_operand.vmem [shape: f32[2,3], index: 0, kind: input, shape index: {}]   ;;  %s9499_s2 = inlined_call_operand.vmem [shape: f32[2,3,512], index: 2, kind: input, shape index: {}]   ;;  %s9500_s3 = inlined_call_operand.hbm [shape: f32[2,8,512], index: 3, kind: input, shape index: {}]   ;;  %s9501_s4 = inlined_call_operand.vmem [shape: f32[2,12,1024], index: 4, kind: output, shape index: {}]   ;;  %s9502_s1 = inlined_call_operand.vmem [shape: f32[2,3], index: 1, kind: input, shape index: {}]  }
   0x1   :  { %s9_s17 = sshll.u32 %s9498_s0, 4  ;;  %s13_s20 = sshll.u32 %s9502_s1, 4  ;;  %s10_s17 = int_to_ptr.vmem [resolvable:$true] %s9_s17  ;;  %s14_s20 = int_to_ptr.vmem [resolvable:$true] %s13_s20 }
   0x2   :  { %s5161_s21 = scalar_lea.vmem %s10_s17, 32  ;;  %p5166_p1 = scmp.lt.s32.totalorder %s10_s17, %s10_s17 }
   0x3   :  { %p5162_p0 = scmp.ne.s32.totalorder %s10_s17, %s5161_s21  ;;  %p5167_p2 = scmp.lt.s32.totalorder %s5161_s21, %s5161_s21 }
   0x5   :  { %p5168_p3 = por %p5167_p2, %p5166_p1 }
   0x7   :  { %p5169_p4 = pnand %p5168_p3, %p5162_p0 }
   0x9   :  { %5172 = shalt.err (!%p5169_p4)  }
   0xa   :  { %s5267_s22 = smov [#allocation3]   ;;  %s5173_s23 = scalar_lea.vmem %s14_s20, 32 }
   0xb   :  { %12 = dma.vmem_to_smem %s10_s17, 32, %s5267_s22, [#allocation2] }
   0xc   :  { %p5174_p5 = scmp.ne.s32.totalorder %s14_s20, %s5173_s23  ;;  %p5178_p6 = scmp.lt.s32.totalorder %s14_s20, %s14_s20 }
   0xd   :  { %p5179_p7 = scmp.lt.s32.totalorder %s5173_s23, %s5173_s23 }
   0xf   :  { %p5180_p8 = por %p5179_p7, %p5178_p6 }
  0x11   :  { %p5181_p9 = pnand %p5180_p8, %p5174_p5 }
  0x13   :  { %5184 = shalt.err (!%p5181_p9)  }
  0x14   :  { %s5268_s0 = smov [#allocation4]  }
  0x15   :  { %16 = dma.vmem_to_smem %s14_s20, 32, %s5268_s0, [#allocation2] }
  0x16   :  { %5237 = dma.done.wait [#allocation2], 64 }
  0x17   :  { %5238 = vsyncadd [#allocation2], 4294967232 }
  0x18   :  { %18 = sfence }
  0x19   :  { %19 = vsyncpa [#allocation6], 0 }
  0x1a   :  { %21 = vsyncpa [#allocation6 + $0x1], 0  ;;  %s5304_s1 = smov 0   ;;  %s5306_s24 = smov 0  }
  0x1b   :  { %s5308_s25 = smov 0   ;;  %s5310_s26 = smov 0  }
  0x1c   :  { %s5312_s27 = smov 0   ;;  %s5314_s28 = smov 0  }
  0x1d LB: > { %s3521_s29 = sadd.s32 4294967295, %s5265_s28   ;;  %s46_s30 = sadd.s32 1, %s5261_s27  ;;  %s5265_s28 = sphi %s5314_s28, %s27_s28   ;;  %s5261_s27 = sphi %s5312_s27, %s11324_s27   ;;  %s5257_s26 = sphi %s5310_s26, %s11323_s26   ;;  %s5253_s25 = sphi %s5308_s25, %s11322_s25   ;;  %s5249_s24 = sphi %s5306_s24, %s11321_s24   ;;  %s5245_s1 = sphi %s5304_s1, %s11320_s1  }
  0x1e   : > { %p48_p10 = scmp.ge.s32.totalorder %s46_s30, 2  ;;  %s83_s5 = sadd.s32 1, %s5253_s25 }
  0x1f   : > { %p90_p11 = scmp.ne.s32.totalorder %s5253_s25, %s5249_s24  ;;  %p91_p12 = scmp.eq.s32.totalorder %s5265_s28, 0 }
  0x20   : > { %s11326_s30 = smov (%p48_p10, %s46_s30), 0  ;;  %p96_p0 = scmp.ne.s32.totalorder %s5249_s24, %s5245_s1 }
  0x21   : > { %p5340_p13 = por %p91_p12, %p90_p11  ;;  %s78_s7 = ssub.s32 %s5261_s27, %s11326_s30 }
  0x22   : > { %p97_p1 = scmp.eq.s32.totalorder %s3521_s29, 0  ;;  %p81_p2 = scmp.eq.s32.totalorder %s78_s7, 0 }
  0x23   : > { %p5100_p4 = scmp.lt.s32.totalorder %s5265_s28, 2  ;;  %s161_s10 = sand.u32 1, %s5253_s25  }
  0x24   : > { %p5347_p3 = por %p97_p1, %p96_p0  ;;  %s5079_s11 = sshll.u32 %s5261_s27, 9 }
  0x25   : > { %s5353_s9 = scalar_select %p81_p2, %s5253_s25, %s83_s5  }
  0x26   : > { %s3525_s12 = sshll.u32 %s161_s10, 5  ;;  %s173_s15 = scalar_lea.hbm %s9500_s3, %s5079_s11 }
  0x27   : > { %s165_s16 = scalar_lea.vmem [#allocation5], %s3525_s12  ;;  %p5362_p5 = pnand %p5100_p4, %p5340_p13 }
  0x28   : > { %s175_s17 = sshll.u32 %s165_s16, 4  ;;  %p3528_p6 = scmp.ge.s32.totalorder %s5265_s28, 1  ;;  %s176_s17 = int_to_ptr.vmem [resolvable:$true] %s175_s17 }
  0x29   : > { %p180_p7 = scmp.lt.s32.totalorder %s5265_s28, 3  ;;  %s162_s19 = scalar_lea.sflag [#allocation6], %s161_s10 }
  0x2a   : > { %p5187_p8 = pneg %p5362_p5  ;;  %s5198_s20 = scalar_lea.vmem %s176_s17, 512 }
  0x2b   : > { %p5199_p9 = scmp.ne.s32.totalorder %s176_s17, %s5198_s20  ;;  %s5269_s21 = smov [#allocation5]  }
  0x2c   : > { %s5203_s22 = sshll.u32 %s5269_s21, 4  ;;  %s5204_s22 = int_to_ptr.vmem [resolvable:$false] %s5203_s22 }
  0x2d   : > { %p5201_p10 = pnand %p5199_p9, %p5187_p8  ;;  %s5205_s23 = scalar_lea.vmem %s5204_s22, 1024 }
  0x2e   : > { %p5206_p12 = scmp.lt.s32.totalorder %s176_s17, %s5204_s22  ;;  %p5207_p13 = scmp.lt.s32.totalorder %s5205_s23, %s5198_s20 }
  0x2f   : > { %p5202_p11 = pneg %p5201_p10 }
  0x30   : > { %p5208_p0 = por %p5207_p13, %p5206_p12 }
  0x32   : > { %p5209_p1 = pnand %p5208_p0, %p5202_p11 }
  0x34   : > { %5212 = shalt.err (!%p5209_p1)
}
  0x35   : > { %5099 = dma.hbm_to_vmem [thread:$0]  (!%p5362_p5), %s173_s15, 512, %s176_s17, %s162_s19  }
  0x36   : > { %p181_p2 = pnand %p3528_p6, %p180_p7 }
  0x38   : > { %184 = sbr.rel (%p181_p2) target bundleno = 1296 (0x510), region = 28 }
  0x3d   : > { %s186_s0 = sand.u32 1, %s5249_s24  }
  0x3e   : > { %s3529_s1 = sshll.u32 %s186_s0, 5  ;;  %s187_s29 = scalar_lea.sflag [#allocation6], %s186_s0 }
  0x3f   : > { %s5377_s5 = scalar_lea.vmem [#allocation5], %s3529_s1 }
  0x40   : > { %5240 = dma.done.wait (%p5347_p3), %s187_s29, 512  }
  0x41   : > { %5242 = vsyncadd (%p5347_p3), %s187_s29, 4294966784  ;;  %p225_p4 = scmp.lt.s32.totalorder %s5257_s26, 1  ;;  %s3534_s6 = sshll.u32 %s5257_s26, 7  ;;  %v338_v25 = vlaneseq  ;;  %vm9503_vm0 = vcmask 1042432  }
  0x42   : > { %s5385_s7 = sld [smem:[#allocation3 + %s3534_s6]]  ;;  %s288_s11 = sadd.s32 1, %s3534_s6 }
  0x43   : > { %s11328_s26 = smov (!%p225_p4, %s5257_s26), 1  ;;  %s5390_s10 = sld [smem:[#allocation4 + %s3534_s6]]  ;;  %v5419_v31 = vshrl.u32 %v338_v25, 7 }
  0x44   : > { %s5080_s12 = sshll.u32 %s11328_s26, 4  ;;  %s305_s15 = sadd.s32 2, %s3534_s6 }
  0x45   : > { %s5396_s8 = scalar_lea.vmem %s9499_s2, %s5080_s12  ;;  %s5398_s16 = sld [smem:[#allocation3 + %s288_s11]]  ;;  %10039 = vst [vmem:[#allocation9_spill] sm:$0xff] %v5419_v31  ;;  %v5422_v35 = vsub.s32 0, %v5419_v31  ;;  %v5425_v36 = vsub.s32 4, %v5419_v31  ;;  %v10117_v31 = vmov 0 }
  0x46   : > { %v5401_v0 = vld [vmem:[%s5396_s8] sm:$0x77]  ;;  %s5404_s17 = sld [smem:[#allocation4 + %s288_s11]]  ;;  %v5432_v42 = vld [vmem:[%s5396_s8 + $0x8] sm:$0x77]  ;;  %s5081_s20 = sshll.u32 %s11328_s26, 7 }
  0x47   : > { %s5407_s18 = sld [smem:[#allocation3 + %s305_s15]]  ;;  %10040 = vst [vmem:[#allocation10_spill] sm:$0xff] %v5422_v35  ;;  %10041 = vst [vmem:[#allocation11_spill] sm:$0xff] %v5425_v36  ;;  %s8987_s22 = scalar_lea.vmem %s9501_s4, %s5081_s20 }
  0x48   : > { %v274_v1 = vstv %s5385_s7  ;;  %s5410_s19 = sld [smem:[#allocation4 + %s305_s15]] }
  0x49   : > { %v275_v2 = vsub.f32 %v5401_v0, %v274_v1  ;;  %v277_v3 = vstv %s5390_s10  ;;  %v276_v44 = vsub.f32 %v5432_v42, %v274_v1 }
  0x4b   : > { %v278_v4 = vmul.f32 %v277_v3, %v275_v2  ;;  %v291_v6 = vstv %s5398_s16  ;;  %v279_v46 = vmul.f32 %v277_v3, %v276_v44 }
  0x4c   : > { %v292_v7 = vsub.f32 %v5401_v0, %v291_v6  ;;  %v294_v8 = vstv %s5404_s17  ;;  %v293_v43 = vsub.f32 %v5432_v42, %v291_v6 }
  0x4d   : > { %v280_v5 = vfloor.f32 %v278_v4  ;;  %v308_v10 = vstv %s5407_s18  ;;  %v281_v49 = vfloor.f32 %v279_v46 }
  0x4e   : > { %v295_v11 = vmul.f32 %v294_v8, %v292_v7  ;;  %v309_v12 = vsub.f32 %v5401_v0, %v308_v10  ;;  %v311_v13 = vstv %s5410_s19  ;;  %v296_v45 = vmul.f32 %v294_v8, %v293_v43 }
  0x4f   : > { %v282_v9 = vmax.f32 %v280_v5, 0.0  ;;  %v310_v48 = vsub.f32 %v5432_v42, %v308_v10  ;;  %v283_v52 = vmax.f32 %v281_v49, 0.0 }
  0x50   : > { %v297_v15 = vfloor.f32 %v295_v11  ;;  %v312_v16 = vmul.f32 %v311_v13, %v309_v12  ;;  %v298_v47 = vfloor.f32 %v296_v45  ;;  %v5270_v11 = vmov 0  }
  0x51   : > { %v284_v14 = vmin.f32 %v282_v9, 9.0  ;;  %v313_v51 = vmul.f32 %v311_v13, %v310_v48  ;;  %v285_v55 = vmin.f32 %v283_v52, 9.0 }
  0x52   : > { %v299_v18 = vmax.f32 %v297_v15, 0.0  ;;  %v314_v19 = vfloor.f32 %v312_v16  ;;  %v300_v50 = vmax.f32 %v298_v47, 0.0 }
  0x53   : > { %v5082_v17 = vtrunc.f32 %v284_v14  ;;  %v315_v54 = vfloor.f32 %v313_v51  ;;  %v5084_v58 = vtrunc.f32 %v285_v55 }
  0x54   : > { %v301_v20 = vmin.f32 %v299_v18, 9.0  ;;  %v316_v21 = vmax.f32 %v314_v19, 0.0  ;;  %v302_v53 = vmin.f32 %v300_v50, 9.0 }
  0x55   : > { %v5083_v22 = vcvt.f32.s32 %v5082_v17  ;;  %v317_v57 = vmax.f32 %v315_v54, 0.0  ;;  %v5085_v61 = vcvt.f32.s32 %v5084_v58 }
  0x56   : > { %v5086_v23 = vtrunc.f32 %v301_v20  ;;  %v318_v24 = vmin.f32 %v316_v21, 9.0  ;;  %v5088_v56 = vtrunc.f32 %v302_v53 }
  0x57   : > { %v322_v29 = vmul.u32 100, %v5083_v22  ;;  %v319_v60 = vmin.f32 %v317_v57, 9.0  ;;  %v323_v2 = vmul.u32 100, %v5085_v61 }
  0x58   : > { %v5087_v26 = vcvt.f32.s32 %v5086_v23  ;;  %v5090_v27 = vtrunc.f32 %v318_v24  ;;  %v5089_v59 = vcvt.f32.s32 %v5088_v56 }
  0x59   : > { %v5092_v62 = vtrunc.f32 %v319_v60 }
  0x5a   : > { %v5091_v28 = vcvt.f32.s32 %v5090_v27  ;;  %v324_v30 = vmul.u32 10, %v5087_v26  ;;  %v325_v63 = vmul.u32 10, %v5089_v59 }
  0x5b   : > { %v5093_v1 = vcvt.f32.s32 %v5092_v62 }
  0x5c   : > { %v3535_v32 = vrot.slane %v324_v30, 9  ;;  %v3537_v33 = vrot.slane %v5091_v28, 10  ;;  %v3536_v3 = vrot.slane %v325_v63, 9 }
  0x5d   : > { %v3538_v5 = vrot.slane %v5093_v1, 10 }
  0x5e   : > { %v330_v34 = vadd.s32 %v3535_v32, %v322_v29  ;;  %v331_v4 = vadd.s32 %v3536_v3, %v323_v2 }
  0x60   : > { %v336_v37 = vadd.s32 %v3537_v33, %v330_v34  ;;  %v337_v6 = vadd.s32 %v3538_v5, %v331_v4 }
  0x62   : > { %v341_v38 = vrot.slane %v336_v37, %v5422_v35  ;;  %v345_v39 = vrot.slane %v336_v37, %v5425_v36  ;;  %v349_v7 = vrot.slane %v337_v6, %v5422_v35  ;;  %v353_v8 = vrot.slane %v337_v6, %v5425_v36 }
  0x64   : > { %v357_v40 = vrot.slane %v341_v38, %v5422_v35  ;;  %v361_v41 = vrot.slane %v345_v39, %v5422_v35  ;;  %v365_v9 = vrot.slane %v349_v7, %v5422_v35  ;;  %v369_v10 = vrot.slane %v353_v8, %v5422_v35 }
  0x66   : > { %370 = vxpose.xlu0.b32.start.end [1/1] (short) %v357_v40, 128  ;;  %402 = vxpose.xlu1.b32.start.end [1/1] (short) %v361_v41, 128 }
  0xa3   : > { %434 = vxpose.xlu0.b32.start.end [1/1] (short) %v365_v9, 128  ;;  %466 = vxpose.xlu1.b32.start.end [1/1] (short) %v369_v10, 128 }
  0xc1   : > { %5155 = vset.pattern.permute.xlu1 %v5270_v11 }
  0xcc   : > { %5154 = vset.pattern.permute.xlu0 %v5270_v11 }
  0xe2   : > { %v5441_v12 = vpop.trf.xlu0  ;;  %v5443_v13 = vpop.trf.xlu1 }
  0xe6   : > { %v5445_v14 = vpop.trf.xlu0  ;;  %v5447_v15 = vpop.trf.xlu1 }
  0xea   : > { %v5449_v16 = vpop.trf.xlu0  ;;  %v5451_v17 = vpop.trf.xlu1 }
  0xee   : > { %v5453_v18 = vpop.trf.xlu0  ;;  %v5455_v19 = vpop.trf.xlu1 }
  0xf2   : > { %v5457_v20 = vpop.trf.xlu0  ;;  %v5459_v21 = vpop.trf.xlu1 }
  0xf6   : > { %v5461_v22 = vpop.trf.xlu0  ;;  %v5463_v23 = vpop.trf.xlu1 }
  0xfa   : > { %v5465_v24 = vpop.trf.xlu0  ;;  %v5467_v26 = vpop.trf.xlu1 }
  0xfe   : > { %v393_v27 = vpop.trf.xlu0  ;;  %v5469_v28 = vpop.trf.xlu1 }
 0x102   : > { %v394_v29 = vpop.trf.xlu0  ;;  %v5471_v30 = vpop.trf.xlu1 }
 0x106   : > { %v395_v32 = vpop.trf.xlu0  ;;  %v5473_v33 = vpop.trf.xlu1 }
 0x10a   : > { %v396_v34 = vpop.trf.xlu0  ;;  %v5475_v38 = vpop.trf.xlu1 }
 0x10e   : > { %v397_v37 = vpop.trf.xlu0  ;;  %v5477_v40 = vpop.trf.xlu1 }
 0x112   : > { %v398_v39 = vpop.trf.xlu0  ;;  %v5479_v44 = vpop.trf.xlu1 }
 0x116   : > { %v399_v41 = vpop.trf.xlu0  ;;  %v5481_v46 = vpop.trf.xlu1 }
 0x11a   : > { %v400_v43 = vpop.trf.xlu0  ;;  %v5485_v49 = vpop.trf.xlu1 }
 0x11b   : > { %578 = vperm.xlu0 %5154, %v400_v43  }
 0x11e   : > { %v401_v45 = vpop.trf.xlu0  ;;  %v433_v51 = vpop.trf.xlu1 }
 0x11f   : > { %575 = vperm.xlu0 %5154, %v399_v41  }
 0x122   : > { %v5483_v47 = vpop.trf.xlu0  ;;  %v5487_v54 = vpop.trf.xlu1 }
 0x126   : > { %v451_v48 = vpop.trf.xlu0  ;;  %v5489_v56 = vpop.trf.xlu1 }
 0x12a   : > { %v452_v50 = vpop.trf.xlu0  ;;  %v5491_v59 = vpop.trf.xlu1 }
 0x12e   : > { %v453_v52 = vpop.trf.xlu0  ;;  %v5493_v61 = vpop.trf.xlu1 }
 0x132   : > { %v454_v53 = vpop.trf.xlu0  ;;  %v5495_v1 = vpop.trf.xlu1 }
 0x136   : > { %v455_v55 = vpop.trf.xlu0  ;;  %v487_v3 = vpop.trf.xlu1 }
 0x13a   : > { %v456_v57 = vpop.trf.xlu0  ;;  %v5497_v6 = vpop.trf.xlu1 }
 0x13e   : > { %v457_v58 = vpop.trf.xlu0  ;;  %v489_v8 = vpop.trf.xlu1 }
 0x142   : > { %v458_v60 = vpop.trf.xlu0  ;;  %v490_v10 = vpop.trf.xlu1 }
 0x146   : > { %v459_v62 = vpop.trf.xlu0  ;;  %v491_v11 = vpop.trf.xlu1 }
 0x14a   : > { %v460_v63 = vpop.trf.xlu0  ;;  %v492_v41 = vpop.trf.xlu1 }
 0x14e   : > { %v461_v2 = vpop.trf.xlu0 }
 0x152   : > { %v462_v4 = vpop.trf.xlu0 }
 0x156   : > { %v463_v5 = vpop.trf.xlu0 }
 0x157   : > { %671 = vperm.xlu0 %5154, %v463_v5  }
 0x15a   : > { %v464_v7 = vpop.trf.xlu0 }
 0x15b   : > { %569 = vperm.xlu0 %5154, %v397_v37   ;;  %674 = vperm.xlu1 %5155, %v464_v7   ;;  %v493_v37 = vpop.trf.xlu1  ;;  %v10072_v7 = vmov 0 }
 0x15e   : > { %v465_v9 = vpop.trf.xlu0 }
 0x15f   : > { %665 = vperm.xlu0 %5154, %v461_v2   ;;  %581 = vperm.xlu1 %5155, %v401_v45   ;;  %v494_v43 = vpop.trf.xlu1  ;;  %v10063_v2 = vmov 0 }
 0x163   : > { %563 = vperm.xlu0 %5154, %v395_v32   ;;  %677 = vperm.xlu1 %5155, %v465_v9   ;;  %v495_v32 = vpop.trf.xlu1 }
 0x167   : > { %659 = vperm.xlu0 %5154, %v459_v62   ;;  %572 = vperm.xlu1 %5155, %v398_v39   ;;  %v10060_v62 = vmov 0 }
 0x16b   : > { %557 = vperm.xlu0 %5154, %v393_v27   ;;  %668 = vperm.xlu1 %5155, %v462_v4   ;;  %v496_v27 = vpop.trf.xlu1 }
 0x16f   : > { %653 = vperm.xlu0 %5154, %v457_v58   ;;  %566 = vperm.xlu1 %5155, %v396_v34   ;;  %v10054_v58 = vmov 0 }
 0x173   : > { %551 = vperm.xlu0 %5154, %v5461_v22   ;;  %662 = vperm.xlu1 %5155, %v460_v63   ;;  %v497_v22 = vpop.trf.xlu1 }
 0x177   : > { %647 = vperm.xlu0 %5154, %v455_v55   ;;  %560 = vperm.xlu1 %5155, %v394_v29  }
 0x17b   : > { %545 = vperm.xlu0 %5154, %v5453_v18   ;;  %656 = vperm.xlu1 %5155, %v458_v60   ;;  %v2521_v18 = vcombine.high %v5401_v0, %v5401_v0 }
 0x17f   : > { %641 = vperm.xlu0 %5154, %v453_v52   ;;  %554 = vperm.xlu1 %5155, %v5465_v24   ;;  %v5539_v24 = vand.u32 127, %v338_v25 }
 0x183   : > { %539 = vperm.xlu0 %5154, %v5445_v14   ;;  %650 = vperm.xlu1 %5155, %v456_v57  }
 0x187   : > { %635 = vperm.xlu0 %5154, %v451_v48   ;;  %548 = vperm.xlu1 %5155, %v5457_v20  }
 0x18b   : > { %629 = vperm.xlu0 %5154, %v433_v51   ;;  %644 = vperm.xlu1 %5155, %v454_v53   ;;  %v10048_v51 = vmov 0 }
 0x18f   : > { %725 = vperm.xlu0 %5154, %v497_v22   ;;  %542 = vperm.xlu1 %5155, %v5449_v16   ;;  %v268_v16 = vld [vmem:[%s5377_s5 + $0x8] sm:$0xff] }
 0x193   : > { %623 = vperm.xlu0 %5154, %v5481_v46   ;;  %638 = vperm.xlu1 %5155, %v452_v50   ;;  %v9643_v50 = vmov 1.0|1.0  }
 0x197   : > { %719 = vperm.xlu0 %5154, %v495_v32   ;;  %536 = vperm.xlu1 %5155, %v5441_v12   ;;  %v5523_v12 = vpop.permute.xlu0 %578  ;;  %v10084_v32 = vmov 0 }
 0x198   : > { %vm839_vm5 = vcmp.eq.s32.totalorder %v5523_v12, %v5539_v24 }
 0x19b   : > { %617 = vperm.xlu0 %5154, %v5477_v40   ;;  %632 = vperm.xlu1 %5155, %v5483_v47   ;;  %v5526_v14 = vpop.permute.xlu0 %575  ;;  %v5555_v40 = vadd.s32 128, %v5539_v24 }
 0x19d   : > { %vm840_vm1 = vcmp.eq.s32.totalorder %v5523_v12, %v5555_v40  ;;  %vm832_vm14 = vcmp.eq.s32.totalorder %v5526_v14, %v5555_v40 }
 0x19f   : > { %713 = vperm.xlu0 %5154, %v493_v37   ;;  %626 = vperm.xlu1 %5155, %v5485_v49  }
 0x1a3   : > { %611 = vperm.xlu0 %5154, %v5473_v33   ;;  %722 = vperm.xlu1 %5155, %v496_v27  }
 0x1a7   : > { %707 = vperm.xlu0 %5154, %v491_v11   ;;  %620 = vperm.xlu1 %5155, %v5479_v44   ;;  %v10078_v11 = vmov 0 }
 0x1ab   : > { %605 = vperm.xlu0 %5154, %v5469_v28   ;;  %716 = vperm.xlu1 %5155, %v494_v43   ;;  %v2522_v28 = vcombine.high %v5432_v42, %v5432_v42  ;;  %v10081_v43 = vmov 0 }
 0x1af   : > { %701 = vperm.xlu0 %5154, %v489_v8   ;;  %614 = vperm.xlu1 %5155, %v5475_v38  }
 0x1b3   : > { %599 = vperm.xlu0 %5154, %v5463_v23   ;;  %710 = vperm.xlu1 %5155, %v492_v41  }
 0x1b7   : > { %695 = vperm.xlu0 %5154, %v487_v3   ;;  %608 = vperm.xlu1 %5155, %v5471_v30   ;;  %v10066_v3 = vmov 0 }
 0x1bb   : > { %593 = vperm.xlu0 %5154, %v5455_v19   ;;  %704 = vperm.xlu1 %5155, %v490_v10   ;;  %v10075_v10 = vmov 0 }
 0x1bf   : > { %689 = vperm.xlu0 %5154, %v5493_v61   ;;  %602 = vperm.xlu1 %5155, %v5467_v26   ;;  %v270_v26 = vld [vmem:[%s5377_s5 + $0x18] sm:$0xff]  ;;  %v10057_v61 = vmov 0 }
 0x1c0   : > { %v2532_v29 = vrot.slane %v270_v26, 5  ;;  %v10096_v26 = vmov 0 }
 0x1c2   : > { %v2541_v25 = vsel %vm9503_vm0, %v2522_v28, %v2532_v29  ;;  %v2545_v39 = vsel %vm9503_vm0, %v2532_v29, 1.0  ;;  %v10099_v28 = vmov 0  ;;  %v10102_v29 = vmov 0 }
 0x1c3   : > { %587 = vperm.xlu0 %5154, %v5447_v15   ;;  %698 = vperm.xlu1 %5155, %v5497_v6   ;;  %v2530_v15 = vrot.slane %v268_v16, 5  ;;  %v5559_v45 = vpack.c.bf16 %v2545_v39, %v2541_v25  ;;  %v10069_v6 = vmov 0  ;;  %v10087_v16 = vmov 0 }
 0x1c5   : > { %v2539_v19 = vsel %vm9503_vm0, %v2521_v18, %v2530_v15  ;;  %v2543_v20 = vsel %vm9503_vm0, %v2530_v15, 1.0  ;;  %10043 = vst [vmem:[#allocation13_spill] sm:$0xff] %v5559_v45  ;;  %v2553_v48 = vunpack.c.l.bf16 %v5559_v45  ;;  %v2557_v49 = vunpack.c.h.bf16 %v5559_v45 }
 0x1c6   : > { %v10090_v18 = vmov 0 }
 0x1c7   : > { %683 = vperm.xlu0 %5154, %v5489_v56   ;;  %596 = vperm.xlu1 %5155, %v5459_v21   ;;  %v5536_v21 = vpack.c.bf16 %v2543_v20, %v2539_v19  ;;  %v2565_v55 = vsub.f32 %v2545_v39, %v2557_v49  ;;  %v10051_v56 = vmov 0  ;;  %v10108_v39 = vmov 0 }
 0x1c9   : > { %10042 = vst [vmem:[#allocation12_spill] sm:$0xff] %v5536_v21  ;;  %v2555_v0 = vunpack.c.h.bf16 %v5536_v21 }
 0x1cb   : > { %692 = vperm.xlu1 %5155, %v5495_v1   ;;  %v2563_v38 = vsub.f32 %v2543_v20, %v2555_v0  ;;  %v10093_v20 = vmov 0 }
 0x1cf   : > { %590 = vperm.xlu1 %5155, %v5451_v17   ;;  %v2551_v17 = vunpack.c.l.bf16 %v5536_v21 }
 0x1d1   : > { %v2559_v34 = vsub.f32 %v2539_v19, %v2551_v17 }
 0x1d2   : > { %v5534_v23 = vpop.permute.xlu0 %671 }
 0x1d3   : > { %686 = vperm.xlu1 %5155, %v5491_v59   ;;  %v5557_v44 = vpack.c.bf16 %v2563_v38, %v2559_v34 }
 0x1d5   : > { %2602 = vmatprep.mubr.bf16.mxu0 %v5557_v44 }
 0x1d6   : > { %v5547_v30 = vpop.permute.xlu1 %674  ;;  %v5549_v33 = vpop.permute.xlu0 %569 }
 0x1d7   : > { %584 = vperm.xlu1 %5155, %v5443_v13   ;;  %v10045_v13 = vmov 0  ;;  %vm1096_vm7 = vcmp.eq.s32.totalorder %v5547_v30, %v5555_v40  ;;  %vm1095_vm11 = vcmp.eq.s32.totalorder %v5547_v30, %v5539_v24 }
 0x1da   : > { %v5561_v46 = vpop.permute.xlu1 %581  ;;  %v5563_v47 = vpop.permute.xlu0 %665 }
 0x1db   : > { %10044 = vst [vmem:[#allocation14_spill] sm:$0xff] %v5561_v46  ;;  %680 = vperm.xlu1 %5155, %v5487_v54   ;;  %vm848_vm2 = vcmp.eq.s32.totalorder %v5561_v46, %v5555_v40  ;;  %vm847_vm3 = vcmp.eq.s32.totalorder %v5561_v46, %v5539_v24  ;;  %v2561_v54 = vsub.f32 %v2541_v25, %v2553_v48  ;;  %v10105_v25 = vmov 0 }
 0x1dc   : > { %vm5573_vm4 = vmpackc.low %vm848_vm2, %vm840_vm1  ;;  %vm831_vm2 = vcmp.eq.s32.totalorder %v5526_v14, %v5539_v24 }
 0x1dd   : > { %v10046_v13 = vsel %vm5573_vm4, 4294967295, %v10045_v13  ;;  %4052 = vmatprep.subr.msk.bf16.mxu0 %vm5573_vm4, %v9643_v50  ;;  %vm5584_vm6 = vmpackc.low %vm847_vm3, %vm839_vm5  ;;  %v5607_v57 = vpack.c.bf16 %v2565_v55, %v2561_v54  ;;  %v10111_v54 = vmov 0  ;;  %v10114_v55 = vmov 0 }
 0x1de   : > { %10047 = vst [vmem:[#allocation15_spill] sm:$0xff] %v10046_v13  ;;  %v10049_v51 = vsel %vm5584_vm6, 4294967295, %v10048_v51  ;;  %v5588_v52 = vpop.permute.xlu1 %677  ;;  %4054 = vmatpush1.bf16.msk.msra.mxu0 %vm5584_vm6, %v9643_v50  ;;  %v5593_v53 = vpop.permute.xlu0 %563 }
 0x1df   : > { %10050 = vst [vmem:[#allocation16_spill] sm:$0xff] %v10049_v51  ;;  %vm1104_vm8 = vcmp.eq.s32.totalorder %v5588_v52, %v5555_v40  ;;  %vm1103_vm9 = vcmp.eq.s32.totalorder %v5588_v52, %v5539_v24  ;;  %2645 = vmatprep.mubr.bf16.mxu1 %v5607_v57  ;;  %v10207_v51 = vmov 0 }
 0x1e0   : > { %vm5601_vm10 = vmpackc.low %vm1104_vm8, %vm1096_vm7  ;;  %vm1088_vm7 = vcmp.eq.s32.totalorder %v5534_v23, %v5555_v40 }
 0x1e1   : > { %v10052_v56 = vsel %vm5601_vm10, 4294967295, %v10051_v56  ;;  %4116 = vmatprep.subr.msk.bf16.mxu1 %vm5601_vm10, %v9643_v50  ;;  %vm5612_vm12 = vmpackc.low %vm1103_vm9, %vm1095_vm11  ;;  %vm1087_vm11 = vcmp.eq.s32.totalorder %v5534_v23, %v5539_v24 }
 0x1e2   : > { %10053 = vst [vmem:[#allocation17_spill] sm:$0xff] %v10052_v56  ;;  %v10055_v58 = vsel %vm5612_vm12, 4294967295, %v10054_v58  ;;  %4118 = vmatpush1.bf16.msk.msra.mxu1 %vm5612_vm12, %v9643_v50  ;;  %v5619_v59 = vpop.permute.xlu1 %572  ;;  %v5621_v60 = vpop.permute.xlu0 %659  ;;  %v10200_v56 = vmov 0 }
 0x1e3   : > { %10056 = vst [vmem:[#allocation18_spill] sm:$0xff] %v10055_v58  ;;  %vm824_vm13 = vcmp.eq.s32.totalorder %v5619_v59, %v5555_v40  ;;  %vm823_vm15 = vcmp.eq.s32.totalorder %v5619_v59, %v5539_v24 }
 0x1e4   : > { %vm5630_vm1 = vmpackc.low %vm832_vm14, %vm824_vm13 }
 0x1e5   : > { %v10058_v61 = vsel %vm5630_vm1, 4294967295, %v10057_v61  ;;  %4056 = vmatprep.subr.msk.bf16.mxu0 %vm5630_vm1, %v9643_v50  ;;  %vm5639_vm3 = vmpackc.low %vm831_vm2, %vm823_vm15  ;;  %vm816_vm15 = vcmp.eq.s32.totalorder %v5549_v33, %v5555_v40 }
 0x1e6   : > { %10059 = vst [vmem:[#allocation19_spill] sm:$0xff] %v10058_v61  ;;  %v10061_v62 = vsel %vm5639_vm3, 4294967295, %v10060_v62  ;;  %v5643_v63 = vpop.permute.xlu1 %668  ;;  %4058 = vmatpush1.bf16.msk.msra.mxu0 %vm5639_vm3, %v9643_v50  ;;  %v5648_v1 = vpop.permute.xlu0 %557 }
 0x1e7   : > { %10062 = vst [vmem:[#allocation20_spill] sm:$0xff] %v10061_v62  ;;  %vm1080_vm5 = vcmp.eq.s32.totalorder %v5643_v63, %v5555_v40  ;;  %vm1079_vm8 = vcmp.eq.s32.totalorder %v5643_v63, %v5539_v24 }
 0x1e8   : > { %vm5656_vm9 = vmpackc.low %vm1088_vm7, %vm1080_vm5  ;;  %vm815_vm7 = vcmp.eq.s32.totalorder %v5549_v33, %v5539_v24 }
 0x1e9   : > { %v10064_v2 = vsel %vm5656_vm9, 4294967295, %v10063_v2  ;;  %4120 = vmatprep.subr.msk.bf16.mxu1 %vm5656_vm9, %v9643_v50  ;;  %vm5665_vm13 = vmpackc.low %vm1087_vm11, %vm1079_vm8 }
 0x1ea   : > { %10065 = vst [vmem:[#allocation21_spill] sm:$0xff] %v10064_v2  ;;  %v10067_v3 = vsel %vm5665_vm13, 4294967295, %v10066_v3  ;;  %v5669_v4 = vpop.permute.xlu1 %566  ;;  %4122 = vmatpush1.bf16.msk.msra.mxu1 %vm5665_vm13, %v9643_v50  ;;  %v5674_v5 = vpop.permute.xlu0 %653  ;;  %v10177_v2 = vmov 0 }
 0x1eb   : > { %10068 = vst [vmem:[#allocation22_spill] sm:$0xff] %v10067_v3  ;;  %vm808_vm14 = vcmp.eq.s32.totalorder %v5669_v4, %v5555_v40  ;;  %vm807_vm2 = vcmp.eq.s32.totalorder %v5669_v4, %v5539_v24 }
 0x1ec   : > { %vm5682_vm5 = vmpackc.low %vm816_vm15, %vm808_vm14  ;;  %vm1072_vm14 = vcmp.eq.s32.totalorder %v5563_v47, %v5555_v40 }
 0x1ed   : > { %v10070_v6 = vsel %vm5682_vm5, 4294967295, %v10069_v6  ;;  %4060 = vmatprep.subr.msk.bf16.mxu0 %vm5682_vm5, %v9643_v50  ;;  %vm5691_vm8 = vmpackc.low %vm815_vm7, %vm807_vm2  ;;  %vm1071_vm7 = vcmp.eq.s32.totalorder %v5563_v47, %v5539_v24 }
 0x1ee   : > { %10071 = vst [vmem:[#allocation23_spill] sm:$0xff] %v10070_v6  ;;  %v10073_v7 = vsel %vm5691_vm8, 4294967295, %v10072_v7  ;;  %v5695_v8 = vpop.permute.xlu1 %662  ;;  %4062 = vmatpush1.bf16.msk.msra.mxu0 %vm5691_vm8, %v9643_v50  ;;  %v5700_v9 = vpop.permute.xlu0 %551 }
 0x1ef   : > { %10074 = vst [vmem:[#allocation24_spill] sm:$0xff] %v10073_v7  ;;  %vm1064_vm11 = vcmp.eq.s32.totalorder %v5695_v8, %v5555_v40  ;;  %vm1063_vm15 = vcmp.eq.s32.totalorder %v5695_v8, %v5539_v24 }
 0x1f0   : > { %vm5708_vm2 = vmpackc.low %vm1072_vm14, %vm1064_vm11  ;;  %vm800_vm14 = vcmp.eq.s32.totalorder %v5593_v53, %v5555_v40 }
 0x1f1   : > { %v10076_v10 = vsel %vm5708_vm2, 4294967295, %v10075_v10  ;;  %4124 = vmatprep.subr.msk.bf16.mxu1 %vm5708_vm2, %v9643_v50  ;;  %vm5717_vm0 = vmpackc.low %vm1071_vm7, %vm1063_vm15  ;;  %vm799_vm2 = vcmp.eq.s32.totalorder %v5593_v53, %v5539_v24 }
 0x1f2   : > { %10077 = vst [vmem:[#allocation25_spill] sm:$0xff] %v10076_v10  ;;  %v10079_v11 = vsel %vm5717_vm0, 4294967295, %v10078_v11  ;;  %v5721_v41 = vpop.permute.xlu1 %560  ;;  %4126 = vmatpush1.bf16.msk.msra.mxu1 %vm5717_vm0, %v9643_v50  ;;  %v5726_v37 = vpop.permute.xlu0 %647  ;;  %v10156_v10 = vmov 0 }
 0x1f3   : > { %10080 = vst [vmem:[#allocation26_spill] sm:$0xff] %v10079_v11  ;;  %vm792_vm11 = vcmp.eq.s32.totalorder %v5721_v41, %v5555_v40  ;;  %vm791_vm15 = vcmp.eq.s32.totalorder %v5721_v41, %v5539_v24 }
 0x1f4   : > { %vm5734_vm7 = vmpackc.low %vm800_vm14, %vm792_vm11  ;;  %vm1056_vm14 = vcmp.eq.s32.totalorder %v5621_v60, %v5555_v40 }
 0x1f5   : > { %v10082_v43 = vsel %vm5734_vm7, 4294967295, %v10081_v43  ;;  %4064 = vmatprep.subr.msk.bf16.mxu0 %vm5734_vm7, %v9643_v50  ;;  %vm5743_vm0 = vmpackc.low %vm799_vm2, %vm791_vm15  ;;  %vm1055_vm7 = vcmp.eq.s32.totalorder %v5621_v60, %v5539_v24 }
 0x1f6   : > { %10083 = vst [vmem:[#allocation27_spill] sm:$0xff] %v10082_v43  ;;  %v10085_v32 = vsel %vm5743_vm0, 4294967295, %v10084_v32  ;;  %v5747_v27 = vpop.permute.xlu1 %656  ;;  %4066 = vmatpush1.bf16.msk.msra.mxu0 %vm5743_vm0, %v9643_v50  ;;  %v5752_v22 = vpop.permute.xlu0 %545 }
 0x1f7   : > { %10086 = vst [vmem:[#allocation28_spill] sm:$0xff] %v10085_v32  ;;  %vm1048_vm11 = vcmp.eq.s32.totalorder %v5747_v27, %v5555_v40  ;;  %vm1047_vm2 = vcmp.eq.s32.totalorder %v5747_v27, %v5539_v24 }
 0x1f8   : > { %vm5760_vm15 = vmpackc.low %vm1056_vm14, %vm1048_vm11  ;;  %vm784_vm14 = vcmp.eq.s32.totalorder %v5648_v1, %v5555_v40 }
 0x1f9   : > { %v10088_v16 = vsel %vm5760_vm15, 4294967295, %v10087_v16  ;;  %4128 = vmatprep.subr.msk.bf16.mxu1 %vm5760_vm15, %v9643_v50  ;;  %vm5769_vm0 = vmpackc.low %vm1055_vm7, %vm1047_vm2  ;;  %vm783_vm15 = vcmp.eq.s32.totalorder %v5648_v1, %v5539_v24 }
 0x1fa   : > { %10089 = vst [vmem:[#allocation29_spill] sm:$0xff] %v10088_v16  ;;  %v10091_v18 = vsel %vm5769_vm0, 4294967295, %v10090_v18  ;;  %v5773_v15 = vpop.permute.xlu1 %554  ;;  %4130 = vmatpush1.bf16.msk.msra.mxu1 %vm5769_vm0, %v9643_v50  ;;  %v5778_v19 = vpop.permute.xlu0 %641 }
 0x1fb   : > { %10092 = vst [vmem:[#allocation30_spill] sm:$0xff] %v10091_v18  ;;  %vm776_vm11 = vcmp.eq.s32.totalorder %v5773_v15, %v5555_v40  ;;  %vm775_vm7 = vcmp.eq.s32.totalorder %v5773_v15, %v5539_v24 }
 0x1fc   : > { %vm5786_vm2 = vmpackc.low %vm784_vm14, %vm776_vm11  ;;  %vm1040_vm14 = vcmp.eq.s32.totalorder %v5674_v5, %v5555_v40 }
 0x1fd   : > { %v10094_v20 = vsel %vm5786_vm2, 4294967295, %v10093_v20  ;;  %4068 = vmatprep.subr.msk.bf16.mxu0 %vm5786_vm2, %v9643_v50  ;;  %vm5795_vm0 = vmpackc.low %vm783_vm15, %vm775_vm7  ;;  %vm1039_vm2 = vcmp.eq.s32.totalorder %v5674_v5, %v5539_v24 }
 0x1fe   : > { %10095 = vst [vmem:[#allocation31_spill] sm:$0xff] %v10094_v20  ;;  %v10097_v26 = vsel %vm5795_vm0, 4294967295, %v10096_v26  ;;  %v5799_v17 = vpop.permute.xlu1 %650  ;;  %4070 = vmatpush1.bf16.msk.msra.mxu0 %vm5795_vm0, %v9643_v50  ;;  %v5804_v0 = vpop.permute.xlu0 %539 }
 0x1ff   : > { %10098 = vst [vmem:[#allocation32_spill] sm:$0xff] %v10097_v26  ;;  %vm1032_vm11 = vcmp.eq.s32.totalorder %v5799_v17, %v5555_v40  ;;  %vm1031_vm15 = vcmp.eq.s32.totalorder %v5799_v17, %v5539_v24 }
 0x200   : > { %vm5812_vm7 = vmpackc.low %vm1040_vm14, %vm1032_vm11  ;;  %vm768_vm14 = vcmp.eq.s32.totalorder %v5700_v9, %v5555_v40 }
 0x201   : > { %v10100_v28 = vsel %vm5812_vm7, 4294967295, %v10099_v28  ;;  %4132 = vmatprep.subr.msk.bf16.mxu1 %vm5812_vm7, %v9643_v50  ;;  %vm5821_vm0 = vmpackc.low %vm1039_vm2, %vm1031_vm15  ;;  %vm767_vm7 = vcmp.eq.s32.totalorder %v5700_v9, %v5539_v24 }
 0x202   : > { %10101 = vst [vmem:[#allocation33_spill] sm:$0xff] %v10100_v28  ;;  %v10103_v29 = vsel %vm5821_vm0, 4294967295, %v10102_v29  ;;  %v5825_v34 = vpop.permute.xlu1 %548  ;;  %4134 = vmatpush1.bf16.msk.msra.mxu1 %vm5821_vm0, %v9643_v50  ;;  %v5830_v38 = vpop.permute.xlu0 %635 }
 0x203   : > { %10104 = vst [vmem:[#allocation34_spill] sm:$0xff] %v10103_v29  ;;  %vm760_vm11 = vcmp.eq.s32.totalorder %v5825_v34, %v5555_v40  ;;  %vm759_vm2 = vcmp.eq.s32.totalorder %v5825_v34, %v5539_v24 }
 0x204   : > { %vm5838_vm15 = vmpackc.low %vm768_vm14, %vm760_vm11  ;;  %vm1024_vm14 = vcmp.eq.s32.totalorder %v5726_v37, %v5555_v40 }
 0x205   : > { %v10106_v25 = vsel %vm5838_vm15, 4294967295, %v10105_v25  ;;  %4072 = vmatprep.subr.msk.bf16.mxu0 %vm5838_vm15, %v9643_v50  ;;  %vm5847_vm0 = vmpackc.low %vm767_vm7, %vm759_vm2  ;;  %vm1023_vm15 = vcmp.eq.s32.totalorder %v5726_v37, %v5539_v24 }
 0x206   : > { %10107 = vst [vmem:[#allocation35_spill] sm:$0xff] %v10106_v25  ;;  %v10109_v39 = vsel %vm5847_vm0, 4294967295, %v10108_v39  ;;  %v5851_v48 = vpop.permute.xlu1 %644  ;;  %4074 = vmatpush1.bf16.msk.msra.mxu0 %vm5847_vm0, %v9643_v50  ;;  %v5856_v49 = vpop.permute.xlu0 %629 }
 0x207   : > { %10110 = vst [vmem:[#allocation36_spill] sm:$0xff] %v10109_v39  ;;  %vm1016_vm11 = vcmp.eq.s32.totalorder %v5851_v48, %v5555_v40  ;;  %vm1015_vm7 = vcmp.eq.s32.totalorder %v5851_v48, %v5539_v24 }
 0x208   : > { %vm5864_vm2 = vmpackc.low %vm1024_vm14, %vm1016_vm11  ;;  %vm752_vm14 = vcmp.eq.s32.totalorder %v5752_v22, %v5555_v40 }
 0x209   : > { %v10112_v54 = vsel %vm5864_vm2, 4294967295, %v10111_v54  ;;  %4136 = vmatprep.subr.msk.bf16.mxu1 %vm5864_vm2, %v9643_v50  ;;  %vm5873_vm0 = vmpackc.low %vm1023_vm15, %vm1015_vm7  ;;  %vm751_vm2 = vcmp.eq.s32.totalorder %v5752_v22, %v5539_v24 }
 0x20a   : > { %10113 = vst [vmem:[#allocation37_spill] sm:$0xff] %v10112_v54  ;;  %v10115_v55 = vsel %vm5873_vm0, 4294967295, %v10114_v55  ;;  %v5877_v36 = vpop.permute.xlu1 %542  ;;  %4138 = vmatpush1.bf16.msk.msra.mxu1 %vm5873_vm0, %v9643_v50  ;;  %v5882_v35 = vpop.permute.xlu0 %725 }
 0x20b   : > { %10116 = vst [vmem:[#allocation38_spill] sm:$0xff] %v10115_v55  ;;  %vm744_vm11 = vcmp.eq.s32.totalorder %v5877_v36, %v5555_v40  ;;  %vm743_vm15 = vcmp.eq.s32.totalorder %v5877_v36, %v5539_v24  ;;  %v10120_v55 = vmov 0 }
 0x20c   : > { %vm5890_vm7 = vmpackc.low %vm752_vm14, %vm744_vm11  ;;  %vm1008_vm14 = vcmp.eq.s32.totalorder %v5778_v19, %v5555_v40 }
 0x20d   : > { %v10118_v31 = vsel %vm5890_vm7, 4294967295, %v10117_v31  ;;  %4076 = vmatprep.subr.msk.bf16.mxu0 %vm5890_vm7, %v9643_v50  ;;  %vm5899_vm0 = vmpackc.low %vm751_vm2, %vm743_vm15  ;;  %vm1007_vm7 = vcmp.eq.s32.totalorder %v5778_v19, %v5539_v24 }
 0x20e   : > { %10119 = vst [vmem:[#allocation39_spill] sm:$0xff] %v10118_v31  ;;  %v10121_v55 = vsel %vm5899_vm0, 4294967295, %v10120_v55  ;;  %v5903_v54 = vpop.permute.xlu1 %638  ;;  %4078 = vmatpush1.bf16.msk.msra.mxu0 %vm5899_vm0, %v9643_v50  ;;  %v5908_v29 = vpop.permute.xlu0 %623  ;;  %v10123_v31 = vmov 0 }
 0x20f   : > { %10122 = vst [vmem:[#allocation40_spill] sm:$0xff] %v10121_v55  ;;  %vm1000_vm11 = vcmp.eq.s32.totalorder %v5903_v54, %v5555_v40  ;;  %vm999_vm2 = vcmp.eq.s32.totalorder %v5903_v54, %v5539_v24  ;;  %v10126_v55 = vmov 0 }
 0x210   : > { %vm5916_vm15 = vmpackc.low %vm1008_vm14, %vm1000_vm11  ;;  %vm736_vm14 = vcmp.eq.s32.totalorder %v5804_v0, %v5555_v40 }
 0x211   : > { %v10124_v31 = vsel %vm5916_vm15, 4294967295, %v10123_v31  ;;  %4140 = vmatprep.subr.msk.bf16.mxu1 %vm5916_vm15, %v9643_v50  ;;  %vm5925_vm0 = vmpackc.low %vm1007_vm7, %vm999_vm2  ;;  %vm735_vm15 = vcmp.eq.s32.totalorder %v5804_v0, %v5539_v24 }
 0x212   : > { %10125 = vst [vmem:[#allocation41_spill] sm:$0xff] %v10124_v31  ;;  %v10127_v55 = vsel %vm5925_vm0, 4294967295, %v10126_v55  ;;  %v5929_v39 = vpop.permute.xlu1 %536  ;;  %4142 = vmatpush1.bf16.msk.msra.mxu1 %vm5925_vm0, %v9643_v50  ;;  %v5934_v28 = vpop.permute.xlu0 %719  ;;  %v10129_v31 = vmov 0 }
 0x213   : > { %10128 = vst [vmem:[#allocation42_spill] sm:$0xff] %v10127_v55  ;;  %vm728_vm11 = vcmp.eq.s32.totalorder %v5929_v39, %v5555_v40  ;;  %vm727_vm7 = vcmp.eq.s32.totalorder %v5929_v39, %v5539_v24  ;;  %v10132_v55 = vmov 0 }
 0x214   : > { %vm5942_vm2 = vmpackc.low %vm736_vm14, %vm728_vm11  ;;  %vm992_vm14 = vcmp.eq.s32.totalorder %v5830_v38, %v5555_v40 }
 0x215   : > { %v10130_v31 = vsel %vm5942_vm2, 4294967295, %v10129_v31  ;;  %4080 = vmatprep.subr.msk.bf16.mxu0 %vm5942_vm2, %v9643_v50  ;;  %vm5951_vm0 = vmpackc.low %vm735_vm15, %vm727_vm7  ;;  %vm991_vm2 = vcmp.eq.s32.totalorder %v5830_v38, %v5539_v24 }
 0x216   : > { %10131 = vst [vmem:[#allocation43_spill] sm:$0xff] %v10130_v31  ;;  %v10133_v55 = vsel %vm5951_vm0, 4294967295, %v10132_v55  ;;  %v5955_v25 = vpop.permute.xlu1 %632  ;;  %4082 = vmatpush1.bf16.msk.msra.mxu0 %vm5951_vm0, %v9643_v50  ;;  %v5960_v18 = vpop.permute.xlu0 %617  ;;  %v10135_v31 = vmov 0 }
 0x217   : > { %10134 = vst [vmem:[#allocation44_spill] sm:$0xff] %v10133_v55  ;;  %vm984_vm11 = vcmp.eq.s32.totalorder %v5955_v25, %v5555_v40  ;;  %vm983_vm15 = vcmp.eq.s32.totalorder %v5955_v25, %v5539_v24  ;;  %v10138_v55 = vmov 0 }
 0x218   : > { %vm5968_vm7 = vmpackc.low %vm992_vm14, %vm984_vm11  ;;  %vm976_vm14 = vcmp.eq.s32.totalorder %v5856_v49, %v5555_v40 }
 0x219   : > { %v10136_v31 = vsel %vm5968_vm7, 4294967295, %v10135_v31  ;;  %4144 = vmatprep.subr.msk.bf16.mxu1 %vm5968_vm7, %v9643_v50  ;;  %vm5977_vm0 = vmpackc.low %vm991_vm2, %vm983_vm15  ;;  %vm975_vm7 = vcmp.eq.s32.totalorder %v5856_v49, %v5539_v24 }
 0x21a   : > { %10137 = vst [vmem:[#allocation45_spill] sm:$0xff] %v10136_v31  ;;  %v10139_v55 = vsel %vm5977_vm0, 4294967295, %v10138_v55  ;;  %v5981_v26 = vpop.permute.xlu1 %626  ;;  %4146 = vmatpush1.bf16.msk.msra.mxu1 %vm5977_vm0, %v9643_v50  ;;  %v5986_v16 = vpop.permute.xlu0 %713  ;;  %v10142_v31 = vmov 0 }
 0x21b   : > { %10140 = vst [vmem:[#allocation46_spill] sm:$0xff] %v10139_v55  ;;  %10141 = vst [vmem:[#allocation47_spill] sm:$0xff] %v5986_v16  ;;  %vm968_vm11 = vcmp.eq.s32.totalorder %v5981_v26, %v5555_v40  ;;  %vm967_vm2 = vcmp.eq.s32.totalorder %v5981_v26, %v5539_v24  ;;  %v10145_v55 = vmov 0 }
 0x21c   : > { %vm5994_vm15 = vmpackc.low %vm976_vm14, %vm968_vm11  ;;  %vm1232_vm14 = vcmp.eq.s32.totalorder %v5882_v35, %v5555_v40 }
 0x21d   : > { %v10143_v31 = vsel %vm5994_vm15, 4294967295, %v10142_v31  ;;  %4084 = vmatprep.subr.msk.bf16.mxu0 %vm5994_vm15, %v9643_v50  ;;  %vm6003_vm0 = vmpackc.low %vm975_vm7, %vm967_vm2  ;;  %vm1231_vm15 = vcmp.eq.s32.totalorder %v5882_v35, %v5539_v24 }
 0x21e   : > { %10144 = vst [vmem:[#allocation48_spill] sm:$0xff] %v10143_v31  ;;  %v10146_v55 = vsel %vm6003_vm0, 4294967295, %v10145_v55  ;;  %v6007_v20 = vpop.permute.xlu1 %722  ;;  %4086 = vmatpush2.bf16.msk.msra.mxu0 %vm6003_vm0, %v9643_v50  ;;  %v6012_v11 = vpop.permute.xlu0 %611  ;;  %v10149_v31 = vmov 0 }
 0x21f   : > { %10147 = vst [vmem:[#allocation49_spill] sm:$0xff] %v10146_v55  ;;  %10148 = vst [vmem:[#allocation50_spill] sm:$0xff] %v6012_v11  ;;  %vm1224_vm11 = vcmp.eq.s32.totalorder %v6007_v20, %v5555_v40  ;;  %vm1223_vm7 = vcmp.eq.s32.totalorder %v6007_v20, %v5539_v24  ;;  %v10152_v55 = vmov 0 }
 0x220   : > { %vm6020_vm2 = vmpackc.low %vm1232_vm14, %vm1224_vm11  ;;  %vm960_vm14 = vcmp.eq.s32.totalorder %v5908_v29, %v5555_v40 }
 0x221   : > { %v10150_v31 = vsel %vm6020_vm2, 4294967295, %v10149_v31  ;;  %4148 = vmatprep.subr.msk.bf16.mxu1 %vm6020_vm2, %v9643_v50  ;;  %vm6029_vm0 = vmpackc.low %vm1231_vm15, %vm1223_vm7  ;;  %vm959_vm7 = vcmp.eq.s32.totalorder %v5908_v29, %v5539_v24 }
 0x222   : > { %10151 = vst [vmem:[#allocation51_spill] sm:$0xff] %v10150_v31  ;;  %v10153_v55 = vsel %vm6029_vm0, 4294967295, %v10152_v55  ;;  %v6033_v32 = vpop.permute.xlu1 %620  ;;  %4150 = vmatpush2.bf16.msk.msra.mxu1 %vm6029_vm0, %v9643_v50  ;;  %v6044_v31 = vpop.permute.xlu0 %707 }
 0x223   : > { %10154 = vst [vmem:[#allocation52_spill] sm:$0xff] %v10153_v55  ;;  %vm952_vm11 = vcmp.eq.s32.totalorder %v6033_v32, %v5555_v40  ;;  %vm951_vm13 = vcmp.eq.s32.totalorder %v6033_v32, %v5539_v24  ;;  %10155 = vst [vmem:[#allocation53_spill] sm:$0xff] %v6044_v31  ;;  %v10159_v55 = vmov 0 }
 0x224   : > { %vm6046_vm15 = vmpackc.low %vm960_vm14, %vm952_vm11  ;;  %vm1216_vm14 = vcmp.eq.s32.totalorder %v5934_v28, %v5555_v40 }
 0x225   : > { %v10157_v10 = vsel %vm6046_vm15, 4294967295, %v10156_v10  ;;  %4088 = vmatprep.subr.msk.bf16.mxu0 %vm6046_vm15, %v9643_v50  ;;  %vm6055_vm0 = vmpackc.low %vm959_vm7, %vm951_vm13  ;;  %vm1215_vm13 = vcmp.eq.s32.totalorder %v5934_v28, %v5539_v24 }
 0x226   : > { %10158 = vst [vmem:[#allocation54_spill] sm:$0xff] %v10157_v10  ;;  %v10160_v55 = vsel %vm6055_vm0, 4294967295, %v10159_v55  ;;  %v6059_v43 = vpop.permute.xlu1 %716  ;;  %4090 = vmatpush2.bf16.msk.msra.mxu0 %vm6055_vm0, %v9643_v50  ;;  %v10162_v10 = vmov 0  ;;  %v6083_v3 = vpop.permute.xlu0 %605 }
 0x227   : > { %10161 = vst [vmem:[#allocation55_spill] sm:$0xff] %v10160_v55  ;;  %vm1208_vm11 = vcmp.eq.s32.totalorder %v6059_v43, %v5555_v40  ;;  %vm1207_vm2 = vcmp.eq.s32.totalorder %v6059_v43, %v5539_v24  ;;  %v10165_v55 = vmov 0  ;;  %10168 = vst [vmem:[#allocation58_spill] sm:$0xff] %v6083_v3 }
 0x228   : > { %vm6070_vm15 = vmpackc.low %vm1216_vm14, %vm1208_vm11  ;;  %vm944_vm14 = vcmp.eq.s32.totalorder %v5960_v18, %v5555_v40 }
 0x229   : > { %v10163_v10 = vsel %vm6070_vm15, 4294967295, %v10162_v10  ;;  %4152 = vmatprep.subr.msk.bf16.mxu1 %vm6070_vm15, %v9643_v50  ;;  %vm6079_vm7 = vmpackc.low %vm1215_vm13, %vm1207_vm2  ;;  %vm943_vm15 = vcmp.eq.s32.totalorder %v5960_v18, %v5539_v24 }
 0x22a   : > { %10164 = vst [vmem:[#allocation56_spill] sm:$0xff] %v10163_v10  ;;  %v10166_v55 = vsel %vm6079_vm7, 4294967295, %v10165_v55  ;;  %v6085_v7 = vpop.permute.xlu1 %614  ;;  %4154 = vmatpush2.bf16.msk.msra.mxu1 %vm6079_vm7, %v9643_v50  ;;  %v10169_v10 = vmov 0 }
 0x22b   : > { %10167 = vst [vmem:[#allocation57_spill] sm:$0xff] %v10166_v55  ;;  %vm936_vm11 = vcmp.eq.s32.totalorder %v6085_v7, %v5555_v40  ;;  %vm935_vm2 = vcmp.eq.s32.totalorder %v6085_v7, %v5539_v24  ;;  %v10172_v55 = vmov 0 }
 0x22c   : > { %vm6096_vm13 = vmpackc.low %vm944_vm14, %vm936_vm11  ;;  %vm1200_vm14 = vcmp.eq.s32.totalorder %v5986_v16, %v5555_v40 }
 0x22d   : > { %v10170_v10 = vsel %vm6096_vm13, 4294967295, %v10169_v10  ;;  %4092 = vmatprep.subr.msk.bf16.mxu0 %vm6096_vm13, %v9643_v50  ;;  %vm6105_vm7 = vmpackc.low %vm943_vm15, %vm935_vm2  ;;  %vm1199_vm2 = vcmp.eq.s32.totalorder %v5986_v16, %v5539_v24 }
 0x22e   : > { %10171 = vst [vmem:[#allocation59_spill] sm:$0xff] %v10170_v10  ;;  %v10173_v55 = vsel %vm6105_vm7, 4294967295, %v10172_v55  ;;  %v6109_v45 = vpop.permute.xlu1 %710  ;;  %4094 = vmatpush2.bf16.msk.msra.mxu0 %vm6105_vm7, %v9643_v50  ;;  %v6120_v10 = vpop.permute.xlu0 %701 }
 0x22f   : > { %10174 = vst [vmem:[#allocation60_spill] sm:$0xff] %v10173_v55  ;;  %10175 = vst [vmem:[#allocation61_spill] sm:$0xff] %v6109_v45  ;;  %vm1192_vm11 = vcmp.eq.s32.totalorder %v6109_v45, %v5555_v40  ;;  %vm1191_vm0 = vcmp.eq.s32.totalorder %v6109_v45, %v5539_v24  ;;  %v10180_v55 = vmov 0 }
 0x230   : > { %10176 = vst [vmem:[#allocation62_spill] sm:$0xff] %v6120_v10  ;;  %vm6122_vm15 = vmpackc.low %vm1200_vm14, %vm1192_vm11  ;;  %vm928_vm14 = vcmp.eq.s32.totalorder %v6012_v11, %v5555_v40 }
 0x231   : > { %v10178_v2 = vsel %vm6122_vm15, 4294967295, %v10177_v2  ;;  %4156 = vmatprep.subr.msk.bf16.mxu1 %vm6122_vm15, %v9643_v50  ;;  %vm6131_vm7 = vmpackc.low %vm1199_vm2, %vm1191_vm0  ;;  %vm927_vm0 = vcmp.eq.s32.totalorder %v6012_v11, %v5539_v24 }
 0x232   : > { %10179 = vst [vmem:[#allocation63_spill] sm:$0xff] %v10178_v2  ;;  %v10181_v55 = vsel %vm6131_vm7, 4294967295, %v10180_v55  ;;  %v6135_v6 = vpop.permute.xlu1 %608  ;;  %4158 = vmatpush2.bf16.msk.msra.mxu1 %vm6131_vm7, %v9643_v50  ;;  %v10184_v2 = vmov 0  ;;  %v6159_v58 = vpop.permute.xlu0 %599  ;;  %vm1183_vm7 = vcmp.eq.s32.totalorder %v6044_v31, %v5539_v24 }
 0x233   : > { %10182 = vst [vmem:[#allocation64_spill] sm:$0xff] %v10181_v55  ;;  %10183 = vst [vmem:[#allocation65_spill] sm:$0xff] %v6135_v6  ;;  %vm920_vm11 = vcmp.eq.s32.totalorder %v6135_v6, %v5555_v40  ;;  %vm919_vm13 = vcmp.eq.s32.totalorder %v6135_v6, %v5539_v24  ;;  %v10187_v55 = vmov 0 }
 0x234   : > { %vm6146_vm15 = vmpackc.low %vm928_vm14, %vm920_vm11  ;;  %10190 = vst [vmem:[#allocation68_spill] sm:$0xff] %v6159_v58  ;;  %vm1184_vm14 = vcmp.eq.s32.totalorder %v6044_v31, %v5555_v40 }
 0x235   : > { %v10185_v2 = vsel %vm6146_vm15, 4294967295, %v10184_v2  ;;  %4096 = vmatprep.subr.msk.bf16.mxu0 %vm6146_vm15, %v9643_v50  ;;  %vm6155_vm2 = vmpackc.low %vm927_vm0, %vm919_vm13 }
 0x236   : > { %10186 = vst [vmem:[#allocation66_spill] sm:$0xff] %v10185_v2  ;;  %v10188_v55 = vsel %vm6155_vm2, 4294967295, %v10187_v55  ;;  %v6161_v62 = vpop.permute.xlu1 %704  ;;  %4098 = vmatpush2.bf16.msk.msra.mxu0 %vm6155_vm2, %v9643_v50  ;;  %v10192_v2 = vmov 0 }
 0x237   : > { %10189 = vst [vmem:[#allocation67_spill] sm:$0xff] %v10188_v55  ;;  %10191 = vst [vmem:[#allocation69_spill] sm:$0xff] %v6161_v62  ;;  %vm1176_vm11 = vcmp.eq.s32.totalorder %v6161_v62, %v5555_v40  ;;  %vm1175_vm13 = vcmp.eq.s32.totalorder %v6161_v62, %v5539_v24  ;;  %v10195_v55 = vmov 0 }
 0x238   : > { %vm6172_vm0 = vmpackc.low %vm1184_vm14, %vm1176_vm11  ;;  %vm912_vm14 = vcmp.eq.s32.totalorder %v6083_v3, %v5555_v40 }
 0x239   : > { %v10193_v2 = vsel %vm6172_vm0, 4294967295, %v10192_v2  ;;  %4160 = vmatprep.subr.msk.bf16.mxu1 %vm6172_vm0, %v9643_v50  ;;  %vm6181_vm2 = vmpackc.low %vm1183_vm7, %vm1175_vm13  ;;  %vm911_vm13 = vcmp.eq.s32.totalorder %v6083_v3, %v5539_v24 }
 0x23a   : > { %10194 = vst [vmem:[#allocation70_spill] sm:$0xff] %v10193_v2  ;;  %v10196_v55 = vsel %vm6181_vm2, 4294967295, %v10195_v55  ;;  %v6185_v21 = vpop.permute.xlu1 %602  ;;  %4162 = vmatpush2.bf16.msk.msra.mxu1 %vm6181_vm2, %v9643_v50  ;;  %v6196_v2 = vpop.permute.xlu0 %695 }
 0x23b   : > { %10197 = vst [vmem:[#allocation71_spill] sm:$0xff] %v10196_v55  ;;  %10198 = vst [vmem:[#allocation72_spill] sm:$0xff] %v6185_v21  ;;  %vm904_vm11 = vcmp.eq.s32.totalorder %v6185_v21, %v5555_v40  ;;  %vm903_vm0 = vcmp.eq.s32.totalorder %v6185_v21, %v5539_v24  ;;  %v10203_v55 = vmov 0 }
 0x23c   : > { %10199 = vst [vmem:[#allocation73_spill] sm:$0xff] %v6196_v2  ;;  %vm6198_vm7 = vmpackc.low %vm912_vm14, %vm904_vm11  ;;  %vm1168_vm14 = vcmp.eq.s32.totalorder %v6120_v10, %v5555_v40 }
 0x23d   : > { %v10201_v56 = vsel %vm6198_vm7, 4294967295, %v10200_v56  ;;  %4100 = vmatprep.subr.msk.bf16.mxu0 %vm6198_vm7, %v9643_v50  ;;  %vm6207_vm2 = vmpackc.low %vm911_vm13, %vm903_vm0  ;;  %vm1167_vm13 = vcmp.eq.s32.totalorder %v6120_v10, %v5539_v24  ;;  %v10215_v10 = vmov 0 }
 0x23e   : > { %10202 = vst [vmem:[#allocation74_spill] sm:$0xff] %v10201_v56  ;;  %v10204_v55 = vsel %vm6207_vm2, 4294967295, %v10203_v55  ;;  %v6211_v61 = vpop.permute.xlu1 %698  ;;  %4102 = vmatpush2.bf16.msk.msra.mxu0 %vm6207_vm2, %v9643_v50  ;;  %v267_v56 = vld [vmem:[%s5377_s5] sm:$0xff]  ;;  %v6236_v13 = vpop.permute.xlu0 %593 }
 0x23f   : > { %10205 = vst [vmem:[#allocation75_spill] sm:$0xff] %v10204_v55  ;;  %10206 = vst [vmem:[#allocation76_spill] sm:$0xff] %v6211_v61  ;;  %vm1160_vm11 = vcmp.eq.s32.totalorder %v6211_v61, %v5555_v40  ;;  %vm1159_vm7 = vcmp.eq.s32.totalorder %v6211_v61, %v5539_v24  ;;  %v10210_v55 = vmov 0  ;;  %v2529_v3 = vrot.slane %v267_v56, 5 }
 0x240   : > { %vm6223_vm0 = vmpackc.low %vm1168_vm14, %vm1160_vm11  ;;  %10213 = vst [vmem:[#allocation79_spill] sm:$0xff] %v6236_v13  ;;  %vm896_vm14 = vcmp.eq.s32.totalorder %v6159_v58, %v5555_v40  ;;  %v10218_v56 = vmov 0 }
 0x241   : > { %v10208_v51 = vsel %vm6223_vm0, 4294967295, %v10207_v51  ;;  %4164 = vmatprep.subr.msk.bf16.mxu1 %vm6223_vm0, %v9643_v50  ;;  %vm6232_vm2 = vmpackc.low %vm1167_vm13, %vm1159_vm7  ;;  %vm895_vm0 = vcmp.eq.s32.totalorder %v6159_v58, %v5539_v24 }
 0x242   : > { %10209 = vst [vmem:[#allocation77_spill] sm:$0xff] %v10208_v51  ;;  %v10211_v55 = vsel %vm6232_vm2, 4294967295, %v10210_v55  ;;  %v6238_v61 = vpop.permute.xlu1 %596  ;;  %4166 = vmatpush2.bf16.msk.msra.mxu1 %vm6232_vm2, %v9643_v50  ;;  %v269_v51 = vld [vmem:[%s5377_s5 + $0x10] sm:$0xff] }
 0x243   : > { %10212 = vst [vmem:[#allocation78_spill] sm:$0xff] %v10211_v55  ;;  %10214 = vst [vmem:[#allocation80_spill] sm:$0xff] %v6238_v61  ;;  %vm888_vm11 = vcmp.eq.s32.totalorder %v6238_v61, %v5555_v40  ;;  %vm887_vm7 = vcmp.eq.s32.totalorder %v6238_v61, %v5539_v24  ;;  %v5160_v61 = vld [vmem:[%s5396_s8] sm:$0x77]  ;;  %v2531_v58 = vrot.slane %v269_v51, 5  ;;  %v10228_v51 = vmov 0 }
 0x244   : > { %vm6250_vm13 = vmpackc.low %vm896_vm14, %vm888_vm11  ;;  %vm10222_vm11 = vcmask 1042432  }
 0x245   : > { %v10216_v10 = vsel %vm6250_vm13, 4294967295, %v10215_v10  ;;  %4104 = vmatprep.subr.msk.bf16.mxu0 %vm6250_vm13, %v9643_v50  ;;  %vm6259_vm2 = vmpackc.low %vm895_vm0, %vm887_vm7  ;;  %v2538_v31 = vsel %vm10222_vm11, %v5160_v61, %v2529_v3  ;;  %vm1152_vm0 = vcmp.eq.s32.totalorder %v6196_v2, %v5555_v40 }
 0x246   : > { %10217 = vst [vmem:[#allocation81_spill] sm:$0xff] %v10216_v10  ;;  %v10219_v56 = vsel %vm6259_vm2, 4294967295, %v10218_v56  ;;  %v6263_v55 = vpop.permute.xlu1 %692  ;;  %4106 = vmatpush2.bf16.msk.msra.mxu0 %vm6259_vm2, %v9643_v50  ;;  %vm10223_vm14 = vmmov %vm10222_vm11  ;;  %v6277_v10 = vpop.permute.xlu0 %689  ;;  %vm1151_vm11 = vcmp.eq.s32.totalorder %v6196_v2, %v5539_v24 }
 0x247   : > { %10220 = vst [vmem:[#allocation82_spill] sm:$0xff] %v10219_v56  ;;  %10221 = vst [vmem:[#allocation83_spill] sm:$0xff] %v6263_v55  ;;  %v2542_v21 = vsel %vm10223_vm14, %v2529_v3, 1.0  ;;  %vm1144_vm15 = vcmp.eq.s32.totalorder %v6263_v55, %v5555_v40  ;;  %vm1143_vm7 = vcmp.eq.s32.totalorder %v6263_v55, %v5539_v24  ;;  %v10225_v56 = vmov 0 }
 0x248   : > { %10224 = vst [vmem:[#allocation84_spill] sm:$0xff] %v6277_v10  ;;  %vm6279_vm13 = vmpackc.low %vm1152_vm0, %vm1144_vm15  ;;  %v6292_v61 = vpack.c.bf16 %v2542_v21, %v2538_v31  ;;  %vm10233_vm15 = vcmask 1042432  }
 0x249   : > { %v10226_v56 = vsel %vm6279_vm13, 4294967295, %v10225_v56  ;;  %4168 = vmatprep.subr.msk.bf16.mxu1 %vm6279_vm13, %v9643_v50  ;;  %vm6288_vm14 = vmpackc.low %vm1151_vm11, %vm1143_vm7  ;;  %v2540_v55 = vsel %vm10233_vm15, %v5432_v42, %v2531_v58  ;;  %vm880_vm7 = vcmp.eq.s32.totalorder %v6236_v13, %v5555_v40  ;;  %v10238_v42 = vmov 0 }
 0x24a   : > { %10227 = vst [vmem:[#allocation85_spill] sm:$0xff] %v10226_v56  ;;  %v10229_v51 = vsel %vm6288_vm14, 4294967295, %v10228_v51  ;;  %10231 = vst [vmem:[#allocation87_spill] sm:$0xff] %v6292_v61  ;;  %v6294_v3 = vpop.permute.xlu1 %590  ;;  %4170 = vmatpush2.bf16.msk.msra.mxu1 %vm6288_vm14, %v9643_v50  ;;  %v10235_v56 = vmov 0  ;;  %vm879_vm14 = vcmp.eq.s32.totalorder %v6236_v13, %v5539_v24  ;;  %v6325_v62 = vpop.permute.xlu0 %587  ;;  %v10247_v13 = vmov 0 }
 0x24b   : > { %10230 = vst [vmem:[#allocation86_spill] sm:$0xff] %v10229_v51  ;;  %10232 = vst [vmem:[#allocation88_spill] sm:$0xff] %v6294_v3  ;;  %vm872_vm13 = vcmp.eq.s32.totalorder %v6294_v3, %v5555_v40  ;;  %vm871_vm11 = vcmp.eq.s32.totalorder %v6294_v3, %v5539_v24  ;;  %v2554_v51 = vunpack.c.h.bf16 %v6292_v61  ;;  %vm863_vm9 = vcmp.eq.s32.totalorder %v6325_v62, %v5539_v24 }
 0x24c   : > { %vm10234_vm0 = vmmov %vm10233_vm15 }
 0x24d   : > { %v2544_v2 = vsel %vm10234_vm0, %v2531_v58, 1.0  ;;  %vm6308_vm2 = vmpackc.low %vm880_vm7, %vm872_vm13  ;;  %v2550_v58 = vunpack.c.l.bf16 %v6292_v61  ;;  %v10243_v61 = vmov 0  ;;  %v2562_v16 = vsub.f32 %v2542_v21, %v2554_v51 }
 0x24e   : > { %v10236_v56 = vsel %vm6308_vm2, 4294967295, %v10235_v56  ;;  %4108 = vmatprep.subr.msk.bf16.mxu0 %vm6308_vm2, %v9643_v50  ;;  %vm6317_vm15 = vmpackc.low %vm879_vm14, %vm871_vm11  ;;  %v6323_v3 = vpack.c.bf16 %v2544_v2, %v2540_v55  ;;  %v6327_v11 = vpop.permute.xlu1 %686  ;;  %vm1136_vm14 = vcmp.eq.s32.totalorder %v6277_v10, %v5555_v40  ;;  %vm1135_vm11 = vcmp.eq.s32.totalorder %v6277_v10, %v5539_v24  ;;  %v6380_v21 = vpop.permute.xlu0 %683 }
 0x24f   : > { %10237 = vst [vmem:[#allocation89_spill] sm:$0xff] %v10236_v56  ;;  %v10239_v42 = vsel %vm6317_vm15, 4294967295, %v10238_v42  ;;  %10242 = vst [vmem:[#allocation92_spill] sm:$0xff] %v6327_v11  ;;  %4110 = vmatpush2.bf16.msk.msra.mxu0 %vm6317_vm15, %v9643_v50  ;;  %v6333_v56 = vadd.s32 384, %v5539_v24  ;;  %vm1128_vm13 = vcmp.eq.s32.totalorder %v6327_v11, %v5555_v40  ;;  %vm1127_vm0 = vcmp.eq.s32.totalorder %v6327_v11, %v5539_v24 }
 0x250   : > { %10240 = vst [vmem:[#allocation90_spill] sm:$0xff] %v10239_v42  ;;  %10241 = vst [vmem:[#allocation91_spill] sm:$0xff] %v6323_v3  ;;  %v6350_v50 = vadd.s32 256, %v5539_v24  ;;  %v10246_v42 = vmov 1.0|1.0   ;;  %v2558_v11 = vsub.f32 %v2538_v31, %v2550_v58  ;;  %v2552_v6 = vunpack.c.l.bf16 %v6323_v3 }
 0x251   : > { %vm6341_vm7 = vmpackc.low %vm1136_vm14, %vm1128_vm13  ;;  %vm850_vm15 = vcmp.eq.s32.totalorder %v5561_v46, %v6333_v56  ;;  %v2556_v10 = vunpack.c.h.bf16 %v6323_v3  ;;  %vm842_vm13 = vcmp.eq.s32.totalorder %v5523_v12, %v6333_v56  ;;  %v10251_v31 = vmov 0 }
 0x252   : > { %v10244_v61 = vsel %vm6341_vm7, 4294967295, %v10243_v61  ;;  %4172 = vmatprep.subr.msk.bf16.mxu1 %vm6341_vm7, %v10246_v42  ;;  %vm6355_vm2 = vmpackc.low %vm1135_vm11, %vm1127_vm0  ;;  %v6361_v45 = vpop.permute.xlu1 %584  ;;  %vm864_vm0 = vcmp.eq.s32.totalorder %v6325_v62, %v5555_v40  ;;  %vm849_vm8 = vcmp.eq.s32.totalorder %v5561_v46, %v6350_v50  ;;  %v10254_v51 = vmov 0 }
 0x253   : > { %10245 = vst [vmem:[#allocation93_spill] sm:$0xff] %v10244_v61  ;;  %v10248_v13 = vsel %vm6355_vm2, 4294967295, %v10247_v13  ;;  %10250 = vst [vmem:[#allocation95_spill] sm:$0xff] %v6361_v45  ;;  %4174 = vmatpush2.bf16.msk.msra.mxu1 %vm6355_vm2, %v10246_v42  ;;  %vm856_vm14 = vcmp.eq.s32.totalorder %v6361_v45, %v5555_v40  ;;  %vm855_vm11 = vcmp.eq.s32.totalorder %v6361_v45, %v5539_v24  ;;  %v10257_v58 = vmov 0 }
 0x254   : > { %10249 = vst [vmem:[#allocation94_spill] sm:$0xff] %v10248_v13  ;;  %vm6374_vm7 = vmpackc.low %vm850_vm15, %vm842_vm13  ;;  %v6397_v3 = vpack.c.bf16 %v2562_v16, %v2558_v11  ;;  %vm841_vm13 = vcmp.eq.s32.totalorder %v5523_v12, %v6350_v50  ;;  %v2560_v13 = vsub.f32 %v2540_v55, %v2552_v6  ;;  %v2564_v61 = vsub.f32 %v2544_v2, %v2556_v10 }
 0x255   : > { %v10252_v31 = vsel %vm6374_vm7, 4294967295, %v10251_v31  ;;  %vm6382_vm2 = vmpackc.low %vm864_vm0, %vm856_vm14  ;;  %v10264_v2 = vmov 0  ;;  %v10267_v6 = vmov 0  ;;  %vm1105_vm12 = vcmp.eq.s32.totalorder %v5588_v52, %v6350_v50 }
 0x256   : > { %10253 = vst [vmem:[#allocation96_spill] sm:$0xff] %v10252_v31  ;;  %v10255_v51 = vsel %vm6382_vm2, 4294967295, %v10254_v51  ;;  %4112 = vmatprep.subr.msk.bf16.mxu0 %vm6382_vm2, %v10246_v42  ;;  %vm6393_vm15 = vmpackc.low %vm863_vm9, %vm855_vm11  ;;  %v6401_v46 = vpop.permute.xlu1 %680  ;;  %vm1098_vm9 = vcmp.eq.s32.totalorder %v5547_v30, %v6333_v56  ;;  %vm1120_vm11 = vcmp.eq.s32.totalorder %v6380_v21, %v5555_v40  ;;  %vm1119_vm2 = vcmp.eq.s32.totalorder %v6380_v21, %v5539_v24  ;;  %v10400_v31 = vld [vmem:[#allocation69_spill] sm:$0xff] }
 0x257   : > { %10256 = vst [vmem:[#allocation97_spill] sm:$0xff] %v10255_v51  ;;  %v10258_v58 = vsel %vm6393_vm15, 4294967295, %v10257_v58  ;;  %4114 = vmatpush2.bf16.msk.msra.mxu0 %vm6393_vm15, %v10246_v42  ;;  %vm6406_vm14 = vmpackc.low %vm849_vm8, %vm841_vm13  ;;  %v10260_v51 = vmov 0  ;;  %vm1112_vm0 = vcmp.eq.s32.totalorder %v6401_v46, %v5555_v40  ;;  %vm1111_vm5 = vcmp.eq.s32.totalorder %v6401_v46, %v5539_v24 }
 0x258   : > { %10259 = vst [vmem:[#allocation98_spill] sm:$0xff] %v10258_v58  ;;  %v10261_v51 = vsel %vm6406_vm14, 4294967295, %v10260_v51  ;;  %4180 = vmatprep.subr.msk.bf16.mxu0 %vm6374_vm7, %v10246_v42  ;;  %vm826_vm8 = vcmp.eq.s32.totalorder %v5619_v59, %v6333_v56  ;;  %vm10263_vm13 = vcmp.eq.s32.totalorder %v5588_v52, %v6333_v56  ;;  %vm6430_vm7 = vmpackc.low %vm1120_vm11, %vm1112_vm0  ;;  %v10270_v40 = vmov 0 }
 0x259   : > { %10262 = vst [vmem:[#allocation99_spill] sm:$0xff] %v10261_v51  ;;  %vm6426_vm15 = vmpackc.low %vm10263_vm13, %vm1098_vm9  ;;  %v10268_v6 = vsel %vm6430_vm7, 4294967295, %v10267_v6  ;;  %4176 = vmatprep.subr.msk.bf16.mxu1 %vm6430_vm7, %v10246_v42  ;;  %vm834_vm0 = vcmp.eq.s32.totalorder %v5526_v14, %v6333_v56  ;;  %v6448_v10 = vpack.c.bf16 %v2564_v61, %v2560_v13  ;;  %vm825_vm11 = vcmp.eq.s32.totalorder %v5619_v59, %v6350_v50 }
 0x25a   : > { %v10265_v2 = vsel %vm6426_vm15, 4294967295, %v10264_v2  ;;  %10269 = vst [vmem:[#allocation101_spill] sm:$0xff] %v10268_v6  ;;  %2603 = vmatmul.mubr.bf16.vlgmr.msra.gmra.mxu0 %v6397_v3  ;;  %vm6442_vm9 = vmpackc.low %vm1119_vm2, %vm1111_vm5  ;;  %v10273_v11 = vmov 0  ;;  %vm1097_vm2 = vcmp.eq.s32.totalorder %v5547_v30, %v6350_v50  ;;  %vm1082_vm13 = vcmp.eq.s32.totalorder %v5643_v63, %v6333_v56 }
 0x25b   : > { %10266 = vst [vmem:[#allocation100_spill] sm:$0xff] %v10265_v2  ;;  %v10271_v40 = vsel %vm6442_vm9, 4294967295, %v10270_v40  ;;  %4178 = vmatpush2.bf16.msk.msra.mxu1 %vm6442_vm9, %v10246_v42  ;;  %4182 = vmatpush1.bf16.msk.msra.mxu0 %vm6406_vm14, %v10246_v42  ;;  %vm6458_vm5 = vmpackc.low %vm834_vm0, %vm826_vm8  ;;  %vm833_vm8 = vcmp.eq.s32.totalorder %v5526_v14, %v6350_v50  ;;  %v10276_v13 = vmov 0  ;;  %vm810_vm14 = vcmp.eq.s32.totalorder %v5669_v4, %v6333_v56  ;;  %v10384_v2 = vld [vmem:[#allocation61_spill] sm:$0xff] }
 0x25c   : > { %10272 = vst [vmem:[#allocation102_spill] sm:$0xff] %v10271_v40  ;;  %v10274_v11 = vsel %vm6458_vm5, 4294967295, %v10273_v11  ;;  %4184 = vmatprep.subr.msk.bf16.mxu0 %vm6458_vm5, %v10246_v42  ;;  %4244 = vmatprep.subr.msk.bf16.mxu1 %vm6426_vm15, %v10246_v42  ;;  %vm6477_vm0 = vmpackc.low %vm1105_vm12, %vm1097_vm2  ;;  %v10279_v16 = vmov 0  ;;  %vm1090_vm15 = vcmp.eq.s32.totalorder %v5534_v23, %v6333_v56  ;;  %vm1081_vm5 = vcmp.eq.s32.totalorder %v5643_v63, %v6350_v50 }
 0x25d   : > { %10275 = vst [vmem:[#allocation103_spill] sm:$0xff] %v10274_v11  ;;  %v10277_v13 = vsel %vm6477_vm0, 4294967295, %v10276_v13  ;;  %vm6483_vm9 = vmpackc.low %vm833_vm8, %vm825_vm11  ;;  %2688 = vmatprep.mubr.bf16.mxu0 %v5557_v44  ;;  %vm818_vm12 = vcmp.eq.s32.totalorder %v5549_v33, %v6333_v56  ;;  %v10282_v55 = vmov 0  ;;  %vm809_vm11 = vcmp.eq.s32.totalorder %v5669_v4, %v6350_v50 }
 0x25e   : > { %10278 = vst [vmem:[#allocation104_spill] sm:$0xff] %v10277_v13  ;;  %v10280_v16 = vsel %vm6483_vm9, 4294967295, %v10279_v16  ;;  %2646 = vmatmul.mubr.bf16.vlgmr.msra.gmra.mxu1 %v6448_v10  ;;  %vm6495_vm2 = vmpackc.low %vm1090_vm15, %vm1082_vm13  ;;  %v10285_v61 = vmov 0  ;;  %vm1089_vm15 = vcmp.eq.s32.totalorder %v5534_v23, %v6350_v50  ;;  %vm1066_vm13 = vcmp.eq.s32.totalorder %v5695_v8, %v6333_v56 }
 0x25f   : > { %10281 = vst [vmem:[#allocation105_spill] sm:$0xff] %v10280_v16  ;;  %v10283_v55 = vsel %vm6495_vm2, 4294967295, %v10282_v55  ;;  %4186 = vmatpush1.bf16.msk.msra.mxu0 %vm6483_vm9, %v10246_v42  ;;  %4246 = vmatpush1.bf16.msk.msra.mxu1 %vm6477_vm0, %v10246_v42  ;;  %vm6507_vm8 = vmpackc.low %vm818_vm12, %vm810_vm14  ;;  %vm817_vm14 = vcmp.eq.s32.totalorder %v5549_v33, %v6350_v50  ;;  %v10288_v13 = vmov 0  ;;  %vm794_vm0 = vcmp.eq.s32.totalorder %v5721_v41, %v6333_v56 }
 0x260   : > { %10284 = vst [vmem:[#allocation106_spill] sm:$0xff] %v10283_v55  ;;  %v10286_v61 = vsel %vm6507_vm8, 4294967295, %v10285_v61  ;;  %4188 = vmatprep.subr.msk.bf16.mxu0 %vm6507_vm8, %v10246_v42  ;;  %4248 = vmatprep.subr.msk.bf16.mxu1 %vm6495_vm2, %v10246_v42  ;;  %vm6523_vm12 = vmpackc.low %vm1089_vm15, %vm1081_vm5  ;;  %v10291_v16 = vmov 0  ;;  %vm1074_vm8 = vcmp.eq.s32.totalorder %v5563_v47, %v6333_v56  ;;  %vm1065_vm2 = vcmp.eq.s32.totalorder %v5695_v8, %v6350_v50 }
 0x261   : > { %10287 = vst [vmem:[#allocation107_spill] sm:$0xff] %v10286_v61  ;;  %v10289_v13 = vsel %vm6523_vm12, 4294967295, %v10288_v13  ;;  %vm6529_vm9 = vmpackc.low %vm817_vm14, %vm809_vm11  ;;  %2731 = vmatprep.mubr.bf16.mxu1 %v5607_v57  ;;  %vm802_vm5 = vcmp.eq.s32.totalorder %v5593_v53, %v6333_v56  ;;  %v10294_v55 = vmov 0  ;;  %vm793_vm11 = vcmp.eq.s32.totalorder %v5721_v41, %v6350_v50 }
 0x262   : > { %10290 = vst [vmem:[#allocation108_spill] sm:$0xff] %v10289_v13  ;;  %v10292_v16 = vsel %vm6529_vm9, 4294967295, %v10291_v16  ;;  %vm6540_vm15 = vmpackc.low %vm1074_vm8, %vm1066_vm13  ;;  %v10297_v61 = vmov 0  ;;  %vm1073_vm8 = vcmp.eq.s32.totalorder %v5563_v47, %v6350_v50  ;;  %vm1050_vm13 = vcmp.eq.s32.totalorder %v5747_v27, %v6333_v56 }
 0x263   : > { %10293 = vst [vmem:[#allocation109_spill] sm:$0xff] %v10292_v16  ;;  %v10295_v55 = vsel %vm6540_vm15, 4294967295, %v10294_v55  ;;  %4190 = vmatpush1.bf16.msk.msra.mxu0 %vm6529_vm9, %v10246_v42  ;;  %4250 = vmatpush1.bf16.msk.msra.mxu1 %vm6523_vm12, %v10246_v42  ;;  %vm6552_vm14 = vmpackc.low %vm802_vm5, %vm794_vm0  ;;  %vm801_vm0 = vcmp.eq.s32.totalorder %v5593_v53, %v6350_v50  ;;  %v10300_v13 = vmov 0  ;;  %vm778_vm12 = vcmp.eq.s32.totalorder %v5773_v15, %v6333_v56 }
 0x264   : > { %10296 = vst [vmem:[#allocation110_spill] sm:$0xff] %v10295_v55  ;;  %v10298_v61 = vsel %vm6552_vm14, 4294967295, %v10297_v61  ;;  %4192 = vmatprep.subr.msk.bf16.mxu0 %vm6552_vm14, %v10246_v42  ;;  %4252 = vmatprep.subr.msk.bf16.mxu1 %vm6540_vm15, %v10246_v42  ;;  %vm6568_vm5 = vmpackc.low %vm1073_vm8, %vm1065_vm2  ;;  %v10303_v16 = vmov 0  ;;  %vm1058_vm14 = vcmp.eq.s32.totalorder %v5621_v60, %v6333_v56  ;;  %vm1049_vm15 = vcmp.eq.s32.totalorder %v5747_v27, %v6350_v50 }
 0x265   : > { %10299 = vst [vmem:[#allocation111_spill] sm:$0xff] %v10298_v61  ;;  %v10301_v13 = vsel %vm6568_vm5, 4294967295, %v10300_v13  ;;  %vm6574_vm9 = vmpackc.low %vm801_vm0, %vm793_vm11  ;;  %vm786_vm7 = vcmp.eq.s32.totalorder %v5648_v1, %v6333_v56  ;;  %v10306_v55 = vmov 0  ;;  %vm777_vm8 = vcmp.eq.s32.totalorder %v5773_v15, %v6350_v50 }
 0x266   : > { %10302 = vst [vmem:[#allocation112_spill] sm:$0xff] %v10301_v13  ;;  %v10304_v16 = vsel %vm6574_vm9, 4294967295, %v10303_v16  ;;  %vm6584_vm2 = vmpackc.low %vm1058_vm14, %vm1050_vm13  ;;  %v10309_v61 = vmov 0  ;;  %vm1057_vm14 = vcmp.eq.s32.totalorder %v5621_v60, %v6350_v50  ;;  %vm1034_vm13 = vcmp.eq.s32.totalorder %v5799_v17, %v6333_v56 }
 0x267   : > { %10305 = vst [vmem:[#allocation113_spill] sm:$0xff] %v10304_v16  ;;  %v10307_v55 = vsel %vm6584_vm2, 4294967295, %v10306_v55  ;;  %4194 = vmatpush1.bf16.msk.msra.mxu0 %vm6574_vm9, %v10246_v42  ;;  %4254 = vmatpush1.bf16.msk.msra.mxu1 %vm6568_vm5, %v10246_v42  ;;  %vm6596_vm11 = vmpackc.low %vm786_vm7, %vm778_vm12  ;;  %vm785_vm7 = vcmp.eq.s32.totalorder %v5648_v1, %v6350_v50  ;;  %v10312_v13 = vmov 0  ;;  %vm762_vm0 = vcmp.eq.s32.totalorder %v5825_v34, %v6333_v56 }
 0x268   : > { %10308 = vst [vmem:[#allocation114_spill] sm:$0xff] %v10307_v55  ;;  %v10310_v61 = vsel %vm6596_vm11, 4294967295, %v10309_v61  ;;  %4196 = vmatprep.subr.msk.bf16.mxu0 %vm6596_vm11, %v10246_v42  ;;  %4256 = vmatprep.subr.msk.bf16.mxu1 %vm6584_vm2, %v10246_v42  ;;  %vm6612_vm12 = vmpackc.low %vm1057_vm14, %vm1049_vm15  ;;  %v10315_v16 = vmov 0  ;;  %vm1042_vm11 = vcmp.eq.s32.totalorder %v5674_v5, %v6333_v56  ;;  %vm1033_vm2 = vcmp.eq.s32.totalorder %v5799_v17, %v6350_v50 }
 0x269   : > { %10311 = vst [vmem:[#allocation115_spill] sm:$0xff] %v10310_v61  ;;  %v10313_v13 = vsel %vm6612_vm12, 4294967295, %v10312_v13  ;;  %vm6618_vm5 = vmpackc.low %vm785_vm7, %vm777_vm8  ;;  %vm770_vm9 = vcmp.eq.s32.totalorder %v5700_v9, %v6333_v56  ;;  %v10318_v55 = vmov 0  ;;  %vm761_vm14 = vcmp.eq.s32.totalorder %v5825_v34, %v6350_v50 }
 0x26a   : > { %10314 = vst [vmem:[#allocation116_spill] sm:$0xff] %v10313_v13  ;;  %v10316_v16 = vsel %vm6618_vm5, 4294967295, %v10315_v16  ;;  %vm6628_vm15 = vmpackc.low %vm1042_vm11, %vm1034_vm13  ;;  %v10321_v61 = vmov 0  ;;  %vm1041_vm11 = vcmp.eq.s32.totalorder %v5674_v5, %v6350_v50  ;;  %vm1018_vm13 = vcmp.eq.s32.totalorder %v5851_v48, %v6333_v56 }
 0x26b   : > { %10317 = vst [vmem:[#allocation117_spill] sm:$0xff] %v10316_v16  ;;  %v10319_v55 = vsel %vm6628_vm15, 4294967295, %v10318_v55  ;;  %4198 = vmatpush1.bf16.msk.msra.mxu0 %vm6618_vm5, %v10246_v42  ;;  %4258 = vmatpush1.bf16.msk.msra.mxu1 %vm6612_vm12, %v10246_v42  ;;  %vm6640_vm8 = vmpackc.low %vm770_vm9, %vm762_vm0  ;;  %vm769_vm9 = vcmp.eq.s32.totalorder %v5700_v9, %v6350_v50  ;;  %v10324_v13 = vmov 0  ;;  %vm746_vm0 = vcmp.eq.s32.totalorder %v5877_v36, %v6333_v56 }
 0x26c   : > { %10320 = vst [vmem:[#allocation118_spill] sm:$0xff] %v10319_v55  ;;  %v10322_v61 = vsel %vm6640_vm8, 4294967295, %v10321_v61  ;;  %4200 = vmatprep.subr.msk.bf16.mxu0 %vm6640_vm8, %v10246_v42  ;;  %4260 = vmatprep.subr.msk.bf16.mxu1 %vm6628_vm15, %v10246_v42  ;;  %vm6656_vm7 = vmpackc.low %vm1041_vm11, %vm1033_vm2  ;;  %v10327_v16 = vmov 0  ;;  %vm1026_vm8 = vcmp.eq.s32.totalorder %v5726_v37, %v6333_v56  ;;  %vm1017_vm15 = vcmp.eq.s32.totalorder %v5851_v48, %v6350_v50 }
 0x26d   : > { %10323 = vst [vmem:[#allocation119_spill] sm:$0xff] %v10322_v61  ;;  %v10325_v13 = vsel %vm6656_vm7, 4294967295, %v10324_v13  ;;  %vm6662_vm12 = vmpackc.low %vm769_vm9, %vm761_vm14  ;;  %vm754_vm5 = vcmp.eq.s32.totalorder %v5752_v22, %v6333_v56  ;;  %v10330_v55 = vmov 0  ;;  %vm745_vm11 = vcmp.eq.s32.totalorder %v5877_v36, %v6350_v50 }
 0x26e   : > { %10326 = vst [vmem:[#allocation120_spill] sm:$0xff] %v10325_v13  ;;  %v10328_v16 = vsel %vm6662_vm12, 4294967295, %v10327_v16  ;;  %vm6672_vm2 = vmpackc.low %vm1026_vm8, %vm1018_vm13  ;;  %v10333_v61 = vmov 0  ;;  %vm1025_vm8 = vcmp.eq.s32.totalorder %v5726_v37, %v6350_v50  ;;  %vm1002_vm13 = vcmp.eq.s32.totalorder %v5903_v54, %v6333_v56 }
 0x26f   : > { %10329 = vst [vmem:[#allocation121_spill] sm:$0xff] %v10328_v16  ;;  %v10331_v55 = vsel %vm6672_vm2, 4294967295, %v10330_v55  ;;  %4202 = vmatpush1.bf16.msk.msra.mxu0 %vm6662_vm12, %v10246_v42  ;;  %4262 = vmatpush1.bf16.msk.msra.mxu1 %vm6656_vm7, %v10246_v42  ;;  %vm6684_vm14 = vmpackc.low %vm754_vm5, %vm746_vm0  ;;  %vm753_vm5 = vcmp.eq.s32.totalorder %v5752_v22, %v6350_v50  ;;  %v10336_v13 = vmov 0  ;;  %vm730_vm0 = vcmp.eq.s32.totalorder %v5929_v39, %v6333_v56 }
 0x270   : > { %10332 = vst [vmem:[#allocation122_spill] sm:$0xff] %v10331_v55  ;;  %v10334_v61 = vsel %vm6684_vm14, 4294967295, %v10333_v61  ;;  %4204 = vmatprep.subr.msk.bf16.mxu0 %vm6684_vm14, %v10246_v42  ;;  %4264 = vmatprep.subr.msk.bf16.mxu1 %vm6672_vm2, %v10246_v42  ;;  %vm6700_vm9 = vmpackc.low %vm1025_vm8, %vm1017_vm15  ;;  %v10339_v16 = vmov 0  ;;  %vm1010_vm14 = vcmp.eq.s32.totalorder %v5778_v19, %v6333_v56  ;;  %vm1001_vm2 = vcmp.eq.s32.totalorder %v5903_v54, %v6350_v50 }
 0x271   : > { %10335 = vst [vmem:[#allocation123_spill] sm:$0xff] %v10334_v61  ;;  %v10337_v13 = vsel %vm6700_vm9, 4294967295, %v10336_v13  ;;  %vm6706_vm7 = vmpackc.low %vm753_vm5, %vm745_vm11  ;;  %vm738_vm12 = vcmp.eq.s32.totalorder %v5804_v0, %v6333_v56  ;;  %v10342_v55 = vmov 0  ;;  %vm729_vm8 = vcmp.eq.s32.totalorder %v5929_v39, %v6350_v50 }
 0x272   : > { %10338 = vst [vmem:[#allocation124_spill] sm:$0xff] %v10337_v13  ;;  %v10340_v16 = vsel %vm6706_vm7, 4294967295, %v10339_v16  ;;  %vm6716_vm15 = vmpackc.low %vm1010_vm14, %vm1002_vm13  ;;  %v10345_v61 = vmov 0  ;;  %vm1009_vm14 = vcmp.eq.s32.totalorder %v5778_v19, %v6350_v50  ;;  %vm986_vm13 = vcmp.eq.s32.totalorder %v5955_v25, %v6333_v56 }
 0x273   : > { %10341 = vst [vmem:[#allocation125_spill] sm:$0xff] %v10340_v16  ;;  %v10343_v55 = vsel %vm6716_vm15, 4294967295, %v10342_v55  ;;  %4206 = vmatpush1.bf16.msk.msra.mxu0 %vm6706_vm7, %v10246_v42  ;;  %4266 = vmatpush1.bf16.msk.msra.mxu1 %vm6700_vm9, %v10246_v42  ;;  %vm6728_vm11 = vmpackc.low %vm738_vm12, %vm730_vm0  ;;  %vm737_vm12 = vcmp.eq.s32.totalorder %v5804_v0, %v6350_v50  ;;  %v10348_v13 = vmov 0  ;;  %vm970_vm0 = vcmp.eq.s32.totalorder %v5981_v26, %v6333_v56 }
 0x274   : > { %10344 = vst [vmem:[#allocation126_spill] sm:$0xff] %v10343_v55  ;;  %v10346_v61 = vsel %vm6728_vm11, 4294967295, %v10345_v61  ;;  %4208 = vmatprep.subr.msk.bf16.mxu0 %vm6728_vm11, %v10246_v42  ;;  %4268 = vmatprep.subr.msk.bf16.mxu1 %vm6716_vm15, %v10246_v42  ;;  %vm6744_vm5 = vmpackc.low %vm1009_vm14, %vm1001_vm2  ;;  %v10351_v16 = vmov 0  ;;  %vm994_vm11 = vcmp.eq.s32.totalorder %v5830_v38, %v6333_v56  ;;  %vm985_vm15 = vcmp.eq.s32.totalorder %v5955_v25, %v6350_v50 }
 0x275   : > { %10347 = vst [vmem:[#allocation127_spill] sm:$0xff] %v10346_v61  ;;  %v10349_v13 = vsel %vm6744_vm5, 4294967295, %v10348_v13  ;;  %vm6750_vm9 = vmpackc.low %vm737_vm12, %vm729_vm8  ;;  %vm978_vm7 = vcmp.eq.s32.totalorder %v5856_v49, %v6333_v56  ;;  %v10354_v55 = vmov 0  ;;  %vm969_vm14 = vcmp.eq.s32.totalorder %v5981_v26, %v6350_v50 }
 0x276   : > { %10350 = vst [vmem:[#allocation128_spill] sm:$0xff] %v10349_v13  ;;  %v10352_v16 = vsel %vm6750_vm9, 4294967295, %v10351_v16  ;;  %vm6760_vm2 = vmpackc.low %vm994_vm11, %vm986_vm13  ;;  %v10357_v61 = vmov 0  ;;  %vm993_vm11 = vcmp.eq.s32.totalorder %v5830_v38, %v6350_v50  ;;  %vm1226_vm13 = vcmp.eq.s32.totalorder %v6007_v20, %v6333_v56 }
 0x277   : > { %10353 = vst [vmem:[#allocation129_spill] sm:$0xff] %v10352_v16  ;;  %v10355_v55 = vsel %vm6760_vm2, 4294967295, %v10354_v55  ;;  %4210 = vmatpush1.bf16.msk.msra.mxu0 %vm6750_vm9, %v10246_v42  ;;  %4270 = vmatpush1.bf16.msk.msra.mxu1 %vm6744_vm5, %v10246_v42  ;;  %vm6772_vm8 = vmpackc.low %vm978_vm7, %vm970_vm0  ;;  %vm977_vm7 = vcmp.eq.s32.totalorder %v5856_v49, %v6350_v50  ;;  %v10360_v13 = vmov 0  ;;  %vm954_vm0 = vcmp.eq.s32.totalorder %v6033_v32, %v6333_v56 }
 0x278   : > { %10356 = vst [vmem:[#allocation130_spill] sm:$0xff] %v10355_v55  ;;  %v10358_v61 = vsel %vm6772_vm8, 4294967295, %v10357_v61  ;;  %4212 = vmatprep.subr.msk.bf16.mxu0 %vm6772_vm8, %v10246_v42  ;;  %4272 = vmatprep.subr.msk.bf16.mxu1 %vm6760_vm2, %v10246_v42  ;;  %vm6788_vm12 = vmpackc.low %vm993_vm11, %vm985_vm15  ;;  %v10363_v16 = vmov 0  ;;  %vm1234_vm8 = vcmp.eq.s32.totalorder %v5882_v35, %v6333_v56  ;;  %vm1225_vm2 = vcmp.eq.s32.totalorder %v6007_v20, %v6350_v50 }
 0x279   : > { %10359 = vst [vmem:[#allocation131_spill] sm:$0xff] %v10358_v61  ;;  %v10361_v13 = vsel %vm6788_vm12, 4294967295, %v10360_v13  ;;  %vm6794_vm5 = vmpackc.low %vm977_vm7, %vm969_vm14  ;;  %vm962_vm9 = vcmp.eq.s32.totalorder %v5908_v29, %v6333_v56  ;;  %v10366_v55 = vmov 0  ;;  %vm953_vm11 = vcmp.eq.s32.totalorder %v6033_v32, %v6350_v50 }
 0x27a   : > { %10362 = vst [vmem:[#allocation132_spill] sm:$0xff] %v10361_v13  ;;  %v10364_v16 = vsel %vm6794_vm5, 4294967295, %v10363_v16  ;;  %vm6804_vm15 = vmpackc.low %vm1234_vm8, %vm1226_vm13  ;;  %v10369_v61 = vmov 0  ;;  %vm1233_vm8 = vcmp.eq.s32.totalorder %v5882_v35, %v6350_v50  ;;  %vm1210_vm13 = vcmp.eq.s32.totalorder %v6059_v43, %v6333_v56 }
 0x27b   : > { %10365 = vst [vmem:[#allocation133_spill] sm:$0xff] %v10364_v16  ;;  %v10367_v55 = vsel %vm6804_vm15, 4294967295, %v10366_v55  ;;  %4214 = vmatpush2.bf16.msk.msra.mxu0 %vm6794_vm5, %v10246_v42  ;;  %4274 = vmatpush1.bf16.msk.msra.mxu1 %vm6788_vm12, %v10246_v42  ;;  %vm6816_vm14 = vmpackc.low %vm962_vm9, %vm954_vm0  ;;  %vm961_vm9 = vcmp.eq.s32.totalorder %v5908_v29, %v6350_v50  ;;  %v10372_v13 = vmov 0  ;;  %vm938_vm0 = vcmp.eq.s32.totalorder %v6085_v7, %v6333_v56 }
 0x27c   : > { %10368 = vst [vmem:[#allocation134_spill] sm:$0xff] %v10367_v55  ;;  %v10370_v61 = vsel %vm6816_vm14, 4294967295, %v10369_v61  ;;  %4216 = vmatprep.subr.msk.bf16.mxu0 %vm6816_vm14, %v10246_v42  ;;  %4276 = vmatprep.subr.msk.bf16.mxu1 %vm6804_vm15, %v10246_v42  ;;  %vm6832_vm7 = vmpackc.low %vm1233_vm8, %vm1225_vm2  ;;  %v10375_v16 = vmov 0  ;;  %vm1218_vm14 = vcmp.eq.s32.totalorder %v5934_v28, %v6333_v56  ;;  %vm1209_vm15 = vcmp.eq.s32.totalorder %v6059_v43, %v6350_v50 }
 0x27d   : > { %10371 = vst [vmem:[#allocation135_spill] sm:$0xff] %v10370_v61  ;;  %v10373_v13 = vsel %vm6832_vm7, 4294967295, %v10372_v13  ;;  %vm6838_vm12 = vmpackc.low %vm961_vm9, %vm953_vm11  ;;  %vm946_vm5 = vcmp.eq.s32.totalorder %v5960_v18, %v6333_v56  ;;  %v10378_v55 = vmov 0  ;;  %vm937_vm8 = vcmp.eq.s32.totalorder %v6085_v7, %v6350_v50 }
 0x27e   : > { %10374 = vst [vmem:[#allocation136_spill] sm:$0xff] %v10373_v13  ;;  %v10376_v16 = vsel %vm6838_vm12, 4294967295, %v10375_v16  ;;  %vm6848_vm2 = vmpackc.low %vm1218_vm14, %vm1210_vm13  ;;  %v10381_v61 = vmov 0  ;;  %vm1217_vm14 = vcmp.eq.s32.totalorder %v5934_v28, %v6350_v50  ;;  %vm1194_vm13 = vcmp.eq.s32.totalorder %v10384_v2, %v6333_v56 }
 0x27f   : > { %10377 = vst [vmem:[#allocation137_spill] sm:$0xff] %v10376_v16  ;;  %v10379_v55 = vsel %vm6848_vm2, 4294967295, %v10378_v55  ;;  %4218 = vmatpush2.bf16.msk.msra.mxu0 %vm6838_vm12, %v10246_v42  ;;  %4278 = vmatpush2.bf16.msk.msra.mxu1 %vm6832_vm7, %v10246_v42  ;;  %vm6860_vm11 = vmpackc.low %vm946_vm5, %vm938_vm0  ;;  %vm945_vm5 = vcmp.eq.s32.totalorder %v5960_v18, %v6350_v50  ;;  %v10385_v13 = vmov 0  ;;  %v10388_v16 = vld [vmem:[#allocation65_spill] sm:$0xff]  ;;  %v10389_v11 = vmov 0 }
 0x280   : > { %10380 = vst [vmem:[#allocation138_spill] sm:$0xff] %v10379_v55  ;;  %v10382_v61 = vsel %vm6860_vm11, 4294967295, %v10381_v61  ;;  %4220 = vmatprep.subr.msk.bf16.mxu0 %vm6860_vm11, %v10246_v42  ;;  %4280 = vmatprep.subr.msk.bf16.mxu1 %vm6848_vm2, %v10246_v42  ;;  %vm6876_vm9 = vmpackc.low %vm1217_vm14, %vm1209_vm15  ;;  %vm922_vm0 = vcmp.eq.s32.totalorder %v10388_v16, %v6333_v56  ;;  %vm1193_vm2 = vcmp.eq.s32.totalorder %v10384_v2, %v6350_v50  ;;  %v10393_v55 = vld [vmem:[#allocation50_spill] sm:$0xff]  ;;  %v10394_v51 = vmov 0 }
 0x281   : > { %10383 = vst [vmem:[#allocation139_spill] sm:$0xff] %v10382_v61  ;;  %v10386_v13 = vsel %vm6876_vm9, 4294967295, %v10385_v13  ;;  %vm6882_vm7 = vmpackc.low %vm945_vm5, %vm937_vm8  ;;  %v10392_v61 = vld [vmem:[#allocation47_spill] sm:$0xff]  ;;  %vm930_vm12 = vcmp.eq.s32.totalorder %v10393_v55, %v6333_v56  ;;  %vm921_vm14 = vcmp.eq.s32.totalorder %v10388_v16, %v6350_v50  ;;  %v10397_v40 = vmov 0 }
 0x282   : > { %10387 = vst [vmem:[#allocation140_spill] sm:$0xff] %v10386_v13  ;;  %v10390_v11 = vsel %vm6882_vm7, 4294967295, %v10389_v11  ;;  %vm1202_vm11 = vcmp.eq.s32.totalorder %v10392_v61, %v6333_v56  ;;  %vm6904_vm8 = vmpackc.low %vm930_vm12, %vm922_vm0  ;;  %vm929_vm12 = vcmp.eq.s32.totalorder %v10393_v55, %v6350_v50  ;;  %v10401_v13 = vmov 0 }
 0x283   : > { %10391 = vst [vmem:[#allocation141_spill] sm:$0xff] %v10390_v11  ;;  %vm6892_vm15 = vmpackc.low %vm1202_vm11, %vm1194_vm13  ;;  %4222 = vmatpush2.bf16.msk.msra.mxu0 %vm6882_vm7, %v10246_v42  ;;  %4282 = vmatpush2.bf16.msk.msra.mxu1 %vm6876_vm9, %v10246_v42  ;;  %v10398_v40 = vsel %vm6904_vm8, 4294967295, %v10397_v40  ;;  %vm1201_vm11 = vcmp.eq.s32.totalorder %v10392_v61, %v6350_v50  ;;  %vm1178_vm13 = vcmp.eq.s32.totalorder %v10400_v31, %v6333_v56  ;;  %v10404_v11 = vld [vmem:[#allocation72_spill] sm:$0xff]  ;;  %v10405_v6 = vmov 0 }
 0x284   : > { %v10395_v51 = vsel %vm6892_vm15, 4294967295, %v10394_v51  ;;  %10399 = vst [vmem:[#allocation143_spill] sm:$0xff] %v10398_v40  ;;  %4224 = vmatprep.subr.msk.bf16.mxu0 %vm6904_vm8, %v10246_v42  ;;  %4284 = vmatprep.subr.msk.bf16.mxu1 %vm6892_vm15, %v10246_v42  ;;  %vm6920_vm5 = vmpackc.low %vm1201_vm11, %vm1193_vm2  ;;  %vm906_vm0 = vcmp.eq.s32.totalorder %v10404_v11, %v6333_v56  ;;  %v10408_v40 = vld [vmem:[#allocation53_spill] sm:$0xff]  ;;  %vm1177_vm15 = vcmp.eq.s32.totalorder %v10400_v31, %v6350_v50  ;;  %v10410_v58 = vmov 0  ;;  %v10416_v61 = vld [vmem:[#allocation76_spill] sm:$0xff] }
 0x285   : > { %10396 = vst [vmem:[#allocation142_spill] sm:$0xff] %v10395_v51  ;;  %v10402_v13 = vsel %vm6920_vm5, 4294967295, %v10401_v13  ;;  %vm6926_vm9 = vmpackc.low %vm929_vm12, %vm921_vm14  ;;  %vm1186_vm8 = vcmp.eq.s32.totalorder %v10408_v40, %v6333_v56  ;;  %v10409_v51 = vld [vmem:[#allocation58_spill] sm:$0xff]  ;;  %vm905_vm11 = vcmp.eq.s32.totalorder %v10404_v11, %v6350_v50  ;;  %v10413_v31 = vmov 0  ;;  %v10432_v11 = vld [vmem:[#allocation83_spill] sm:$0xff] }
 0x286   : > { %10403 = vst [vmem:[#allocation144_spill] sm:$0xff] %v10402_v13  ;;  %v10406_v6 = vsel %vm6926_vm9, 4294967295, %v10405_v6  ;;  %vm914_vm7 = vcmp.eq.s32.totalorder %v10409_v51, %v6333_v56  ;;  %vm6936_vm2 = vmpackc.low %vm1186_vm8, %vm1178_vm13  ;;  %vm1185_vm8 = vcmp.eq.s32.totalorder %v10408_v40, %v6350_v50  ;;  %vm1162_vm13 = vcmp.eq.s32.totalorder %v10416_v61, %v6333_v56 }
 0x287   : > { %10407 = vst [vmem:[#allocation145_spill] sm:$0xff] %v10406_v6  ;;  %v10411_v58 = vsel %vm6936_vm2, 4294967295, %v10410_v58  ;;  %4226 = vmatpush2.bf16.msk.msra.mxu0 %vm6926_vm9, %v10246_v42  ;;  %4286 = vmatpush2.bf16.msk.msra.mxu1 %vm6920_vm5, %v10246_v42  ;;  %vm6948_vm14 = vmpackc.low %vm914_vm7, %vm906_vm0  ;;  %vm913_vm7 = vcmp.eq.s32.totalorder %v10409_v51, %v6350_v50  ;;  %v10417_v13 = vmov 0  ;;  %v10420_v6 = vld [vmem:[#allocation80_spill] sm:$0xff]  ;;  %v10421_v40 = vmov 0 }
 0x288   : > { %10412 = vst [vmem:[#allocation146_spill] sm:$0xff] %v10411_v58  ;;  %v10414_v31 = vsel %vm6948_vm14, 4294967295, %v10413_v31  ;;  %4228 = vmatprep.subr.msk.bf16.mxu0 %vm6948_vm14, %v10246_v42  ;;  %4288 = vmatprep.subr.msk.bf16.mxu1 %vm6936_vm2, %v10246_v42  ;;  %vm6964_vm12 = vmpackc.low %vm1185_vm8, %vm1177_vm15  ;;  %vm890_vm0 = vcmp.eq.s32.totalorder %v10420_v6, %v6333_v56  ;;  %vm1161_vm2 = vcmp.eq.s32.totalorder %v10416_v61, %v6350_v50  ;;  %v10425_v58 = vld [vmem:[#allocation68_spill] sm:$0xff]  ;;  %v10426_v51 = vmov 0 }
 0x289   : > { %10415 = vst [vmem:[#allocation147_spill] sm:$0xff] %v10414_v31  ;;  %v10418_v13 = vsel %vm6964_vm12, 4294967295, %v10417_v13  ;;  %vm6970_vm5 = vmpackc.low %vm913_vm7, %vm905_vm11  ;;  %v10424_v31 = vld [vmem:[#allocation62_spill] sm:$0xff]  ;;  %vm898_vm9 = vcmp.eq.s32.totalorder %v10425_v58, %v6333_v56  ;;  %vm889_vm8 = vcmp.eq.s32.totalorder %v10420_v6, %v6350_v50  ;;  %v10429_v61 = vmov 0  ;;  %v10448_v6 = vld [vmem:[#allocation92_spill] sm:$0xff] }
 0x28a   : > { %10419 = vst [vmem:[#allocation148_spill] sm:$0xff] %v10418_v13  ;;  %v10422_v40 = vsel %vm6970_vm5, 4294967295, %v10421_v40  ;;  %vm1170_vm14 = vcmp.eq.s32.totalorder %v10424_v31, %v6333_v56  ;;  %vm6992_vm11 = vmpackc.low %vm898_vm9, %vm890_vm0  ;;  %vm897_vm9 = vcmp.eq.s32.totalorder %v10425_v58, %v6350_v50  ;;  %v10433_v13 = vmov 0 }
 0x28b   : > { %10423 = vst [vmem:[#allocation149_spill] sm:$0xff] %v10422_v40  ;;  %vm6980_vm15 = vmpackc.low %vm1170_vm14, %vm1162_vm13  ;;  %4230 = vmatpush2.bf16.msk.msra.mxu0 %vm6970_vm5, %v10246_v42  ;;  %4290 = vmatpush2.bf16.msk.msra.mxu1 %vm6964_vm12, %v10246_v42  ;;  %v10430_v61 = vsel %vm6992_vm11, 4294967295, %v10429_v61  ;;  %vm1169_vm14 = vcmp.eq.s32.totalorder %v10424_v31, %v6350_v50  ;;  %vm1146_vm13 = vcmp.eq.s32.totalorder %v10432_v11, %v6333_v56  ;;  %v10436_v40 = vld [vmem:[#allocation88_spill] sm:$0xff]  ;;  %v10437_v31 = vmov 0 }
 0x28c   : > { %v10427_v51 = vsel %vm6980_vm15, 4294967295, %v10426_v51  ;;  %10431 = vst [vmem:[#allocation151_spill] sm:$0xff] %v10430_v61  ;;  %4232 = vmatprep.subr.msk.bf16.mxu0 %vm6992_vm11, %v10246_v42  ;;  %4292 = vmatprep.subr.msk.bf16.mxu1 %vm6980_vm15, %v10246_v42  ;;  %vm7008_vm7 = vmpackc.low %vm1169_vm14, %vm1161_vm2  ;;  %vm874_vm0 = vcmp.eq.s32.totalorder %v10436_v40, %v6333_v56  ;;  %v10440_v61 = vld [vmem:[#allocation73_spill] sm:$0xff]  ;;  %vm1145_vm15 = vcmp.eq.s32.totalorder %v10432_v11, %v6350_v50  ;;  %v10442_v58 = vmov 0 }
 0x28d   : > { %10428 = vst [vmem:[#allocation150_spill] sm:$0xff] %v10427_v51  ;;  %v10434_v13 = vsel %vm7008_vm7, 4294967295, %v10433_v13  ;;  %vm7014_vm12 = vmpackc.low %vm897_vm9, %vm889_vm8  ;;  %vm1154_vm11 = vcmp.eq.s32.totalorder %v10440_v61, %v6333_v56  ;;  %v10441_v51 = vld [vmem:[#allocation79_spill] sm:$0xff]  ;;  %vm873_vm14 = vcmp.eq.s32.totalorder %v10436_v40, %v6350_v50  ;;  %v10445_v11 = vmov 0 }
 0x28e   : > { %10435 = vst [vmem:[#allocation152_spill] sm:$0xff] %v10434_v13  ;;  %v10438_v31 = vsel %vm7014_vm12, 4294967295, %v10437_v31  ;;  %vm882_vm5 = vcmp.eq.s32.totalorder %v10441_v51, %v6333_v56  ;;  %vm7024_vm2 = vmpackc.low %vm1154_vm11, %vm1146_vm13  ;;  %vm1153_vm11 = vcmp.eq.s32.totalorder %v10440_v61, %v6350_v50  ;;  %vm1130_vm13 = vcmp.eq.s32.totalorder %v10448_v6, %v6333_v56 }
 0x28f   : > { %10439 = vst [vmem:[#allocation153_spill] sm:$0xff] %v10438_v31  ;;  %v10443_v58 = vsel %vm7024_vm2, 4294967295, %v10442_v58  ;;  %4234 = vmatpush2.bf16.msk.msra.mxu0 %vm7014_vm12, %v10246_v42  ;;  %4294 = vmatpush2.bf16.msk.msra.mxu1 %vm7008_vm7, %v10246_v42  ;;  %vm7036_vm8 = vmpackc.low %vm882_vm5, %vm874_vm0  ;;  %vm881_vm5 = vcmp.eq.s32.totalorder %v10441_v51, %v6350_v50  ;;  %v10449_v13 = vmov 0  ;;  %vm858_vm0 = vcmp.eq.s32.totalorder %v6361_v45, %v6333_v56 }
 0x290   : > { %10444 = vst [vmem:[#allocation154_spill] sm:$0xff] %v10443_v58  ;;  %v10446_v11 = vsel %vm7036_vm8, 4294967295, %v10445_v11  ;;  %4236 = vmatprep.subr.msk.bf16.mxu0 %vm7036_vm8, %v10246_v42  ;;  %4296 = vmatprep.subr.msk.bf16.mxu1 %vm7024_vm2, %v10246_v42  ;;  %vm7052_vm9 = vmpackc.low %vm1153_vm11, %vm1145_vm15  ;;  %v10452_v31 = vmov 0  ;;  %vm1129_vm2 = vcmp.eq.s32.totalorder %v10448_v6, %v6350_v50  ;;  %vm866_vm12 = vcmp.eq.s32.totalorder %v6325_v62, %v6333_v56 }
 0x291   : > { %10447 = vst [vmem:[#allocation155_spill] sm:$0xff] %v10446_v11  ;;  %v10450_v13 = vsel %vm7052_vm9, 4294967295, %v10449_v13  ;;  %vm7058_vm7 = vmpackc.low %vm881_vm5, %vm873_vm14  ;;  %v10455_v11 = vld [vmem:[#allocation84_spill] sm:$0xff]  ;;  %v10456_v58 = vmov 0  ;;  %vm857_vm11 = vcmp.eq.s32.totalorder %v6361_v45, %v6350_v50  ;;  %v7075_v61 = vadd.s32 640, %v5539_v24 }
 0x292   : > { %10451 = vst [vmem:[#allocation156_spill] sm:$0xff] %v10450_v13  ;;  %v10453_v31 = vsel %vm7058_vm7, 4294967295, %v10452_v31  ;;  %vm1138_vm8 = vcmp.eq.s32.totalorder %v10455_v11, %v6333_v56  ;;  %vm7083_vm14 = vmpackc.low %vm866_vm12, %vm858_vm0  ;;  %v10459_v6 = vmov 0  ;;  %vm865_vm12 = vcmp.eq.s32.totalorder %v6325_v62, %v6350_v50 }
 0x293   : > { %10454 = vst [vmem:[#allocation157_spill] sm:$0xff] %v10453_v31  ;;  %vm7068_vm15 = vmpackc.low %vm1138_vm8, %vm1130_vm13  ;;  %4238 = vmatpush2.bf16.msk.msra.mxu0 %vm7058_vm7, %v10246_v42  ;;  %4298 = vmatpush2.bf16.msk.msra.mxu1 %vm7052_vm9, %v10246_v42  ;;  %v10460_v6 = vsel %vm7083_vm14, 4294967295, %v10459_v6  ;;  %vm1137_vm8 = vcmp.eq.s32.totalorder %v10455_v11, %v6350_v50  ;;  %vm1114_vm13 = vcmp.eq.s32.totalorder %v6401_v46, %v6333_v56  ;;  %v10462_v13 = vmov 0  ;;  %v10465_v31 = vld [vmem:[#allocation14_spill] sm:$0xff] }
 0x294   : > { %v10457_v58 = vsel %vm7068_vm15, 4294967295, %v10456_v58  ;;  %10461 = vst [vmem:[#allocation159_spill] sm:$0xff] %v10460_v6  ;;  %4240 = vmatprep.subr.msk.bf16.mxu0 %vm7083_vm14, %v10246_v42  ;;  %4300 = vmatprep.subr.msk.bf16.mxu1 %vm7068_vm15, %v10246_v42  ;;  %vm7099_vm5 = vmpackc.low %vm1137_vm8, %vm1129_vm2  ;;  %vm852_vm0 = vcmp.eq.s32.totalorder %v10465_v31, %v7075_v61  ;;  %v7106_v11 = vadd.s32 512, %v5539_v24  ;;  %v10466_v6 = vmov 0 }
 0x295   : > { %10458 = vst [vmem:[#allocation158_spill] sm:$0xff] %v10457_v58  ;;  %v10463_v13 = vsel %vm7099_vm5, 4294967295, %v10462_v13  ;;  %vm7108_vm9 = vmpackc.low %vm865_vm12, %vm857_vm11  ;;  %vm1122_vm15 = vcmp.eq.s32.totalorder %v6380_v21, %v6333_v56  ;;  %vm1113_vm14 = vcmp.eq.s32.totalorder %v6401_v46, %v6350_v50  ;;  %v10469_v58 = vmov 0 }
 0x296   : > { %10464 = vst [vmem:[#allocation160_spill] sm:$0xff] %v10463_v13  ;;  %v10467_v6 = vsel %vm7108_vm9, 4294967295, %v10466_v6  ;;  %vm7116_vm2 = vmpackc.low %vm1122_vm15, %vm1114_vm13  ;;  %vm844_vm8 = vcmp.eq.s32.totalorder %v5523_v12, %v7075_v61  ;;  %vm851_vm7 = vcmp.eq.s32.totalorder %v10465_v31, %v7106_v11  ;;  %v10472_v56 = vmov 0 }
 0x297   : > { %10468 = vst [vmem:[#allocation14_spill] sm:$0xff] %v10467_v6  ;;  %v10470_v58 = vsel %vm7116_vm2, 4294967295, %v10469_v58  ;;  %4242 = vmatpush2.bf16.msk.msra.mxu0 %vm7108_vm9, %v10246_v42  ;;  %4302 = vmatpush2.bf16.msk.msra.mxu1 %vm7099_vm5, %v10246_v42  ;;  %vm7130_vm11 = vmpackc.low %vm852_vm0, %vm844_vm8  ;;  %vm1121_vm15 = vcmp.eq.s32.totalorder %v6380_v21, %v6350_v50  ;;  %vm828_vm13 = vcmp.eq.s32.totalorder %v5619_v59, %v7075_v61  ;;  %v10475_v13 = vmov 0 }
 0x298   : > { %10471 = vst [vmem:[#allocation161_spill] sm:$0xff] %v10470_v58  ;;  %v10473_v56 = vsel %vm7130_vm11, 4294967295, %v10472_v56  ;;  %4304 = vmatprep.subr.msk.bf16.mxu1 %vm7116_vm2, %v10246_v42  ;;  %4308 = vmatprep.subr.msk.bf16.mxu0 %vm7130_vm11, %v10246_v42  ;;  %vm7144_vm12 = vmpackc.low %vm1121_vm15, %vm1113_vm14  ;;  %vm843_vm0 = vcmp.eq.s32.totalorder %v5523_v12, %v7106_v11  ;;  %vm1108_vm8 = vcmp.eq.s32.totalorder %v5588_v52, %v7075_v61  ;;  %v10478_v50 = vmov 0 }
 0x299   : > { %10474 = vst [vmem:[#allocation162_spill] sm:$0xff] %v10473_v56  ;;  %v10476_v13 = vsel %vm7144_vm12, 4294967295, %v10475_v13  ;;  %vm7152_vm5 = vmpackc.low %vm851_vm7, %vm843_vm0  ;;  %vm836_vm2 = vcmp.eq.s32.totalorder %v5526_v14, %v7075_v61  ;;  %vm827_vm11 = vcmp.eq.s32.totalorder %v5619_v59, %v7106_v11  ;;  %v10481_v56 = vmov 0 }
 0x29a   : > { %10477 = vst [vmem:[#allocation163_spill] sm:$0xff] %v10476_v13  ;;  %v10479_v50 = vsel %vm7152_vm5, 4294967295, %v10478_v50  ;;  %2689 = vmatmul.mubr.bf16.vlgmr.msra.gmra.mxu0 %v6397_v3  ;;  %vm7161_vm14 = vmpackc.low %vm836_vm2, %vm828_vm13  ;;  %vm1100_vm15 = vcmp.eq.s32.totalorder %v5547_v30, %v7075_v61  ;;  %vm1107_vm7 = vcmp.eq.s32.totalorder %v5588_v52, %v7106_v11  ;;  %v10484_v58 = vmov 0 }
 0x29b   : > { %10480 = vst [vmem:[#allocation164_spill] sm:$0xff] %v10479_v50  ;;  %v10482_v56 = vsel %vm7161_vm14, 4294967295, %v10481_v56  ;;  %4306 = vmatpush2.bf16.msk.msra.mxu1 %vm7144_vm12, %v10246_v42  ;;  %4310 = vmatpush1.bf16.msk.msra.mxu0 %vm7152_vm5, %v10246_v42  ;;  %vm7175_vm0 = vmpackc.low %vm1108_vm8, %vm1100_vm15  ;;  %vm835_vm2 = vcmp.eq.s32.totalorder %v5526_v14, %v7106_v11  ;;  %vm812_vm13 = vcmp.eq.s32.totalorder %v5669_v4, %v7075_v61  ;;  %v10487_v50 = vmov 0 }
 0x29c   : > { %10483 = vst [vmem:[#allocation165_spill] sm:$0xff] %v10482_v56  ;;  %v10485_v58 = vsel %vm7175_vm0, 4294967295, %v10484_v58  ;;  %4312 = vmatprep.subr.msk.bf16.mxu0 %vm7161_vm14, %v10246_v42  ;;  %4372 = vmatprep.subr.msk.bf16.mxu1 %vm7175_vm0, %v10246_v42  ;;  %vm7189_vm12 = vmpackc.low %vm835_vm2, %vm827_vm11  ;;  %vm1099_vm8 = vcmp.eq.s32.totalorder %v5547_v30, %v7106_v11  ;;  %vm1084_vm15 = vcmp.eq.s32.totalorder %v5643_v63, %v7075_v61  ;;  %v10490_v13 = vmov 0 }
 0x29d   : > { %10486 = vst [vmem:[#allocation166_spill] sm:$0xff] %v10485_v58  ;;  %v10488_v50 = vsel %vm7189_vm12, 4294967295, %v10487_v50  ;;  %vm7197_vm5 = vmpackc.low %vm1107_vm7, %vm1099_vm8  ;;  %vm820_vm14 = vcmp.eq.s32.totalorder %v5549_v33, %v7075_v61  ;;  %vm811_vm0 = vcmp.eq.s32.totalorder %v5669_v4, %v7106_v11  ;;  %2774 = vmatprep.mubr.bf16.mxu0 %v5557_v44  ;;  %v10493_v58 = vmov 0 }
 0x29e   : > { %10489 = vst [vmem:[#allocation167_spill] sm:$0xff] %v10488_v50  ;;  %v10491_v13 = vsel %vm7197_vm5, 4294967295, %v10490_v13  ;;  %2732 = vmatmul.mubr.bf16.vlgmr.msra.gmra.mxu1 %v6448_v10  ;;  %vm7207_vm11 = vmpackc.low %vm820_vm14, %vm812_vm13  ;;  %vm1092_vm7 = vcmp.eq.s32.totalorder %v5534_v23, %v7075_v61  ;;  %vm1083_vm2 = vcmp.eq.s32.totalorder %v5643_v63, %v7106_v11  ;;  %v10496_v56 = vmov 0 }
 0x29f   : > { %10492 = vst [vmem:[#allocation168_spill] sm:$0xff] %v10491_v13  ;;  %v10494_v58 = vsel %vm7207_vm11, 4294967295, %v10493_v58  ;;  %4314 = vmatpush1.bf16.msk.msra.mxu0 %vm7189_vm12, %v10246_v42  ;;  %4374 = vmatpush1.bf16.msk.msra.mxu1 %vm7197_vm5, %v10246_v42  ;;  %vm7221_vm8 = vmpackc.low %vm1092_vm7, %vm1084_vm15  ;;  %vm819_vm14 = vcmp.eq.s32.totalorder %v5549_v33, %v7106_v11  ;;  %vm796_vm13 = vcmp.eq.s32.totalorder %v5721_v41, %v7075_v61  ;;  %v10499_v13 = vmov 0 }
 0x2a0   : > { %10495 = vst [vmem:[#allocation169_spill] sm:$0xff] %v10494_v58  ;;  %v10497_v56 = vsel %vm7221_vm8, 4294967295, %v10496_v56  ;;  %4316 = vmatprep.subr.msk.bf16.mxu0 %vm7207_vm11, %v10246_v42  ;;  %4376 = vmatprep.subr.msk.bf16.mxu1 %vm7221_vm8, %v10246_v42  ;;  %vm7235_vm12 = vmpackc.low %vm819_vm14, %vm811_vm0  ;;  %vm1091_vm15 = vcmp.eq.s32.totalorder %v5534_v23, %v7106_v11  ;;  %vm1068_vm7 = vcmp.eq.s32.totalorder %v5695_v8, %v7075_v61  ;;  %v10502_v50 = vmov 0 }
 0x2a1   : > { %10498 = vst [vmem:[#allocation170_spill] sm:$0xff] %v10497_v56  ;;  %v10500_v13 = vsel %vm7235_vm12, 4294967295, %v10499_v13  ;;  %vm7243_vm5 = vmpackc.low %vm1091_vm15, %vm1083_vm2  ;;  %vm804_vm11 = vcmp.eq.s32.totalorder %v5593_v53, %v7075_v61  ;;  %vm795_vm8 = vcmp.eq.s32.totalorder %v5721_v41, %v7106_v11  ;;  %2817 = vmatprep.mubr.bf16.mxu1 %v5607_v57  ;;  %v10505_v56 = vmov 0 }
 0x2a2   : > { %10501 = vst [vmem:[#allocation171_spill] sm:$0xff] %v10500_v13  ;;  %v10503_v50 = vsel %vm7243_vm5, 4294967295, %v10502_v50  ;;  %vm7252_vm0 = vmpackc.low %vm804_vm11, %vm796_vm13  ;;  %vm1076_vm14 = vcmp.eq.s32.totalorder %v5563_v47, %v7075_v61  ;;  %vm1067_vm2 = vcmp.eq.s32.totalorder %v5695_v8, %v7106_v11  ;;  %v10508_v58 = vmov 0 }
 0x2a3   : > { %10504 = vst [vmem:[#allocation172_spill] sm:$0xff] %v10503_v50  ;;  %v10506_v56 = vsel %vm7252_vm0, 4294967295, %v10505_v56  ;;  %4318 = vmatpush1.bf16.msk.msra.mxu0 %vm7235_vm12, %v10246_v42  ;;  %4378 = vmatpush1.bf16.msk.msra.mxu1 %vm7243_vm5, %v10246_v42  ;;  %vm7266_vm15 = vmpackc.low %vm1076_vm14, %vm1068_vm7  ;;  %vm803_vm11 = vcmp.eq.s32.totalorder %v5593_v53, %v7106_v11  ;;  %vm780_vm13 = vcmp.eq.s32.totalorder %v5773_v15, %v7075_v61  ;;  %v10511_v50 = vmov 0 }
 0x2a4   : > { %10507 = vst [vmem:[#allocation173_spill] sm:$0xff] %v10506_v56  ;;  %v10509_v58 = vsel %vm7266_vm15, 4294967295, %v10508_v58  ;;  %4320 = vmatprep.subr.msk.bf16.mxu0 %vm7252_vm0, %v10246_v42  ;;  %4380 = vmatprep.subr.msk.bf16.mxu1 %vm7266_vm15, %v10246_v42  ;;  %vm7280_vm12 = vmpackc.low %vm803_vm11, %vm795_vm8  ;;  %vm1075_vm7 = vcmp.eq.s32.totalorder %v5563_v47, %v7106_v11  ;;  %vm1052_vm14 = vcmp.eq.s32.totalorder %v5747_v27, %v7075_v61  ;;  %v10514_v13 = vmov 0 }
 0x2a5   : > { %10510 = vst [vmem:[#allocation174_spill] sm:$0xff] %v10509_v58  ;;  %v10512_v50 = vsel %vm7280_vm12, 4294967295, %v10511_v50  ;;  %vm7288_vm5 = vmpackc.low %vm1075_vm7, %vm1067_vm2  ;;  %vm788_vm0 = vcmp.eq.s32.totalorder %v5648_v1, %v7075_v61  ;;  %vm779_vm15 = vcmp.eq.s32.totalorder %v5773_v15, %v7106_v11  ;;  %v10517_v58 = vmov 0 }
 0x2a6   : > { %10513 = vst [vmem:[#allocation175_spill] sm:$0xff] %v10512_v50  ;;  %v10515_v13 = vsel %vm7288_vm5, 4294967295, %v10514_v13  ;;  %vm7296_vm8 = vmpackc.low %vm788_vm0, %vm780_vm13  ;;  %vm1060_vm11 = vcmp.eq.s32.totalorder %v5621_v60, %v7075_v61  ;;  %vm1051_vm9 = vcmp.eq.s32.totalorder %v5747_v27, %v7106_v11  ;;  %v10520_v56 = vmov 0 }
 0x2a7   : > { %10516 = vst [vmem:[#allocation176_spill] sm:$0xff] %v10515_v13  ;;  %v10518_v58 = vsel %vm7296_vm8, 4294967295, %v10517_v58  ;;  %4322 = vmatpush1.bf16.msk.msra.mxu0 %vm7280_vm12, %v10246_v42  ;;  %4382 = vmatpush1.bf16.msk.msra.mxu1 %vm7288_vm5, %v10246_v42  ;;  %vm7310_vm2 = vmpackc.low %vm1060_vm11, %vm1052_vm14  ;;  %vm787_vm0 = vcmp.eq.s32.totalorder %v5648_v1, %v7106_v11  ;;  %vm764_vm13 = vcmp.eq.s32.totalorder %v5825_v34, %v7075_v61  ;;  %v10523_v13 = vmov 0 }
 0x2a8   : > { %10519 = vst [vmem:[#allocation177_spill] sm:$0xff] %v10518_v58  ;;  %v10521_v56 = vsel %vm7310_vm2, 4294967295, %v10520_v56  ;;  %4324 = vmatprep.subr.msk.bf16.mxu0 %vm7296_vm8, %v10246_v42  ;;  %4384 = vmatprep.subr.msk.bf16.mxu1 %vm7310_vm2, %v10246_v42  ;;  %vm7324_vm7 = vmpackc.low %vm787_vm0, %vm779_vm15  ;;  %vm1059_vm14 = vcmp.eq.s32.totalorder %v5621_v60, %v7106_v11  ;;  %vm1036_vm11 = vcmp.eq.s32.totalorder %v5799_v17, %v7075_v61  ;;  %v10526_v50 = vmov 0 }
 0x2a9   : > { %10522 = vst [vmem:[#allocation178_spill] sm:$0xff] %v10521_v56  ;;  %v10524_v13 = vsel %vm7324_vm7, 4294967295, %v10523_v13  ;;  %vm7332_vm5 = vmpackc.low %vm1059_vm14, %vm1051_vm9  ;;  %vm772_vm8 = vcmp.eq.s32.totalorder %v5700_v9, %v7075_v61  ;;  %vm763_vm2 = vcmp.eq.s32.totalorder %v5825_v34, %v7106_v11  ;;  %v10529_v56 = vmov 0 }
 0x2aa   : > { %10525 = vst [vmem:[#allocation179_spill] sm:$0xff] %v10524_v13  ;;  %v10527_v50 = vsel %vm7332_vm5, 4294967295, %v10526_v50  ;;  %vm7340_vm15 = vmpackc.low %vm772_vm8, %vm764_vm13  ;;  %vm1044_vm0 = vcmp.eq.s32.totalorder %v5674_v5, %v7075_v61  ;;  %vm1035_vm12 = vcmp.eq.s32.totalorder %v5799_v17, %v7106_v11  ;;  %v10532_v58 = vmov 0 }
 0x2ab   : > { %10528 = vst [vmem:[#allocation180_spill] sm:$0xff] %v10527_v50  ;;  %v10530_v56 = vsel %vm7340_vm15, 4294967295, %v10529_v56  ;;  %4326 = vmatpush1.bf16.msk.msra.mxu0 %vm7324_vm7, %v10246_v42  ;;  %4386 = vmatpush1.bf16.msk.msra.mxu1 %vm7332_vm5, %v10246_v42  ;;  %vm7354_vm9 = vmpackc.low %vm1044_vm0, %vm1036_vm11  ;;  %vm771_vm8 = vcmp.eq.s32.totalorder %v5700_v9, %v7106_v11  ;;  %vm748_vm13 = vcmp.eq.s32.totalorder %v5877_v36, %v7075_v61  ;;  %v10535_v50 = vmov 0 }
 0x2ac   : > { %10531 = vst [vmem:[#allocation181_spill] sm:$0xff] %v10530_v56  ;;  %v10533_v58 = vsel %vm7354_vm9, 4294967295, %v10532_v58  ;;  %4328 = vmatprep.subr.msk.bf16.mxu0 %vm7340_vm15, %v10246_v42  ;;  %4388 = vmatprep.subr.msk.bf16.mxu1 %vm7354_vm9, %v10246_v42  ;;  %vm7368_vm14 = vmpackc.low %vm771_vm8, %vm763_vm2  ;;  %vm1043_vm11 = vcmp.eq.s32.totalorder %v5674_v5, %v7106_v11  ;;  %vm1020_vm0 = vcmp.eq.s32.totalorder %v5851_v48, %v7075_v61  ;;  %v10538_v13 = vmov 0 }
 0x2ad   : > { %10534 = vst [vmem:[#allocation182_spill] sm:$0xff] %v10533_v58  ;;  %v10536_v50 = vsel %vm7368_vm14, 4294967295, %v10535_v50  ;;  %vm7376_vm5 = vmpackc.low %vm1043_vm11, %vm1035_vm12  ;;  %vm756_vm15 = vcmp.eq.s32.totalorder %v5752_v22, %v7075_v61  ;;  %vm747_vm9 = vcmp.eq.s32.totalorder %v5877_v36, %v7106_v11  ;;  %v10541_v58 = vmov 0 }
 0x2ae   : > { %10537 = vst [vmem:[#allocation183_spill] sm:$0xff] %v10536_v50  ;;  %v10539_v13 = vsel %vm7376_vm5, 4294967295, %v10538_v13  ;;  %vm7384_vm2 = vmpackc.low %vm756_vm15, %vm748_vm13  ;;  %vm1028_vm8 = vcmp.eq.s32.totalorder %v5726_v37, %v7075_v61  ;;  %vm1019_vm7 = vcmp.eq.s32.totalorder %v5851_v48, %v7106_v11  ;;  %v10544_v56 = vmov 0 }
 0x2af   : > { %10540 = vst [vmem:[#allocation184_spill] sm:$0xff] %v10539_v13  ;;  %v10542_v58 = vsel %vm7384_vm2, 4294967295, %v10541_v58  ;;  %4330 = vmatpush1.bf16.msk.msra.mxu0 %vm7368_vm14, %v10246_v42  ;;  %4390 = vmatpush1.bf16.msk.msra.mxu1 %vm7376_vm5, %v10246_v42  ;;  %vm7398_vm12 = vmpackc.low %vm1028_vm8, %vm1020_vm0  ;;  %vm755_vm15 = vcmp.eq.s32.totalorder %v5752_v22, %v7106_v11  ;;  %vm732_vm13 = vcmp.eq.s32.totalorder %v5929_v39, %v7075_v61  ;;  %v10547_v13 = vmov 0 }
 0x2b0   : > { %10543 = vst [vmem:[#allocation185_spill] sm:$0xff] %v10542_v58  ;;  %v10545_v56 = vsel %vm7398_vm12, 4294967295, %v10544_v56  ;;  %4332 = vmatprep.subr.msk.bf16.mxu0 %vm7384_vm2, %v10246_v42  ;;  %4392 = vmatprep.subr.msk.bf16.mxu1 %vm7398_vm12, %v10246_v42  ;;  %vm7412_vm11 = vmpackc.low %vm755_vm15, %vm747_vm9  ;;  %vm1027_vm0 = vcmp.eq.s32.totalorder %v5726_v37, %v7106_v11  ;;  %vm1004_vm8 = vcmp.eq.s32.totalorder %v5903_v54, %v7075_v61  ;;  %v10550_v50 = vmov 0 }
 0x2b1   : > { %10546 = vst [vmem:[#allocation186_spill] sm:$0xff] %v10545_v56  ;;  %v10548_v13 = vsel %vm7412_vm11, 4294967295, %v10547_v13  ;;  %vm7420_vm5 = vmpackc.low %vm1027_vm0, %vm1019_vm7  ;;  %vm740_vm2 = vcmp.eq.s32.totalorder %v5804_v0, %v7075_v61  ;;  %vm731_vm12 = vcmp.eq.s32.totalorder %v5929_v39, %v7106_v11  ;;  %v10553_v56 = vmov 0 }
 0x2b2   : > { %10549 = vst [vmem:[#allocation187_spill] sm:$0xff] %v10548_v13  ;;  %v10551_v50 = vsel %vm7420_vm5, 4294967295, %v10550_v50  ;;  %vm7428_vm9 = vmpackc.low %vm740_vm2, %vm732_vm13  ;;  %vm1012_vm15 = vcmp.eq.s32.totalorder %v5778_v19, %v7075_v61  ;;  %vm1003_vm14 = vcmp.eq.s32.totalorder %v5903_v54, %v7106_v11  ;;  %v10556_v58 = vmov 0 }
 0x2b3   : > { %10552 = vst [vmem:[#allocation188_spill] sm:$0xff] %v10551_v50  ;;  %v10554_v56 = vsel %vm7428_vm9, 4294967295, %v10553_v56  ;;  %4334 = vmatpush1.bf16.msk.msra.mxu0 %vm7412_vm11, %v10246_v42  ;;  %4394 = vmatpush1.bf16.msk.msra.mxu1 %vm7420_vm5, %v10246_v42  ;;  %vm7442_vm7 = vmpackc.low %vm1012_vm15, %vm1004_vm8  ;;  %vm739_vm2 = vcmp.eq.s32.totalorder %v5804_v0, %v7106_v11  ;;  %vm972_vm13 = vcmp.eq.s32.totalorder %v5981_v26, %v7075_v61  ;;  %v10559_v50 = vmov 0 }
 0x2b4   : > { %10555 = vst [vmem:[#allocation189_spill] sm:$0xff] %v10554_v56  ;;  %v10557_v58 = vsel %vm7442_vm7, 4294967295, %v10556_v58  ;;  %4336 = vmatprep.subr.msk.bf16.mxu0 %vm7428_vm9, %v10246_v42  ;;  %4396 = vmatprep.subr.msk.bf16.mxu1 %vm7442_vm7, %v10246_v42  ;;  %vm7456_vm0 = vmpackc.low %vm739_vm2, %vm731_vm12  ;;  %vm1011_vm8 = vcmp.eq.s32.totalorder %v5778_v19, %v7106_v11  ;;  %vm988_vm15 = vcmp.eq.s32.totalorder %v5955_v25, %v7075_v61  ;;  %v10562_v13 = vmov 0 }
 0x2b5   : > { %10558 = vst [vmem:[#allocation190_spill] sm:$0xff] %v10557_v58  ;;  %v10560_v50 = vsel %vm7456_vm0, 4294967295, %v10559_v50  ;;  %vm7464_vm5 = vmpackc.low %vm1011_vm8, %vm1003_vm14  ;;  %vm980_vm9 = vcmp.eq.s32.totalorder %v5856_v49, %v7075_v61  ;;  %vm971_vm7 = vcmp.eq.s32.totalorder %v5981_v26, %v7106_v11  ;;  %v10565_v58 = vmov 0 }
 0x2b6   : > { %10561 = vst [vmem:[#allocation191_spill] sm:$0xff] %v10560_v50  ;;  %v10563_v13 = vsel %vm7464_vm5, 4294967295, %v10562_v13  ;;  %vm7472_vm12 = vmpackc.low %vm980_vm9, %vm972_vm13  ;;  %vm996_vm2 = vcmp.eq.s32.totalorder %v5830_v38, %v7075_v61  ;;  %vm987_vm11 = vcmp.eq.s32.totalorder %v5955_v25, %v7106_v11  ;;  %v10568_v56 = vmov 0 }
 0x2b7   : > { %10564 = vst [vmem:[#allocation192_spill] sm:$0xff] %v10563_v13  ;;  %v10566_v58 = vsel %vm7472_vm12, 4294967295, %v10565_v58  ;;  %4338 = vmatpush1.bf16.msk.msra.mxu0 %vm7456_vm0, %v10246_v42  ;;  %4398 = vmatpush1.bf16.msk.msra.mxu1 %vm7464_vm5, %v10246_v42  ;;  %vm7486_vm14 = vmpackc.low %vm996_vm2, %vm988_vm15  ;;  %vm979_vm9 = vcmp.eq.s32.totalorder %v5856_v49, %v7106_v11  ;;  %vm956_vm13 = vcmp.eq.s32.totalorder %v6033_v32, %v7075_v61  ;;  %v10571_v13 = vmov 0 }
 0x2b8   : > { %10567 = vst [vmem:[#allocation193_spill] sm:$0xff] %v10566_v58  ;;  %v10569_v56 = vsel %vm7486_vm14, 4294967295, %v10568_v56  ;;  %4340 = vmatprep.subr.msk.bf16.mxu0 %vm7472_vm12, %v10246_v42  ;;  %4400 = vmatprep.subr.msk.bf16.mxu1 %vm7486_vm14, %v10246_v42  ;;  %vm7500_vm8 = vmpackc.low %vm979_vm9, %vm971_vm7  ;;  %vm995_vm15 = vcmp.eq.s32.totalorder %v5830_v38, %v7106_v11  ;;  %vm1228_vm2 = vcmp.eq.s32.totalorder %v6007_v20, %v7075_v61  ;;  %v10574_v50 = vmov 0 }
 0x2b9   : > { %10570 = vst [vmem:[#allocation194_spill] sm:$0xff] %v10569_v56  ;;  %v10572_v13 = vsel %vm7500_vm8, 4294967295, %v10571_v13  ;;  %vm7508_vm5 = vmpackc.low %vm995_vm15, %vm987_vm11  ;;  %vm964_vm12 = vcmp.eq.s32.totalorder %v5908_v29, %v7075_v61  ;;  %vm955_vm14 = vcmp.eq.s32.totalorder %v6033_v32, %v7106_v11  ;;  %v10577_v56 = vmov 0 }
 0x2ba   : > { %10573 = vst [vmem:[#allocation195_spill] sm:$0xff] %v10572_v13  ;;  %v10575_v50 = vsel %vm7508_vm5, 4294967295, %v10574_v50  ;;  %vm7516_vm7 = vmpackc.low %vm964_vm12, %vm956_vm13  ;;  %vm1236_vm9 = vcmp.eq.s32.totalorder %v5882_v35, %v7075_v61  ;;  %vm1227_vm0 = vcmp.eq.s32.totalorder %v6007_v20, %v7106_v11  ;;  %v10580_v58 = vmov 0 }
 0x2bb   : > { %10576 = vst [vmem:[#allocation196_spill] sm:$0xff] %v10575_v50  ;;  %v10578_v56 = vsel %vm7516_vm7, 4294967295, %v10577_v56  ;;  %4342 = vmatpush2.bf16.msk.msra.mxu0 %vm7500_vm8, %v10246_v42  ;;  %4402 = vmatpush1.bf16.msk.msra.mxu1 %vm7508_vm5, %v10246_v42  ;;  %vm7530_vm11 = vmpackc.low %vm1236_vm9, %vm1228_vm2  ;;  %vm963_vm12 = vcmp.eq.s32.totalorder %v5908_v29, %v7106_v11  ;;  %vm940_vm13 = vcmp.eq.s32.totalorder %v6085_v7, %v7075_v61  ;;  %v10583_v50 = vmov 0 }
 0x2bc   : > { %10579 = vst [vmem:[#allocation197_spill] sm:$0xff] %v10578_v56  ;;  %v10581_v58 = vsel %vm7530_vm11, 4294967295, %v10580_v58  ;;  %4344 = vmatprep.subr.msk.bf16.mxu0 %vm7516_vm7, %v10246_v42  ;;  %4404 = vmatprep.subr.msk.bf16.mxu1 %vm7530_vm11, %v10246_v42  ;;  %vm7544_vm15 = vmpackc.low %vm963_vm12, %vm955_vm14  ;;  %vm1235_vm2 = vcmp.eq.s32.totalorder %v5882_v35, %v7106_v11  ;;  %vm1212_vm9 = vcmp.eq.s32.totalorder %v6059_v43, %v7075_v61  ;;  %v10586_v13 = vmov 0 }
 0x2bd   : > { %10582 = vst [vmem:[#allocation198_spill] sm:$0xff] %v10581_v58  ;;  %v10584_v50 = vsel %vm7544_vm15, 4294967295, %v10583_v50  ;;  %vm7552_vm5 = vmpackc.low %vm1235_vm2, %vm1227_vm0  ;;  %vm948_vm7 = vcmp.eq.s32.totalorder %v5960_v18, %v7075_v61  ;;  %vm939_vm11 = vcmp.eq.s32.totalorder %v6085_v7, %v7106_v11  ;;  %v10589_v58 = vmov 0 }
 0x2be   : > { %10585 = vst [vmem:[#allocation199_spill] sm:$0xff] %v10584_v50  ;;  %v10587_v13 = vsel %vm7552_vm5, 4294967295, %v10586_v13  ;;  %vm7560_vm14 = vmpackc.low %vm948_vm7, %vm940_vm13  ;;  %vm1220_vm12 = vcmp.eq.s32.totalorder %v5934_v28, %v7075_v61  ;;  %vm1211_vm8 = vcmp.eq.s32.totalorder %v6059_v43, %v7106_v11  ;;  %v10592_v56 = vmov 0 }
 0x2bf   : > { %10588 = vst [vmem:[#allocation200_spill] sm:$0xff] %v10587_v13  ;;  %v10590_v58 = vsel %vm7560_vm14, 4294967295, %v10589_v58  ;;  %4346 = vmatpush2.bf16.msk.msra.mxu0 %vm7544_vm15, %v10246_v42  ;;  %4406 = vmatpush2.bf16.msk.msra.mxu1 %vm7552_vm5, %v10246_v42  ;;  %vm7574_vm0 = vmpackc.low %vm1220_vm12, %vm1212_vm9  ;;  %vm947_vm7 = vcmp.eq.s32.totalorder %v5960_v18, %v7106_v11  ;;  %vm924_vm13 = vcmp.eq.s32.totalorder %v10388_v16, %v7075_v61  ;;  %v10595_v13 = vmov 0 }
 0x2c0   : > { %10591 = vst [vmem:[#allocation201_spill] sm:$0xff] %v10590_v58  ;;  %v10593_v56 = vsel %vm7574_vm0, 4294967295, %v10592_v56  ;;  %4348 = vmatprep.subr.msk.bf16.mxu0 %vm7560_vm14, %v10246_v42  ;;  %4408 = vmatprep.subr.msk.bf16.mxu1 %vm7574_vm0, %v10246_v42  ;;  %vm7588_vm2 = vmpackc.low %vm947_vm7, %vm939_vm11  ;;  %vm1219_vm9 = vcmp.eq.s32.totalorder %v5934_v28, %v7106_v11  ;;  %vm1196_vm12 = vcmp.eq.s32.totalorder %v10384_v2, %v7075_v61  ;;  %v10598_v50 = vmov 0  ;;  %v10604_v58 = vld [vmem:[#allocation47_spill] sm:$0xff] }
 0x2c1   : > { %10594 = vst [vmem:[#allocation202_spill] sm:$0xff] %v10593_v56  ;;  %v10596_v13 = vsel %vm7588_vm2, 4294967295, %v10595_v13  ;;  %vm7596_vm5 = vmpackc.low %vm1219_vm9, %vm1211_vm8  ;;  %vm932_vm14 = vcmp.eq.s32.totalorder %v10393_v55, %v7075_v61  ;;  %vm923_vm0 = vcmp.eq.s32.totalorder %v10388_v16, %v7106_v11  ;;  %v10601_v56 = vmov 0  ;;  %v10608_v16 = vld [vmem:[#allocation72_spill] sm:$0xff] }
 0x2c2   : > { %10597 = vst [vmem:[#allocation203_spill] sm:$0xff] %v10596_v13  ;;  %v10599_v50 = vsel %vm7596_vm5, 4294967295, %v10598_v50  ;;  %vm7604_vm11 = vmpackc.low %vm932_vm14, %vm924_vm13  ;;  %vm1204_vm7 = vcmp.eq.s32.totalorder %v10604_v58, %v7075_v61  ;;  %vm1195_vm15 = vcmp.eq.s32.totalorder %v10384_v2, %v7106_v11  ;;  %v10605_v6 = vmov 0  ;;  %v10612_v13 = vld [vmem:[#allocation69_spill] sm:$0xff] }
 0x2c3   : > { %10600 = vst [vmem:[#allocation204_spill] sm:$0xff] %v10599_v50  ;;  %v10602_v56 = vsel %vm7604_vm11, 4294967295, %v10601_v56  ;;  %4350 = vmatpush2.bf16.msk.msra.mxu0 %vm7588_vm2, %v10246_v42  ;;  %4410 = vmatpush2.bf16.msk.msra.mxu1 %vm7596_vm5, %v10246_v42  ;;  %vm7618_vm8 = vmpackc.low %vm1204_vm7, %vm1196_vm12  ;;  %vm931_vm14 = vcmp.eq.s32.totalorder %v10393_v55, %v7106_v11  ;;  %vm908_vm13 = vcmp.eq.s32.totalorder %v10608_v16, %v7075_v61  ;;  %v10609_v50 = vmov 0  ;;  %v10620_v2 = vld [vmem:[#allocation53_spill] sm:$0xff] }
 0x2c4   : > { %10603 = vst [vmem:[#allocation205_spill] sm:$0xff] %v10602_v56  ;;  %v10606_v6 = vsel %vm7618_vm8, 4294967295, %v10605_v6  ;;  %4352 = vmatprep.subr.msk.bf16.mxu0 %vm7604_vm11, %v10246_v42  ;;  %4412 = vmatprep.subr.msk.bf16.mxu1 %vm7618_vm8, %v10246_v42  ;;  %vm7632_vm9 = vmpackc.low %vm931_vm14, %vm923_vm0  ;;  %vm1203_vm12 = vcmp.eq.s32.totalorder %v10604_v58, %v7106_v11  ;;  %vm1180_vm7 = vcmp.eq.s32.totalorder %v10612_v13, %v7075_v61  ;;  %v10613_v55 = vmov 0  ;;  %v10616_v56 = vld [vmem:[#allocation58_spill] sm:$0xff]  ;;  %v10624_v58 = vld [vmem:[#allocation80_spill] sm:$0xff] }
 0x2c5   : > { %10607 = vst [vmem:[#allocation206_spill] sm:$0xff] %v10606_v6  ;;  %v10610_v50 = vsel %vm7632_vm9, 4294967295, %v10609_v50  ;;  %vm7640_vm5 = vmpackc.low %vm1203_vm12, %vm1195_vm15  ;;  %vm916_vm11 = vcmp.eq.s32.totalorder %v10616_v56, %v7075_v61  ;;  %vm907_vm8 = vcmp.eq.s32.totalorder %v10608_v16, %v7106_v11  ;;  %v10617_v6 = vmov 0 }
 0x2c6   : > { %10611 = vst [vmem:[#allocation207_spill] sm:$0xff] %v10610_v50  ;;  %v10614_v55 = vsel %vm7640_vm5, 4294967295, %v10613_v55  ;;  %vm7648_vm0 = vmpackc.low %vm916_vm11, %vm908_vm13  ;;  %vm1188_vm14 = vcmp.eq.s32.totalorder %v10620_v2, %v7075_v61  ;;  %vm1179_vm2 = vcmp.eq.s32.totalorder %v10612_v13, %v7106_v11  ;;  %v10621_v16 = vmov 0  ;;  %v10628_v50 = vld [vmem:[#allocation76_spill] sm:$0xff]  ;;  %v10636_v13 = vld [vmem:[#allocation62_spill] sm:$0xff] }
 0x2c7   : > { %10615 = vst [vmem:[#allocation208_spill] sm:$0xff] %v10614_v55  ;;  %v10618_v6 = vsel %vm7648_vm0, 4294967295, %v10617_v6  ;;  %4354 = vmatpush2.bf16.msk.msra.mxu0 %vm7632_vm9, %v10246_v42  ;;  %4414 = vmatpush2.bf16.msk.msra.mxu1 %vm7640_vm5, %v10246_v42  ;;  %vm7662_vm15 = vmpackc.low %vm1188_vm14, %vm1180_vm7  ;;  %vm915_vm11 = vcmp.eq.s32.totalorder %v10616_v56, %v7106_v11  ;;  %vm892_vm13 = vcmp.eq.s32.totalorder %v10624_v58, %v7075_v61  ;;  %v10625_v55 = vmov 0 }
 0x2c8   : > { %10619 = vst [vmem:[#allocation209_spill] sm:$0xff] %v10618_v6  ;;  %v10622_v16 = vsel %vm7662_vm15, 4294967295, %v10621_v16  ;;  %4356 = vmatprep.subr.msk.bf16.mxu0 %vm7648_vm0, %v10246_v42  ;;  %4416 = vmatprep.subr.msk.bf16.mxu1 %vm7662_vm15, %v10246_v42  ;;  %vm7676_vm12 = vmpackc.low %vm915_vm11, %vm907_vm8  ;;  %vm1187_vm7 = vcmp.eq.s32.totalorder %v10620_v2, %v7106_v11  ;;  %vm1164_vm14 = vcmp.eq.s32.totalorder %v10628_v50, %v7075_v61  ;;  %v10629_v56 = vmov 0  ;;  %v10632_v6 = vld [vmem:[#allocation68_spill] sm:$0xff] }
 0x2c9   : > { %10623 = vst [vmem:[#allocation53_spill] sm:$0xff] %v10622_v16  ;;  %v10626_v55 = vsel %vm7676_vm12, 4294967295, %v10625_v55  ;;  %vm7684_vm5 = vmpackc.low %vm1187_vm7, %vm1179_vm2  ;;  %vm900_vm0 = vcmp.eq.s32.totalorder %v10632_v6, %v7075_v61  ;;  %vm891_vm15 = vcmp.eq.s32.totalorder %v10624_v58, %v7106_v11  ;;  %v10633_v16 = vmov 0 }
 0x2ca   : > { %10627 = vst [vmem:[#allocation210_spill] sm:$0xff] %v10626_v55  ;;  %v10630_v56 = vsel %vm7684_vm5, 4294967295, %v10629_v56  ;;  %vm7692_vm8 = vmpackc.low %vm900_vm0, %vm892_vm13  ;;  %vm1172_vm11 = vcmp.eq.s32.totalorder %v10636_v13, %v7075_v61  ;;  %vm1163_vm9 = vcmp.eq.s32.totalorder %v10628_v50, %v7106_v11  ;;  %v10637_v58 = vmov 0  ;;  %v10643_v55 = vld [vmem:[#allocation83_spill] sm:$0xff] }
 0x2cb   : > { %10631 = vst [vmem:[#allocation76_spill] sm:$0xff] %v10630_v56  ;;  %v10634_v16 = vsel %vm7692_vm8, 4294967295, %v10633_v16  ;;  %4358 = vmatpush2.bf16.msk.msra.mxu0 %vm7676_vm12, %v10246_v42  ;;  %4418 = vmatpush2.bf16.msk.msra.mxu1 %vm7684_vm5, %v10246_v42  ;;  %vm7706_vm2 = vmpackc.low %vm1172_vm11, %vm1164_vm14  ;;  %vm899_vm0 = vcmp.eq.s32.totalorder %v10632_v6, %v7106_v11  ;;  %vm876_vm13 = vcmp.eq.s32.totalorder %v10436_v40, %v7075_v61  ;;  %v10640_v56 = vmov 0 }
 0x2cc   : > { %10635 = vst [vmem:[#allocation211_spill] sm:$0xff] %v10634_v16  ;;  %v10638_v58 = vsel %vm7706_vm2, 4294967295, %v10637_v58  ;;  %4360 = vmatprep.subr.msk.bf16.mxu0 %vm7692_vm8, %v10246_v42  ;;  %4420 = vmatprep.subr.msk.bf16.mxu1 %vm7706_vm2, %v10246_v42  ;;  %vm7720_vm7 = vmpackc.low %vm899_vm0, %vm891_vm15  ;;  %vm1171_vm14 = vcmp.eq.s32.totalorder %v10636_v13, %v7106_v11  ;;  %vm1148_vm11 = vcmp.eq.s32.totalorder %v10643_v55, %v7075_v61  ;;  %v10644_v6 = vmov 0  ;;  %v10650_v16 = vld [vmem:[#allocation73_spill] sm:$0xff] }
 0x2cd   : > { %10639 = vst [vmem:[#allocation62_spill] sm:$0xff] %v10638_v58  ;;  %v10641_v56 = vsel %vm7720_vm7, 4294967295, %v10640_v56  ;;  %vm7728_vm5 = vmpackc.low %vm1171_vm14, %vm1163_vm9  ;;  %vm884_vm8 = vcmp.eq.s32.totalorder %v10441_v51, %v7075_v61  ;;  %vm875_vm2 = vcmp.eq.s32.totalorder %v10436_v40, %v7106_v11  ;;  %v10647_v58 = vmov 0 }
 0x2ce   : > { %10642 = vst [vmem:[#allocation212_spill] sm:$0xff] %v10641_v56  ;;  %v10645_v6 = vsel %vm7728_vm5, 4294967295, %v10644_v6  ;;  %vm7736_vm15 = vmpackc.low %vm884_vm8, %vm876_vm13  ;;  %vm1156_vm0 = vcmp.eq.s32.totalorder %v10650_v16, %v7075_v61  ;;  %vm1147_vm12 = vcmp.eq.s32.totalorder %v10643_v55, %v7106_v11  ;;  %v10651_v40 = vmov 0  ;;  %v10657_v56 = vld [vmem:[#allocation92_spill] sm:$0xff] }
 0x2cf   : > { %10646 = vst [vmem:[#allocation83_spill] sm:$0xff] %v10645_v6  ;;  %v10648_v58 = vsel %vm7736_vm15, 4294967295, %v10647_v58  ;;  %4362 = vmatpush2.bf16.msk.msra.mxu0 %vm7720_vm7, %v10246_v42  ;;  %4422 = vmatpush2.bf16.msk.msra.mxu1 %vm7728_vm5, %v10246_v42  ;;  %vm7750_vm9 = vmpackc.low %vm1156_vm0, %vm1148_vm11  ;;  %vm883_vm8 = vcmp.eq.s32.totalorder %v10441_v51, %v7106_v11  ;;  %vm860_vm13 = vcmp.eq.s32.totalorder %v6361_v45, %v7075_v61  ;;  %v10654_v6 = vmov 0 }
 0x2d0   : > { %10649 = vst [vmem:[#allocation213_spill] sm:$0xff] %v10648_v58  ;;  %v10652_v40 = vsel %vm7750_vm9, 4294967295, %v10651_v40  ;;  %4364 = vmatprep.subr.msk.bf16.mxu0 %vm7736_vm15, %v10246_v42  ;;  %4424 = vmatprep.subr.msk.bf16.mxu1 %vm7750_vm9, %v10246_v42  ;;  %vm7764_vm14 = vmpackc.low %vm883_vm8, %vm875_vm2  ;;  %vm1155_vm11 = vcmp.eq.s32.totalorder %v10650_v16, %v7106_v11  ;;  %vm1132_vm0 = vcmp.eq.s32.totalorder %v10657_v56, %v7075_v61  ;;  %v10658_v51 = vmov 0  ;;  %v10664_v58 = vld [vmem:[#allocation84_spill] sm:$0xff] }
 0x2d1   : > { %10653 = vst [vmem:[#allocation214_spill] sm:$0xff] %v10652_v40  ;;  %v10655_v6 = vsel %vm7764_vm14, 4294967295, %v10654_v6  ;;  %vm7772_vm5 = vmpackc.low %vm1155_vm11, %vm1147_vm12  ;;  %vm868_vm15 = vcmp.eq.s32.totalorder %v6325_v62, %v7075_v61  ;;  %vm859_vm9 = vcmp.eq.s32.totalorder %v6361_v45, %v7106_v11  ;;  %v10661_v40 = vmov 0 }
 0x2d2   : > { %10656 = vst [vmem:[#allocation215_spill] sm:$0xff] %v10655_v6  ;;  %v10659_v51 = vsel %vm7772_vm5, 4294967295, %v10658_v51  ;;  %vm7780_vm2 = vmpackc.low %vm868_vm15, %vm860_vm13  ;;  %vm1140_vm8 = vcmp.eq.s32.totalorder %v10664_v58, %v7075_v61  ;;  %vm1131_vm7 = vcmp.eq.s32.totalorder %v10657_v56, %v7106_v11  ;;  %v7789_v16 = vadd.s32 896, %v5539_v24 }
 0x2d3   : > { %10660 = vst [vmem:[#allocation92_spill] sm:$0xff] %v10659_v51  ;;  %v10662_v40 = vsel %vm7780_vm2, 4294967295, %v10661_v40  ;;  %4366 = vmatpush2.bf16.msk.msra.mxu0 %vm7764_vm14, %v10246_v42  ;;  %4426 = vmatpush2.bf16.msk.msra.mxu1 %vm7772_vm5, %v10246_v42  ;;  %vm7797_vm12 = vmpackc.low %vm1140_vm8, %vm1132_vm0  ;;  %v10665_v45 = vmov 0  ;;  %vm867_vm15 = vcmp.eq.s32.totalorder %v6325_v62, %v7106_v11  ;;  %vm1116_vm13 = vcmp.eq.s32.totalorder %v6401_v46, %v7075_v61 }
 0x2d4   : > { %10663 = vst [vmem:[#allocation216_spill] sm:$0xff] %v10662_v40  ;;  %v10666_v45 = vsel %vm7797_vm12, 4294967295, %v10665_v45  ;;  %4368 = vmatprep.subr.msk.bf16.mxu0 %vm7780_vm2, %v10246_v42  ;;  %4428 = vmatprep.subr.msk.bf16.mxu1 %vm7797_vm12, %v10246_v42  ;;  %vm7811_vm11 = vmpackc.low %vm867_vm15, %vm859_vm9  ;;  %v10668_v51 = vmov 0  ;;  %vm1139_vm0 = vcmp.eq.s32.totalorder %v10664_v58, %v7106_v11  ;;  %vm854_vm8 = vcmp.eq.s32.totalorder %v10465_v31, %v7789_v16 }
 0x2d5   : > { %10667 = vst [vmem:[#allocation84_spill] sm:$0xff] %v10666_v45  ;;  %v10669_v51 = vsel %vm7811_vm11, 4294967295, %v10668_v51  ;;  %v7820_v6 = vadd.s32 768, %v5539_v24  ;;  %vm7822_vm5 = vmpackc.low %vm1139_vm0, %vm1131_vm7  ;;  %v10670_v40 = vmov 0  ;;  %vm1124_vm12 = vcmp.eq.s32.totalorder %v6380_v21, %v7075_v61 }
 0x2d6   : > { %v10671_v40 = vsel %vm7822_vm5, 4294967295, %v10670_v40  ;;  %vm1115_vm9 = vcmp.eq.s32.totalorder %v6401_v46, %v7106_v11  ;;  %vm7830_vm15 = vmpackc.low %vm1124_vm12, %vm1116_vm13  ;;  %v10672_v45 = vmov 0  ;;  %vm846_vm2 = vcmp.eq.s32.totalorder %v5523_v12, %v7789_v16 }
 0x2d7   : > { %v10673_v45 = vsel %vm7830_vm15, 4294967295, %v10672_v45  ;;  %vm853_vm14 = vcmp.eq.s32.totalorder %v10465_v31, %v7820_v6  ;;  %4370 = vmatpush2.bf16.msk.msra.mxu0 %vm7811_vm11, %v10246_v42  ;;  %4430 = vmatpush2.bf16.msk.msra.mxu1 %vm7822_vm5, %v10246_v42  ;;  %vm7844_vm7 = vmpackc.low %vm854_vm8, %vm846_vm2  ;;  %v10674_v24 = vmov 0  ;;  %vm1123_vm12 = vcmp.eq.s32.totalorder %v6380_v21, %v7106_v11 }
 0x2d8   : > { %v10675_v24 = vsel %vm7844_vm7, 4294967295, %v10674_v24  ;;  %vm830_vm13 = vcmp.eq.s32.totalorder %v5619_v59, %v7789_v16  ;;  %4432 = vmatprep.subr.msk.bf16.mxu1 %vm7830_vm15, %v10246_v42  ;;  %4436 = vmatprep.subr.msk.bf16.mxu0 %vm7844_vm7, %v10246_v42  ;;  %vm7858_vm0 = vmpackc.low %vm1123_vm12, %vm1115_vm9  ;;  %v10676_v31 = vmov 0  ;;  %vm845_vm2 = vcmp.eq.s32.totalorder %v5523_v12, %v7820_v6 }
 0x2d9   : > { %v10677_v31 = vsel %vm7858_vm0, 4294967295, %v10676_v31  ;;  %vm1110_vm8 = vcmp.eq.s32.totalorder %v5588_v52, %v7789_v16  ;;  %vm7866_vm5 = vmpackc.low %vm853_vm14, %vm845_vm2  ;;  %v10678_v11 = vmov 0  ;;  %vm838_vm15 = vcmp.eq.s32.totalorder %v5526_v14, %v7789_v16 }
 0x2da   : > { %v10679_v11 = vsel %vm7866_vm5, 4294967295, %v10678_v11  ;;  %vm829_vm7 = vcmp.eq.s32.totalorder %v5619_v59, %v7820_v6  ;;  %2775 = vmatmul.mubr.bf16.vlgmr.msra.gmra.mxu0 %v6397_v3  ;;  %vm7875_vm9 = vmpackc.low %vm838_vm15, %vm830_vm13  ;;  %v10680_v61 = vmov 0  ;;  %vm1102_vm12 = vcmp.eq.s32.totalorder %v5547_v30, %v7789_v16 }
 0x2db   : > { %v10681_v61 = vsel %vm7875_vm9, 4294967295, %v10680_v61  ;;  %vm1109_vm14 = vcmp.eq.s32.totalorder %v5588_v52, %v7820_v6  ;;  %4434 = vmatpush2.bf16.msk.msra.mxu1 %vm7858_vm0, %v10246_v42  ;;  %4438 = vmatpush1.bf16.msk.msra.mxu0 %vm7866_vm5, %v10246_v42  ;;  %vm7889_vm2 = vmpackc.low %vm1110_vm8, %vm1102_vm12  ;;  %v10682_v12 = vmov 0  ;;  %vm837_vm15 = vcmp.eq.s32.totalorder %v5526_v14, %v7820_v6 }
 0x2dc   : > { %v10683_v12 = vsel %vm7889_vm2, 4294967295, %v10682_v12  ;;  %vm814_vm13 = vcmp.eq.s32.totalorder %v5669_v4, %v7789_v16  ;;  %4440 = vmatprep.subr.msk.bf16.mxu0 %vm7875_vm9, %v10246_v42  ;;  %4500 = vmatprep.subr.msk.bf16.mxu1 %vm7889_vm2, %v10246_v42  ;;  %vm7903_vm0 = vmpackc.low %vm837_vm15, %vm829_vm7  ;;  %v10684_v52 = vmov 0  ;;  %vm1101_vm8 = vcmp.eq.s32.totalorder %v5547_v30, %v7820_v6 }
 0x2dd   : > { %v10685_v52 = vsel %vm7903_vm0, 4294967295, %v10684_v52  ;;  %vm1086_vm12 = vcmp.eq.s32.totalorder %v5643_v63, %v7789_v16  ;;  %vm7911_vm5 = vmpackc.low %vm1109_vm14, %vm1101_vm8  ;;  %v10686_v14 = vmov 0  ;;  %vm822_vm9 = vcmp.eq.s32.totalorder %v5549_v33, %v7789_v16  ;;  %2860 = vmatprep.mubr.bf16.mxu0 %v5557_v44 }
 0x2de   : > { %v10687_v14 = vsel %vm7911_vm5, 4294967295, %v10686_v14  ;;  %vm813_vm2 = vcmp.eq.s32.totalorder %v5669_v4, %v7820_v6  ;;  %2818 = vmatmul.mubr.bf16.vlgmr.msra.gmra.mxu1 %v6448_v10  ;;  %vm7921_vm7 = vmpackc.low %vm822_vm9, %vm814_vm13  ;;  %v10688_v59 = vmov 0  ;;  %vm1094_vm14 = vcmp.eq.s32.totalorder %v5534_v23, %v7789_v16 }
 0x2df   : > { %v10689_v59 = vsel %vm7921_vm7, 4294967295, %v10688_v59  ;;  %vm1085_vm15 = vcmp.eq.s32.totalorder %v5643_v63, %v7820_v6  ;;  %4442 = vmatpush1.bf16.msk.msra.mxu0 %vm7903_vm0, %v10246_v42  ;;  %4502 = vmatpush1.bf16.msk.msra.mxu1 %vm7911_vm5, %v10246_v42  ;;  %vm7935_vm8 = vmpackc.low %vm1094_vm14, %vm1086_vm12  ;;  %v10690_v30 = vmov 0  ;;  %vm821_vm9 = vcmp.eq.s32.totalorder %v5549_v33, %v7820_v6 }
 0x2e0   : > { %v10691_v30 = vsel %vm7935_vm8, 4294967295, %v10690_v30  ;;  %vm798_vm13 = vcmp.eq.s32.totalorder %v5721_v41, %v7789_v16  ;;  %4444 = vmatprep.subr.msk.bf16.mxu0 %vm7921_vm7, %v10246_v42  ;;  %4504 = vmatprep.subr.msk.bf16.mxu1 %vm7935_vm8, %v10246_v42  ;;  %vm7949_vm0 = vmpackc.low %vm821_vm9, %vm813_vm2  ;;  %v10692_v44 = vmov 0  ;;  %vm1093_vm12 = vcmp.eq.s32.totalorder %v5534_v23, %v7820_v6 }
 0x2e1   : > { %v10693_v44 = vsel %vm7949_vm0, 4294967295, %v10692_v44  ;;  %vm1070_vm14 = vcmp.eq.s32.totalorder %v5695_v8, %v7789_v16  ;;  %vm7957_vm5 = vmpackc.low %vm1093_vm12, %vm1085_vm15  ;;  %v10694_v33 = vmov 0  ;;  %vm806_vm7 = vcmp.eq.s32.totalorder %v5593_v53, %v7789_v16  ;;  %2903 = vmatprep.mubr.bf16.mxu1 %v5607_v57 }
 0x2e2   : > { %v10695_v33 = vsel %vm7957_vm5, 4294967295, %v10694_v33  ;;  %vm797_vm8 = vcmp.eq.s32.totalorder %v5721_v41, %v7820_v6  ;;  %vm7966_vm2 = vmpackc.low %vm806_vm7, %vm798_vm13  ;;  %v10696_v63 = vmov 0  ;;  %vm1078_vm9 = vcmp.eq.s32.totalorder %v5563_v47, %v7789_v16 }
 0x2e3   : > { %v10697_v63 = vsel %vm7966_vm2, 4294967295, %v10696_v63  ;;  %vm1069_vm15 = vcmp.eq.s32.totalorder %v5695_v8, %v7820_v6  ;;  %4446 = vmatpush1.bf16.msk.msra.mxu0 %vm7949_vm0, %v10246_v42  ;;  %4506 = vmatpush1.bf16.msk.msra.mxu1 %vm7957_vm5, %v10246_v42  ;;  %vm7980_vm12 = vmpackc.low %vm1078_vm9, %vm1070_vm14  ;;  %v10698_v23 = vmov 0  ;;  %vm805_vm7 = vcmp.eq.s32.totalorder %v5593_v53, %v7820_v6 }
 0x2e4   : > { %v10699_v23 = vsel %vm7980_vm12, 4294967295, %v10698_v23  ;;  %vm782_vm13 = vcmp.eq.s32.totalorder %v5773_v15, %v7789_v16  ;;  %4448 = vmatprep.subr.msk.bf16.mxu0 %vm7966_vm2, %v10246_v42  ;;  %4508 = vmatprep.subr.msk.bf16.mxu1 %vm7980_vm12, %v10246_v42  ;;  %vm7994_vm0 = vmpackc.low %vm805_vm7, %vm797_vm8  ;;  %v10700_v57 = vmov 0  ;;  %vm1077_vm14 = vcmp.eq.s32.totalorder %v5563_v47, %v7820_v6 }
 0x2e5   : > { %v10701_v57 = vsel %vm7994_vm0, 4294967295, %v10700_v57  ;;  %vm1054_vm9 = vcmp.eq.s32.totalorder %v5747_v27, %v7789_v16  ;;  %vm8002_vm5 = vmpackc.low %vm1077_vm14, %vm1069_vm15  ;;  %v10702_v53 = vmov 0  ;;  %vm790_vm2 = vcmp.eq.s32.totalorder %v5648_v1, %v7789_v16 }
 0x2e6   : > { %v10703_v53 = vsel %vm8002_vm5, 4294967295, %v10702_v53  ;;  %vm781_vm12 = vcmp.eq.s32.totalorder %v5773_v15, %v7820_v6  ;;  %vm8010_vm8 = vmpackc.low %vm790_vm2, %vm782_vm13  ;;  %v10704_v4 = vmov 0  ;;  %vm1062_vm7 = vcmp.eq.s32.totalorder %v5621_v60, %v7789_v16 }
 0x2e7   : > { %v10705_v4 = vsel %vm8010_vm8, 4294967295, %v10704_v4  ;;  %vm1053_vm11 = vcmp.eq.s32.totalorder %v5747_v27, %v7820_v6  ;;  %4450 = vmatpush1.bf16.msk.msra.mxu0 %vm7994_vm0, %v10246_v42  ;;  %4510 = vmatpush1.bf16.msk.msra.mxu1 %vm8002_vm5, %v10246_v42  ;;  %vm8024_vm15 = vmpackc.low %vm1062_vm7, %vm1054_vm9  ;;  %v10706_v47 = vmov 0  ;;  %vm789_vm2 = vcmp.eq.s32.totalorder %v5648_v1, %v7820_v6 }
 0x2e8   : > { %v10707_v47 = vsel %vm8024_vm15, 4294967295, %v10706_v47  ;;  %vm766_vm13 = vcmp.eq.s32.totalorder %v5825_v34, %v7789_v16  ;;  %4452 = vmatprep.subr.msk.bf16.mxu0 %vm8010_vm8, %v10246_v42  ;;  %4512 = vmatprep.subr.msk.bf16.mxu1 %vm8024_vm15, %v10246_v42  ;;  %vm8038_vm14 = vmpackc.low %vm789_vm2, %vm781_vm12  ;;  %v10708_v8 = vmov 0  ;;  %vm1061_vm9 = vcmp.eq.s32.totalorder %v5621_v60, %v7820_v6 }
 0x2e9   : > { %v10709_v8 = vsel %vm8038_vm14, 4294967295, %v10708_v8  ;;  %vm1038_vm7 = vcmp.eq.s32.totalorder %v5799_v17, %v7789_v16  ;;  %vm8046_vm5 = vmpackc.low %vm1061_vm9, %vm1053_vm11  ;;  %v10710_v1 = vmov 0  ;;  %vm774_vm8 = vcmp.eq.s32.totalorder %v5700_v9, %v7789_v16 }
 0x2ea   : > { %v10711_v1 = vsel %vm8046_vm5, 4294967295, %v10710_v1  ;;  %vm765_vm15 = vcmp.eq.s32.totalorder %v5825_v34, %v7820_v6  ;;  %vm8054_vm12 = vmpackc.low %vm774_vm8, %vm766_vm13  ;;  %v10712_v41 = vmov 0  ;;  %vm1046_vm2 = vcmp.eq.s32.totalorder %v5674_v5, %v7789_v16 }
 0x2eb   : > { %v10713_v41 = vsel %vm8054_vm12, 4294967295, %v10712_v41  ;;  %vm1037_vm0 = vcmp.eq.s32.totalorder %v5799_v17, %v7820_v6  ;;  %4454 = vmatpush1.bf16.msk.msra.mxu0 %vm8038_vm14, %v10246_v42  ;;  %4514 = vmatpush1.bf16.msk.msra.mxu1 %vm8046_vm5, %v10246_v42  ;;  %vm8068_vm11 = vmpackc.low %vm1046_vm2, %vm1038_vm7  ;;  %v10714_v60 = vmov 0  ;;  %vm773_vm8 = vcmp.eq.s32.totalorder %v5700_v9, %v7820_v6 }
 0x2ec   : > { %v10715_v60 = vsel %vm8068_vm11, 4294967295, %v10714_v60  ;;  %vm750_vm13 = vcmp.eq.s32.totalorder %v5877_v36, %v7789_v16  ;;  %4456 = vmatprep.subr.msk.bf16.mxu0 %vm8054_vm12, %v10246_v42  ;;  %4516 = vmatprep.subr.msk.bf16.mxu1 %vm8068_vm11, %v10246_v42  ;;  %vm8082_vm9 = vmpackc.low %vm773_vm8, %vm765_vm15  ;;  %v10716_v27 = vmov 0  ;;  %vm1045_vm7 = vcmp.eq.s32.totalorder %v5674_v5, %v7820_v6 }
 0x2ed   : > { %v10717_v27 = vsel %vm8082_vm9, 4294967295, %v10716_v27  ;;  %vm1022_vm2 = vcmp.eq.s32.totalorder %v5851_v48, %v7789_v16  ;;  %vm8090_vm5 = vmpackc.low %vm1045_vm7, %vm1037_vm0  ;;  %v10718_v9 = vmov 0  ;;  %vm758_vm12 = vcmp.eq.s32.totalorder %v5752_v22, %v7789_v16 }
 0x2ee   : > { %v10719_v9 = vsel %vm8090_vm5, 4294967295, %v10718_v9  ;;  %vm749_vm11 = vcmp.eq.s32.totalorder %v5877_v36, %v7820_v6  ;;  %vm8098_vm15 = vmpackc.low %vm758_vm12, %vm750_vm13  ;;  %v10720_v15 = vmov 0  ;;  %vm1030_vm8 = vcmp.eq.s32.totalorder %v5726_v37, %v7789_v16 }
 0x2ef   : > { %v10721_v15 = vsel %vm8098_vm15, 4294967295, %v10720_v15  ;;  %vm1021_vm14 = vcmp.eq.s32.totalorder %v5851_v48, %v7820_v6  ;;  %4458 = vmatpush1.bf16.msk.msra.mxu0 %vm8082_vm9, %v10246_v42  ;;  %4518 = vmatpush1.bf16.msk.msra.mxu1 %vm8090_vm5, %v10246_v42  ;;  %vm8112_vm0 = vmpackc.low %vm1030_vm8, %vm1022_vm2  ;;  %v10722_v36 = vmov 0  ;;  %vm757_vm12 = vcmp.eq.s32.totalorder %v5752_v22, %v7820_v6 }
 0x2f0   : > { %v10723_v36 = vsel %vm8112_vm0, 4294967295, %v10722_v36  ;;  %vm734_vm13 = vcmp.eq.s32.totalorder %v5929_v39, %v7789_v16  ;;  %4460 = vmatprep.subr.msk.bf16.mxu0 %vm8098_vm15, %v10246_v42  ;;  %4520 = vmatprep.subr.msk.bf16.mxu1 %vm8112_vm0, %v10246_v42  ;;  %vm8126_vm7 = vmpackc.low %vm757_vm12, %vm749_vm11  ;;  %v10724_v5 = vmov 0  ;;  %vm1029_vm2 = vcmp.eq.s32.totalorder %v5726_v37, %v7820_v6 }
 0x2f1   : > { %v10725_v5 = vsel %vm8126_vm7, 4294967295, %v10724_v5  ;;  %vm1006_vm8 = vcmp.eq.s32.totalorder %v5903_v54, %v7789_v16  ;;  %vm8134_vm5 = vmpackc.low %vm1029_vm2, %vm1021_vm14  ;;  %v10726_v22 = vmov 0  ;;  %vm742_vm15 = vcmp.eq.s32.totalorder %v5804_v0, %v7789_v16 }
 0x2f2   : > { %v10727_v22 = vsel %vm8134_vm5, 4294967295, %v10726_v22  ;;  %vm733_vm0 = vcmp.eq.s32.totalorder %v5929_v39, %v7820_v6  ;;  %vm8142_vm11 = vmpackc.low %vm742_vm15, %vm734_vm13  ;;  %v10728_v17 = vmov 0  ;;  %vm1014_vm12 = vcmp.eq.s32.totalorder %v5778_v19, %v7789_v16 }
 0x2f3   : > { %v10729_v17 = vsel %vm8142_vm11, 4294967295, %v10728_v17  ;;  %vm1005_vm9 = vcmp.eq.s32.totalorder %v5903_v54, %v7820_v6  ;;  %4462 = vmatpush1.bf16.msk.msra.mxu0 %vm8126_vm7, %v10246_v42  ;;  %4522 = vmatpush1.bf16.msk.msra.mxu1 %vm8134_vm5, %v10246_v42  ;;  %vm8156_vm14 = vmpackc.low %vm1014_vm12, %vm1006_vm8  ;;  %v10730_v37 = vmov 0  ;;  %vm741_vm15 = vcmp.eq.s32.totalorder %v5804_v0, %v7820_v6  ;;  %v10765_v54 = vld [vmem:[#allocation50_spill] sm:$0xff] }
 0x2f4   : > { %v10731_v37 = vsel %vm8156_vm14, 4294967295, %v10730_v37  ;;  %vm974_vm13 = vcmp.eq.s32.totalorder %v5981_v26, %v7789_v16  ;;  %4464 = vmatprep.subr.msk.bf16.mxu0 %vm8142_vm11, %v10246_v42  ;;  %4524 = vmatprep.subr.msk.bf16.mxu1 %vm8156_vm14, %v10246_v42  ;;  %vm8170_vm2 = vmpackc.low %vm741_vm15, %vm733_vm0  ;;  %v10732_v34 = vmov 0  ;;  %vm1013_vm8 = vcmp.eq.s32.totalorder %v5778_v19, %v7820_v6 }
 0x2f5   : > { %v10733_v34 = vsel %vm8170_vm2, 4294967295, %v10732_v34  ;;  %vm990_vm12 = vcmp.eq.s32.totalorder %v5955_v25, %v7789_v16  ;;  %vm8178_vm5 = vmpackc.low %vm1013_vm8, %vm1005_vm9  ;;  %v10734_v0 = vmov 0  ;;  %vm982_vm11 = vcmp.eq.s32.totalorder %v5856_v49, %v7789_v16 }
 0x2f6   : > { %v10735_v0 = vsel %vm8178_vm5, 4294967295, %v10734_v0  ;;  %vm973_vm14 = vcmp.eq.s32.totalorder %v5981_v26, %v7820_v6  ;;  %vm8186_vm0 = vmpackc.low %vm982_vm11, %vm974_vm13  ;;  %v10736_v39 = vmov 0  ;;  %vm998_vm15 = vcmp.eq.s32.totalorder %v5830_v38, %v7789_v16 }
 0x2f7   : > { %v10737_v39 = vsel %vm8186_vm0, 4294967295, %v10736_v39  ;;  %vm989_vm7 = vcmp.eq.s32.totalorder %v5955_v25, %v7820_v6  ;;  %4466 = vmatpush1.bf16.msk.msra.mxu0 %vm8170_vm2, %v10246_v42  ;;  %4526 = vmatpush1.bf16.msk.msra.mxu1 %vm8178_vm5, %v10246_v42  ;;  %vm8200_vm9 = vmpackc.low %vm998_vm15, %vm990_vm12  ;;  %v10738_v19 = vmov 0  ;;  %vm981_vm11 = vcmp.eq.s32.totalorder %v5856_v49, %v7820_v6 }
 0x2f8   : > { %v10739_v19 = vsel %vm8200_vm9, 4294967295, %v10738_v19  ;;  %vm958_vm13 = vcmp.eq.s32.totalorder %v6033_v32, %v7789_v16  ;;  %4468 = vmatprep.subr.msk.bf16.mxu0 %vm8186_vm0, %v10246_v42  ;;  %4528 = vmatprep.subr.msk.bf16.mxu1 %vm8200_vm9, %v10246_v42  ;;  %vm8214_vm8 = vmpackc.low %vm981_vm11, %vm973_vm14  ;;  %v10740_v26 = vmov 0  ;;  %vm997_vm12 = vcmp.eq.s32.totalorder %v5830_v38, %v7820_v6 }
 0x2f9   : > { %v10741_v26 = vsel %vm8214_vm8, 4294967295, %v10740_v26  ;;  %vm1230_vm15 = vcmp.eq.s32.totalorder %v6007_v20, %v7789_v16  ;;  %vm8222_vm5 = vmpackc.low %vm997_vm12, %vm989_vm7  ;;  %v10742_v25 = vmov 0  ;;  %vm966_vm0 = vcmp.eq.s32.totalorder %v5908_v29, %v7789_v16 }
 0x2fa   : > { %v10743_v25 = vsel %vm8222_vm5, 4294967295, %v10742_v25  ;;  %vm957_vm9 = vcmp.eq.s32.totalorder %v6033_v32, %v7820_v6  ;;  %vm8230_vm14 = vmpackc.low %vm966_vm0, %vm958_vm13  ;;  %v10744_v48 = vmov 0  ;;  %vm1238_vm11 = vcmp.eq.s32.totalorder %v5882_v35, %v7789_v16 }
 0x2fb   : > { %v10745_v48 = vsel %vm8230_vm14, 4294967295, %v10744_v48  ;;  %vm1229_vm2 = vcmp.eq.s32.totalorder %v6007_v20, %v7820_v6  ;;  %4470 = vmatpush2.bf16.msk.msra.mxu0 %vm8214_vm8, %v10246_v42  ;;  %4530 = vmatpush1.bf16.msk.msra.mxu1 %vm8222_vm5, %v10246_v42  ;;  %vm8244_vm7 = vmpackc.low %vm1238_vm11, %vm1230_vm15  ;;  %v10746_v32 = vmov 0  ;;  %vm965_vm0 = vcmp.eq.s32.totalorder %v5908_v29, %v7820_v6 }
 0x2fc   : > { %v10747_v32 = vsel %vm8244_vm7, 4294967295, %v10746_v32  ;;  %vm942_vm13 = vcmp.eq.s32.totalorder %v6085_v7, %v7789_v16  ;;  %4472 = vmatprep.subr.msk.bf16.mxu0 %vm8230_vm14, %v10246_v42  ;;  %4532 = vmatprep.subr.msk.bf16.mxu1 %vm8244_vm7, %v10246_v42  ;;  %vm8258_vm12 = vmpackc.low %vm965_vm0, %vm957_vm9  ;;  %v10748_v20 = vmov 0  ;;  %vm1237_vm15 = vcmp.eq.s32.totalorder %v5882_v35, %v7820_v6 }
 0x2fd   : > { %v10749_v20 = vsel %vm8258_vm12, 4294967295, %v10748_v20  ;;  %vm1214_vm11 = vcmp.eq.s32.totalorder %v6059_v43, %v7789_v16  ;;  %vm8266_vm5 = vmpackc.low %vm1237_vm15, %vm1229_vm2  ;;  %v10750_v29 = vmov 0  ;;  %vm950_vm14 = vcmp.eq.s32.totalorder %v5960_v18, %v7789_v16 }
 0x2fe   : > { %v10751_v29 = vsel %vm8266_vm5, 4294967295, %v10750_v29  ;;  %vm941_vm7 = vcmp.eq.s32.totalorder %v6085_v7, %v7820_v6  ;;  %vm8274_vm9 = vmpackc.low %vm950_vm14, %vm942_vm13  ;;  %v10752_v38 = vmov 0  ;;  %vm1222_vm0 = vcmp.eq.s32.totalorder %v5934_v28, %v7789_v16  ;;  %v10758_v7 = vld [vmem:[#allocation65_spill] sm:$0xff] }
 0x2ff   : > { %v10753_v38 = vsel %vm8274_vm9, 4294967295, %v10752_v38  ;;  %vm1213_vm8 = vcmp.eq.s32.totalorder %v6059_v43, %v7820_v6  ;;  %4474 = vmatpush2.bf16.msk.msra.mxu0 %vm8258_vm12, %v10246_v42  ;;  %4534 = vmatpush2.bf16.msk.msra.mxu1 %vm8266_vm5, %v10246_v42  ;;  %vm8288_vm2 = vmpackc.low %vm1222_vm0, %vm1214_vm11  ;;  %v10755_v35 = vmov 0  ;;  %vm949_vm14 = vcmp.eq.s32.totalorder %v5960_v18, %v7820_v6  ;;  %v10761_v18 = vld [vmem:[#allocation61_spill] sm:$0xff] }
 0x300   : > { %10754 = vst [vmem:[#allocation217_spill] sm:$0xff] %v10753_v38  ;;  %v10756_v35 = vsel %vm8288_vm2, 4294967295, %v10755_v35  ;;  %vm926_vm13 = vcmp.eq.s32.totalorder %v10758_v7, %v7789_v16  ;;  %4476 = vmatprep.subr.msk.bf16.mxu0 %vm8274_vm9, %v10246_v42  ;;  %4536 = vmatprep.subr.msk.bf16.mxu1 %vm8288_vm2, %v10246_v42  ;;  %vm8302_vm15 = vmpackc.low %vm949_vm14, %vm941_vm7  ;;  %v10759_v43 = vmov 0  ;;  %vm1221_vm11 = vcmp.eq.s32.totalorder %v5934_v28, %v7820_v6  ;;  %v10769_v38 = vld [vmem:[#allocation47_spill] sm:$0xff] }
 0x301   : > { %10757 = vst [vmem:[#allocation218_spill] sm:$0xff] %v10756_v35  ;;  %v10760_v43 = vsel %vm8302_vm15, 4294967295, %v10759_v43  ;;  %vm1198_vm0 = vcmp.eq.s32.totalorder %v10761_v18, %v7789_v16  ;;  %vm8310_vm5 = vmpackc.low %vm1221_vm11, %vm1213_vm8  ;;  %v10762_v49 = vmov 0  ;;  %vm934_vm9 = vcmp.eq.s32.totalorder %v10765_v54, %v7789_v16 }
 0x302   : > { %v10763_v49 = vsel %vm8310_vm5, 4294967295, %v10762_v49  ;;  %vm925_vm2 = vcmp.eq.s32.totalorder %v10758_v7, %v7820_v6  ;;  %vm8318_vm7 = vmpackc.low %vm934_vm9, %vm926_vm13  ;;  %v10766_v35 = vmov 0  ;;  %vm1206_vm14 = vcmp.eq.s32.totalorder %v10769_v38, %v7789_v16  ;;  %v10773_v7 = vld [vmem:[#allocation72_spill] sm:$0xff] }
 0x303   : > { %10764 = vst [vmem:[#allocation65_spill] sm:$0xff] %v10763_v49  ;;  %v10767_v35 = vsel %vm8318_vm7, 4294967295, %v10766_v35  ;;  %vm1197_vm12 = vcmp.eq.s32.totalorder %v10761_v18, %v7820_v6  ;;  %4478 = vmatpush2.bf16.msk.msra.mxu0 %vm8302_vm15, %v10246_v42  ;;  %4538 = vmatpush2.bf16.msk.msra.mxu1 %vm8310_vm5, %v10246_v42  ;;  %vm8332_vm8 = vmpackc.low %vm1206_vm14, %vm1198_vm0  ;;  %v10770_v28 = vmov 0  ;;  %vm933_vm9 = vcmp.eq.s32.totalorder %v10765_v54, %v7820_v6  ;;  %v10776_v54 = vld [vmem:[#allocation69_spill] sm:$0xff] }
 0x304   : > { %10768 = vst [vmem:[#allocation61_spill] sm:$0xff] %v10767_v35  ;;  %v10771_v28 = vsel %vm8332_vm8, 4294967295, %v10770_v28  ;;  %vm910_vm13 = vcmp.eq.s32.totalorder %v10773_v7, %v7789_v16  ;;  %4480 = vmatprep.subr.msk.bf16.mxu0 %vm8318_vm7, %v10246_v42  ;;  %4540 = vmatprep.subr.msk.bf16.mxu1 %vm8332_vm8, %v10246_v42  ;;  %vm8346_vm11 = vmpackc.low %vm933_vm9, %vm925_vm2  ;;  %v10774_v18 = vmov 0  ;;  %vm1205_vm0 = vcmp.eq.s32.totalorder %v10769_v38, %v7820_v6  ;;  %v10779_v35 = vld [vmem:[#allocation58_spill] sm:$0xff] }
 0x305   : > { %10772 = vst [vmem:[#allocation50_spill] sm:$0xff] %v10771_v28  ;;  %v10775_v18 = vsel %vm8346_vm11, 4294967295, %v10774_v18  ;;  %vm1182_vm14 = vcmp.eq.s32.totalorder %v10776_v54, %v7789_v16  ;;  %vm8354_vm5 = vmpackc.low %vm1205_vm0, %vm1197_vm12  ;;  %v10777_v49 = vmov 0  ;;  %vm918_vm7 = vcmp.eq.s32.totalorder %v10779_v35, %v7789_v16 }
 0x306   : > { %v10778_v49 = vsel %vm8354_vm5, 4294967295, %v10777_v49  ;;  %vm909_vm8 = vcmp.eq.s32.totalorder %v10773_v7, %v7820_v6  ;;  %vm8362_vm2 = vmpackc.low %vm918_vm7, %vm910_vm13  ;;  %v10780_v28 = vmov 0  ;;  %vm1190_vm9 = vcmp.eq.s32.totalorder %v10620_v2, %v7789_v16  ;;  %v10786_v7 = vld [vmem:[#allocation80_spill] sm:$0xff] }
 0x307   : > { %v10781_v28 = vsel %vm8362_vm2, 4294967295, %v10780_v28  ;;  %vm1181_vm15 = vcmp.eq.s32.totalorder %v10776_v54, %v7820_v6  ;;  %4482 = vmatpush2.bf16.msk.msra.mxu0 %vm8346_vm11, %v10246_v42  ;;  %4542 = vmatpush2.bf16.msk.msra.mxu1 %vm8354_vm5, %v10246_v42  ;;  %vm8376_vm12 = vmpackc.low %vm1190_vm9, %vm1182_vm14  ;;  %v10783_v38 = vmov 0  ;;  %vm917_vm7 = vcmp.eq.s32.totalorder %v10779_v35, %v7820_v6 }
 0x308   : > { %10782 = vst [vmem:[#allocation47_spill] sm:$0xff] %v10781_v28  ;;  %v10784_v38 = vsel %vm8376_vm12, 4294967295, %v10783_v38  ;;  %vm894_vm13 = vcmp.eq.s32.totalorder %v10786_v7, %v7789_v16  ;;  %4484 = vmatprep.subr.msk.bf16.mxu0 %vm8362_vm2, %v10246_v42  ;;  %4544 = vmatprep.subr.msk.bf16.mxu1 %vm8376_vm12, %v10246_v42  ;;  %vm8390_vm0 = vmpackc.low %vm917_vm7, %vm909_vm8  ;;  %v10787_v54 = vmov 0  ;;  %vm1189_vm14 = vcmp.eq.s32.totalorder %v10620_v2, %v7820_v6  ;;  %v10792_v28 = vld [vmem:[#allocation68_spill] sm:$0xff] }
 0x309   : > { %10785 = vst [vmem:[#allocation72_spill] sm:$0xff] %v10784_v38  ;;  %v10788_v54 = vsel %vm8390_vm0, 4294967295, %v10787_v54  ;;  %vm1166_vm9 = vcmp.eq.s32.totalorder %v10628_v50, %v7789_v16  ;;  %vm8398_vm5 = vmpackc.low %vm1189_vm14, %vm1181_vm15  ;;  %v10789_v35 = vmov 0  ;;  %vm902_vm2 = vcmp.eq.s32.totalorder %v10792_v28, %v7789_v16 }
 0x30a   : > { %v10790_v35 = vsel %vm8398_vm5, 4294967295, %v10789_v35  ;;  %vm893_vm12 = vcmp.eq.s32.totalorder %v10786_v7, %v7820_v6  ;;  %vm8406_vm8 = vmpackc.low %vm902_vm2, %vm894_vm13  ;;  %v10793_v38 = vmov 0  ;;  %vm1174_vm7 = vcmp.eq.s32.totalorder %v10636_v13, %v7789_v16  ;;  %v10799_v7 = vld [vmem:[#allocation88_spill] sm:$0xff] }
 0x30b   : > { %10791 = vst [vmem:[#allocation69_spill] sm:$0xff] %v10790_v35  ;;  %v10794_v38 = vsel %vm8406_vm8, 4294967295, %v10793_v38  ;;  %vm1165_vm11 = vcmp.eq.s32.totalorder %v10628_v50, %v7820_v6  ;;  %4486 = vmatpush2.bf16.msk.msra.mxu0 %vm8390_vm0, %v10246_v42  ;;  %4546 = vmatpush2.bf16.msk.msra.mxu1 %vm8398_vm5, %v10246_v42  ;;  %vm8420_vm15 = vmpackc.low %vm1174_vm7, %vm1166_vm9  ;;  %v10796_v2 = vmov 0  ;;  %vm901_vm2 = vcmp.eq.s32.totalorder %v10792_v28, %v7820_v6  ;;  %v10809_v35 = vld [vmem:[#allocation73_spill] sm:$0xff] }
 0x30c   : > { %10795 = vst [vmem:[#allocation58_spill] sm:$0xff] %v10794_v38  ;;  %v10797_v2 = vsel %vm8420_vm15, 4294967295, %v10796_v2  ;;  %vm878_vm13 = vcmp.eq.s32.totalorder %v10799_v7, %v7789_v16  ;;  %4488 = vmatprep.subr.msk.bf16.mxu0 %vm8406_vm8, %v10246_v42  ;;  %4548 = vmatprep.subr.msk.bf16.mxu1 %vm8420_vm15, %v10246_v42  ;;  %vm8434_vm14 = vmpackc.low %vm901_vm2, %vm893_vm12  ;;  %v10800_v50 = vmov 0  ;;  %vm1173_vm9 = vcmp.eq.s32.totalorder %v10636_v13, %v7820_v6  ;;  %v10805_v38 = vld [vmem:[#allocation79_spill] sm:$0xff] }
 0x30d   : > { %10798 = vst [vmem:[#allocation80_spill] sm:$0xff] %v10797_v2  ;;  %v10801_v50 = vsel %vm8434_vm14, 4294967295, %v10800_v50  ;;  %vm1150_vm7 = vcmp.eq.s32.totalorder %v10643_v55, %v7789_v16  ;;  %vm8442_vm5 = vmpackc.low %vm1173_vm9, %vm1165_vm11  ;;  %v10802_v28 = vmov 0  ;;  %vm886_vm8 = vcmp.eq.s32.totalorder %v10805_v38, %v7789_v16 }
 0x30e   : > { %v10803_v28 = vsel %vm8442_vm5, 4294967295, %v10802_v28  ;;  %vm877_vm15 = vcmp.eq.s32.totalorder %v10799_v7, %v7820_v6  ;;  %vm8450_vm12 = vmpackc.low %vm886_vm8, %vm878_vm13  ;;  %v10806_v2 = vmov 0  ;;  %vm1158_vm2 = vcmp.eq.s32.totalorder %v10809_v35, %v7789_v16  ;;  %v10813_v7 = vld [vmem:[#allocation95_spill] sm:$0xff] }
 0x30f   : > { %10804 = vst [vmem:[#allocation68_spill] sm:$0xff] %v10803_v28  ;;  %v10807_v2 = vsel %vm8450_vm12, 4294967295, %v10806_v2  ;;  %vm1149_vm0 = vcmp.eq.s32.totalorder %v10643_v55, %v7820_v6  ;;  %4490 = vmatpush2.bf16.msk.msra.mxu0 %vm8434_vm14, %v10246_v42  ;;  %4550 = vmatpush2.bf16.msk.msra.mxu1 %vm8442_vm5, %v10246_v42  ;;  %vm8464_vm11 = vmpackc.low %vm1158_vm2, %vm1150_vm7  ;;  %v10810_v13 = vmov 0  ;;  %vm885_vm8 = vcmp.eq.s32.totalorder %v10805_v38, %v7820_v6  ;;  %v11124_v28 = vld [vmem:[#allocation173_spill] sm:$0xff] }
 0x310   : > { %10808 = vst [vmem:[#allocation88_spill] sm:$0xff] %v10807_v2  ;;  %v10811_v13 = vsel %vm8464_vm11, 4294967295, %v10810_v13  ;;  %vm862_vm13 = vcmp.eq.s32.totalorder %v10813_v7, %v7789_v16  ;;  %4492 = vmatprep.subr.msk.bf16.mxu0 %vm8450_vm12, %v10246_v42  ;;  %4552 = vmatprep.subr.msk.bf16.mxu1 %vm8464_vm11, %v10246_v42  ;;  %vm8478_vm9 = vmpackc.low %vm885_vm8, %vm877_vm15  ;;  %v10814_v55 = vmov 0  ;;  %vm1157_vm7 = vcmp.eq.s32.totalorder %v10809_v35, %v7820_v6 }
 0x311   : > { %10812 = vst [vmem:[#allocation79_spill] sm:$0xff] %v10811_v13  ;;  %v10815_v55 = vsel %vm8478_vm9, 4294967295, %v10814_v55  ;;  %vm1134_vm2 = vcmp.eq.s32.totalorder %v10657_v56, %v7789_v16  ;;  %vm8486_vm5 = vmpackc.low %vm1157_vm7, %vm1149_vm0  ;;  %v10817_v38 = vmov 0  ;;  %vm870_vm12 = vcmp.eq.s32.totalorder %v6325_v62, %v7789_v16 }
 0x312   : > { %10816 = vst [vmem:[#allocation73_spill] sm:$0xff] %v10815_v55  ;;  %v10818_v38 = vsel %vm8486_vm5, 4294967295, %v10817_v38  ;;  %vm8492_vm14 = vmpackc.low %vm870_vm12, %vm862_vm13  ;;  %v10820_v13 = vmov 0  ;;  %vm1142_vm15 = vcmp.eq.s32.totalorder %v10664_v58, %v7789_v16  ;;  %vm861_vm8 = vcmp.eq.s32.totalorder %v10813_v7, %v7820_v6  ;;  %v10986_v55 = vld [vmem:[#allocation106_spill] sm:$0xff] }
 0x313   : > { %10819 = vst [vmem:[#allocation95_spill] sm:$0xff] %v10818_v38  ;;  %v10821_v13 = vsel %vm8492_vm14, 4294967295, %v10820_v13  ;;  %4494 = vmatpush2.bf16.msk.msra.mxu0 %vm8478_vm9, %v10246_v42  ;;  %4554 = vmatpush2.bf16.msk.msra.mxu1 %vm8486_vm5, %v10246_v42  ;;  %vm8506_vm0 = vmpackc.low %vm1142_vm15, %vm1134_vm2  ;;  %v10823_v35 = vmov 0  ;;  %vm1133_vm12 = vcmp.eq.s32.totalorder %v10657_v56, %v7820_v6  ;;  %vm869_vm13 = vcmp.eq.s32.totalorder %v6325_v62, %v7820_v6 }
 0x314   : > { %10822 = vst [vmem:[#allocation219_spill] sm:$0xff] %v10821_v13  ;;  %v10824_v35 = vsel %vm8506_vm0, 4294967295, %v10823_v35  ;;  %4496 = vmatprep.subr.msk.bf16.mxu0 %vm8492_vm14, %v10246_v42  ;;  %4556 = vmatprep.subr.msk.bf16.mxu1 %vm8506_vm0, %v10246_v42  ;;  %vm1118_vm7 = vcmp.eq.s32.totalorder %v6401_v46, %v7789_v16  ;;  %vm8522_vm2 = vmpackc.low %vm869_vm13, %vm861_vm8  ;;  %v10826_v7 = vmov 0  ;;  %vm1141_vm15 = vcmp.eq.s32.totalorder %v10664_v58, %v7820_v6 }
 0x315   : > { %10825 = vst [vmem:[#allocation220_spill] sm:$0xff] %v10824_v35  ;;  %v10827_v7 = vsel %vm8522_vm2, 4294967295, %v10826_v7  ;;  %vm8528_vm5 = vmpackc.low %vm1141_vm15, %vm1133_vm12  ;;  %v10829_v56 = vmov 0  ;;  %vm1126_vm0 = vcmp.eq.s32.totalorder %v6380_v21, %v7789_v16  ;;  %v10832_v62 = vmov 0  ;;  %v10849_v35 = vld [vmem:[#allocation21_spill] sm:$0xff] }
 0x316   : > { %10828 = vst [vmem:[#allocation221_spill] sm:$0xff] %v10827_v7  ;;  %v10830_v56 = vsel %vm8528_vm5, 4294967295, %v10829_v56  ;;  %vm8540_vm8 = vmpackc.low %vm1126_vm0, %vm1118_vm7  ;;  %vm1117_vm12 = vcmp.eq.s32.totalorder %v6401_v46, %v7820_v6  ;;  %vm1125_vm13 = vcmp.eq.s32.totalorder %v6380_v21, %v7820_v6  ;;  %v10836_v16 = vmov 0  ;;  %v10845_v46 = vld [vmem:[#allocation18_spill] sm:$0xff]  ;;  %v10847_v21 = vld [vmem:[#allocation23_spill] sm:$0xff] }
 0x317   : > { %10831 = vst [vmem:[#allocation222_spill] sm:$0xff] %v10830_v56  ;;  %4498 = vmatpush2.bf16.msk.msra.mxu0 %vm8522_vm2, %v10246_v42  ;;  %4558 = vmatpush2.bf16.msk.msra.mxu1 %vm8528_vm5, %v10246_v42  ;;  %v10833_v62 = vsel %vm8540_vm8, 4294967295, %v10832_v62  ;;  %vm8555_vm0 = vmpackc.low %vm1125_vm13, %vm1117_vm12  ;;  %v10853_v56 = vld [vmem:[#allocation24_spill] sm:$0xff] }
 0x318   : > { %10834 = vst [vmem:[#allocation223_spill] sm:$0xff] %v10833_v62  ;;  %4560 = vmatprep.subr.msk.bf16.mxu1 %vm8540_vm8, %v10246_v42  ;;  %4564 = vmatprep.subr.msk.bf16.mxu0 %vm5573_vm4, %v10246_v42  ;;  %v10837_v16 = vsel %vm8555_vm0, 4294967295, %v10836_v16  ;;  %vm10846_vm4 = vnez %v10845_v46  ;;  %v10857_v46 = vld [vmem:[#allocation27_spill] sm:$0xff] }
 0x319   : > { %10838 = vst [vmem:[#allocation15_spill] sm:$0xff] %v10837_v16  ;;  %vm10858_vm7 = vnez %v10857_v46  ;;  %v10871_v46 = vld [vmem:[#allocation30_spill] sm:$0xff] }
 0x31a   : > { %2861 = vmatmul.mubr.bf16.vlgmr.msra.gmra.mxu0 %v6397_v3  ;;  %v2604_v62 = vpop.f32.mrf.mxu0  ;;  %v10842_v3 = vld [vmem:[#allocation12_spill] sm:$0xff] }
 0x31b   : > { %4562 = vmatpush2.bf16.msk.msra.mxu1 %vm8555_vm0, %v10246_v42  ;;  %4566 = vmatpush1.bf16.msk.msra.mxu0 %vm5584_vm6, %v10246_v42  ;;  %vm10848_vm6 = vnez %v10847_v21  ;;  %v10859_v21 = vld [vmem:[#allocation25_spill] sm:$0xff] }
 0x31c   : > { %4568 = vmatprep.subr.msk.bf16.mxu0 %vm5630_vm1, %v10246_v42  ;;  %4628 = vmatprep.subr.msk.bf16.mxu1 %vm5601_vm10, %v10246_v42  ;;  %v2606_v58 = vpop.f32.mrf.mxu0  ;;  %vm10850_vm10 = vnez %v10849_v35  ;;  %vm10854_vm1 = vnez %v10853_v56  ;;  %vm10860_vm15 = vnez %v10859_v21  ;;  %v10861_v35 = vld [vmem:[#allocation28_spill] sm:$0xff]  ;;  %v10867_v56 = vld [vmem:[#allocation29_spill] sm:$0xff]  ;;  %v10873_v21 = vld [vmem:[#allocation35_spill] sm:$0xff] }
 0x31d   : > { %2946 = vmatprep.mubr.bf16.mxu0 %v10842_v3  ;;  %vm10862_vm12 = vnez %v10861_v35  ;;  %v10875_v35 = vld [vmem:[#allocation33_spill] sm:$0xff] }
 0x31e   : > { %v2647_v6 = vpop.f32.mrf.mxu1  ;;  %2904 = vmatmul.mubr.bf16.vlgmr.msra.gmra.mxu1 %v6448_v10 }
 0x31f   : > { %v8573_v16 = vadd.f32 %v2647_v6, %v2604_v62  ;;  %4570 = vmatpush1.bf16.msk.msra.mxu0 %vm5639_vm3, %v10246_v42  ;;  %4630 = vmatpush1.bf16.msk.msra.mxu1 %vm10846_vm4, %v10246_v42  ;;  %v10852_v62 = vld [vmem:[#allocation13_spill] sm:$0xff]  ;;  %v10855_v6 = vld [vmem:[#allocation22_spill] sm:$0xff] }
 0x320   : > { %v2649_v7 = vpop.f32.mrf.mxu1  ;;  %4572 = vmatprep.subr.msk.bf16.mxu0 %vm10848_vm6, %v10246_v42  ;;  %4632 = vmatprep.subr.msk.bf16.mxu1 %vm10850_vm10, %v10246_v42  ;;  %vm10856_vm3 = vnez %v10855_v6  ;;  %vm10868_vm6 = vnez %v10867_v56  ;;  %v10869_v6 = vld [vmem:[#allocation32_spill] sm:$0xff]  ;;  %v10881_v56 = vld [vmem:[#allocation39_spill] sm:$0xff] }
 0x321   : > { %10843 = vst [vmem:[#allocation16_spill] sm:$0xff] %v8573_v16  ;;  %v8587_v10 = vadd.f32 %v2649_v7, %v2606_v58  ;;  %2989 = vmatprep.mubr.bf16.mxu1 %v10852_v62  ;;  %v10863_v7 = vld [vmem:[#allocation26_spill] sm:$0xff]  ;;  %v10865_v58 = vld [vmem:[#allocation31_spill] sm:$0xff]  ;;  %vm10870_vm10 = vnez %v10869_v6  ;;  %v10883_v6 = vld [vmem:[#allocation37_spill] sm:$0xff] }
 0x322   : > { %vm10864_vm13 = vnez %v10863_v7  ;;  %vm10866_vm4 = vnez %v10865_v58  ;;  %v10877_v7 = vld [vmem:[#allocation36_spill] sm:$0xff]  ;;  %v10879_v58 = vld [vmem:[#allocation34_spill] sm:$0xff] }
 0x323   : > { %10851 = vst [vmem:[#allocation19_spill] sm:$0xff] %v8587_v10  ;;  %4574 = vmatpush1.bf16.msk.msra.mxu0 %vm10854_vm1, %v10246_v42  ;;  %4634 = vmatpush1.bf16.msk.msra.mxu1 %vm10856_vm3, %v10246_v42  ;;  %vm10872_vm1 = vnez %v10871_v46  ;;  %vm10874_vm3 = vnez %v10873_v21  ;;  %v10885_v46 = vld [vmem:[#allocation40_spill] sm:$0xff]  ;;  %v10887_v21 = vld [vmem:[#allocation38_spill] sm:$0xff]  ;;  %v10968_v10 = vld [vmem:[#allocation87_spill] sm:$0xff] }
 0x324   : > { %4576 = vmatprep.subr.msk.bf16.mxu0 %vm10858_vm7, %v10246_v42  ;;  %4636 = vmatprep.subr.msk.bf16.mxu1 %vm10860_vm15, %v10246_v42  ;;  %vm10876_vm7 = vnez %v10875_v35  ;;  %vm10878_vm15 = vnez %v10877_v7  ;;  %v10889_v35 = vld [vmem:[#allocation43_spill] sm:$0xff]  ;;  %v10891_v7 = vld [vmem:[#allocation41_spill] sm:$0xff] }
 0x327   : > { %4578 = vmatpush1.bf16.msk.msra.mxu0 %vm10862_vm12, %v10246_v42  ;;  %4638 = vmatpush1.bf16.msk.msra.mxu1 %vm10864_vm13, %v10246_v42  ;;  %vm10880_vm12 = vnez %v10879_v58  ;;  %vm10882_vm13 = vnez %v10881_v56  ;;  %v10893_v58 = vld [vmem:[#allocation44_spill] sm:$0xff]  ;;  %v10895_v56 = vld [vmem:[#allocation42_spill] sm:$0xff] }
 0x328   : > { %4580 = vmatprep.subr.msk.bf16.mxu0 %vm10866_vm4, %v10246_v42  ;;  %4640 = vmatprep.subr.msk.bf16.mxu1 %vm10868_vm6, %v10246_v42  ;;  %vm10884_vm4 = vnez %v10883_v6  ;;  %vm10886_vm6 = vnez %v10885_v46  ;;  %v10897_v6 = vld [vmem:[#allocation48_spill] sm:$0xff]  ;;  %v10899_v46 = vld [vmem:[#allocation45_spill] sm:$0xff] }
 0x32b   : > { %4582 = vmatpush1.bf16.msk.msra.mxu0 %vm10870_vm10, %v10246_v42  ;;  %4642 = vmatpush1.bf16.msk.msra.mxu1 %vm10872_vm1, %v10246_v42  ;;  %vm10888_vm10 = vnez %v10887_v21  ;;  %vm10890_vm1 = vnez %v10889_v35  ;;  %v10901_v21 = vld [vmem:[#allocation49_spill] sm:$0xff]  ;;  %v10903_v35 = vld [vmem:[#allocation46_spill] sm:$0xff] }
 0x32c   : > { %4584 = vmatprep.subr.msk.bf16.mxu0 %vm10874_vm3, %v10246_v42  ;;  %4644 = vmatprep.subr.msk.bf16.mxu1 %vm10876_vm7, %v10246_v42  ;;  %vm10892_vm3 = vnez %v10891_v7  ;;  %vm10894_vm7 = vnez %v10893_v58  ;;  %v10905_v7 = vld [vmem:[#allocation54_spill] sm:$0xff]  ;;  %v10907_v58 = vld [vmem:[#allocation51_spill] sm:$0xff] }
 0x32f   : > { %4586 = vmatpush1.bf16.msk.msra.mxu0 %vm10878_vm15, %v10246_v42  ;;  %4646 = vmatpush1.bf16.msk.msra.mxu1 %vm10880_vm12, %v10246_v42  ;;  %vm10896_vm15 = vnez %v10895_v56  ;;  %vm10898_vm12 = vnez %v10897_v6  ;;  %v10909_v56 = vld [vmem:[#allocation55_spill] sm:$0xff]  ;;  %v10911_v6 = vld [vmem:[#allocation52_spill] sm:$0xff] }
 0x330   : > { %4588 = vmatprep.subr.msk.bf16.mxu0 %vm10882_vm13, %v10246_v42  ;;  %4648 = vmatprep.subr.msk.bf16.mxu1 %vm10884_vm4, %v10246_v42  ;;  %vm10900_vm13 = vnez %v10899_v46  ;;  %vm10902_vm4 = vnez %v10901_v21  ;;  %v10913_v46 = vld [vmem:[#allocation59_spill] sm:$0xff]  ;;  %v10915_v21 = vld [vmem:[#allocation56_spill] sm:$0xff] }
 0x333   : > { %4590 = vmatpush1.bf16.msk.msra.mxu0 %vm10886_vm6, %v10246_v42  ;;  %4650 = vmatpush1.bf16.msk.msra.mxu1 %vm10888_vm10, %v10246_v42  ;;  %vm10904_vm6 = vnez %v10903_v35  ;;  %vm10906_vm10 = vnez %v10905_v7  ;;  %v10917_v35 = vld [vmem:[#allocation60_spill] sm:$0xff]  ;;  %v10919_v7 = vld [vmem:[#allocation57_spill] sm:$0xff] }
 0x334   : > { %4592 = vmatprep.subr.msk.bf16.mxu0 %vm10890_vm1, %v10246_v42  ;;  %4652 = vmatprep.subr.msk.bf16.mxu1 %vm10892_vm3, %v10246_v42  ;;  %vm10908_vm1 = vnez %v10907_v58  ;;  %vm10910_vm3 = vnez %v10909_v56  ;;  %v10921_v58 = vld [vmem:[#allocation66_spill] sm:$0xff]  ;;  %v10923_v56 = vld [vmem:[#allocation63_spill] sm:$0xff] }
 0x337   : > { %4594 = vmatpush1.bf16.msk.msra.mxu0 %vm10894_vm7, %v10246_v42  ;;  %4654 = vmatpush1.bf16.msk.msra.mxu1 %vm10896_vm15, %v10246_v42  ;;  %vm10912_vm7 = vnez %v10911_v6  ;;  %vm10914_vm15 = vnez %v10913_v46  ;;  %v10925_v6 = vld [vmem:[#allocation67_spill] sm:$0xff]  ;;  %v10927_v46 = vld [vmem:[#allocation64_spill] sm:$0xff] }
 0x338   : > { %4596 = vmatprep.subr.msk.bf16.mxu0 %vm10898_vm12, %v10246_v42  ;;  %4656 = vmatprep.subr.msk.bf16.mxu1 %vm10900_vm13, %v10246_v42  ;;  %vm10916_vm12 = vnez %v10915_v21  ;;  %vm10918_vm13 = vnez %v10917_v35  ;;  %v10929_v21 = vld [vmem:[#allocation74_spill] sm:$0xff] }
 0x339   : > { %v10931_v35 = vld [vmem:[#allocation70_spill] sm:$0xff] }
 0x33b   : > { %4598 = vmatpush2.bf16.msk.msra.mxu0 %vm10902_vm4, %v10246_v42  ;;  %4658 = vmatpush1.bf16.msk.msra.mxu1 %vm10904_vm6, %v10246_v42  ;;  %vm10920_vm4 = vnez %v10919_v7  ;;  %vm10922_vm6 = vnez %v10921_v58  ;;  %v10933_v7 = vld [vmem:[#allocation75_spill] sm:$0xff] }
 0x33c   : > { %4600 = vmatprep.subr.msk.bf16.mxu0 %vm10906_vm10, %v10246_v42  ;;  %4660 = vmatprep.subr.msk.bf16.mxu1 %vm10908_vm1, %v10246_v42  ;;  %vm10924_vm10 = vnez %v10923_v56  ;;  %vm10926_vm1 = vnez %v10925_v6  ;;  %v10935_v58 = vld [vmem:[#allocation71_spill] sm:$0xff]  ;;  %v10937_v56 = vld [vmem:[#allocation81_spill] sm:$0xff] }
 0x33d   : > { %v10939_v6 = vld [vmem:[#allocation77_spill] sm:$0xff] }
 0x33f   : > { %4602 = vmatpush2.bf16.msk.msra.mxu0 %vm10910_vm3, %v10246_v42  ;;  %4662 = vmatpush2.bf16.msk.msra.mxu1 %vm10912_vm7, %v10246_v42  ;;  %vm10928_vm3 = vnez %v10927_v46  ;;  %vm10930_vm7 = vnez %v10929_v21  ;;  %v10941_v46 = vld [vmem:[#allocation82_spill] sm:$0xff] }
 0x340   : > { %4604 = vmatprep.subr.msk.bf16.mxu0 %vm10914_vm15, %v10246_v42  ;;  %4664 = vmatprep.subr.msk.bf16.mxu1 %vm10916_vm12, %v10246_v42  ;;  %vm10932_vm15 = vnez %v10931_v35  ;;  %vm10934_vm12 = vnez %v10933_v7  ;;  %v10943_v21 = vld [vmem:[#allocation78_spill] sm:$0xff]  ;;  %v10945_v35 = vld [vmem:[#allocation89_spill] sm:$0xff] }
 0x341   : > { %v10947_v7 = vld [vmem:[#allocation85_spill] sm:$0xff] }
 0x343   : > { %4606 = vmatpush2.bf16.msk.msra.mxu0 %vm10918_vm13, %v10246_v42  ;;  %4666 = vmatpush2.bf16.msk.msra.mxu1 %vm10920_vm4, %v10246_v42  ;;  %vm10936_vm13 = vnez %v10935_v58  ;;  %vm10938_vm4 = vnez %v10937_v56  ;;  %v10949_v58 = vld [vmem:[#allocation90_spill] sm:$0xff] }
 0x344   : > { %4608 = vmatprep.subr.msk.bf16.mxu0 %vm10922_vm6, %v10246_v42  ;;  %4668 = vmatprep.subr.msk.bf16.mxu1 %vm10924_vm10, %v10246_v42  ;;  %vm10940_vm6 = vnez %v10939_v6  ;;  %vm10942_vm10 = vnez %v10941_v46  ;;  %v10951_v56 = vld [vmem:[#allocation86_spill] sm:$0xff]  ;;  %v8740_v6 = vpop.f32.mrf.mxu0  ;;  %v10954_v46 = vld [vmem:[#allocation97_spill] sm:$0xff] }
 0x345   : > { %10953 = vst [vmem:[#allocation17_spill] sm:$0xff] %v8740_v6  ;;  %v10964_v6 = vld [vmem:[#allocation101_spill] sm:$0xff] }
 0x347   : > { %4610 = vmatpush2.bf16.msk.msra.mxu0 %vm10926_vm1, %v10246_v42  ;;  %4670 = vmatpush2.bf16.msk.msra.mxu1 %vm10928_vm3, %v10246_v42  ;;  %vm10944_vm1 = vnez %v10943_v21  ;;  %vm10946_vm3 = vnez %v10945_v35  ;;  %v10956_v21 = vld [vmem:[#allocation93_spill] sm:$0xff]  ;;  %v10958_v35 = vld [vmem:[#allocation98_spill] sm:$0xff] }
 0x348   : > { %4612 = vmatprep.subr.msk.bf16.mxu0 %vm10930_vm7, %v10246_v42  ;;  %4672 = vmatprep.subr.msk.bf16.mxu1 %vm10932_vm15, %v10246_v42  ;;  %vm10948_vm7 = vnez %v10947_v7  ;;  %vm10950_vm15 = vnez %v10949_v58  ;;  %v10960_v7 = vld [vmem:[#allocation94_spill] sm:$0xff]  ;;  %v8754_v58 = vpop.f32.mrf.mxu0 }
 0x349   : > { %10962 = vst [vmem:[#allocation12_spill] sm:$0xff] %v8754_v58 }
 0x34b   : > { %4614 = vmatpush2.bf16.msk.msra.mxu0 %vm10934_vm12, %v10246_v42  ;;  %4674 = vmatpush2.bf16.msk.msra.mxu1 %vm10936_vm13, %v10246_v42  ;;  %vm10952_vm12 = vnez %v10951_v56  ;;  %vm10955_vm13 = vnez %v10954_v46  ;;  %v8756_v56 = vpop.f32.mrf.mxu1  ;;  %v10966_v46 = vld [vmem:[#allocation96_spill] sm:$0xff] }
 0x34c   : > { %4616 = vmatprep.subr.msk.bf16.mxu0 %vm10938_vm4, %v10246_v42  ;;  %4676 = vmatprep.subr.msk.bf16.mxu1 %vm10940_vm6, %v10246_v42  ;;  %vm10957_vm4 = vnez %v10956_v21  ;;  %vm10959_vm6 = vnez %v10958_v35  ;;  %10963 = vst [vmem:[#allocation20_spill] sm:$0xff] %v8756_v56  ;;  %v10969_v35 = vld [vmem:[#allocation102_spill] sm:$0xff] }
 0x34d   : > { %v8771_v58 = vpop.f32.mrf.mxu1 }
 0x34e   : > { %10973 = vst [vmem:[#allocation18_spill] sm:$0xff] %v8771_v58  ;;  %v10982_v58 = vld [vmem:[#allocation104_spill] sm:$0xff] }
 0x34f   : > { %4618 = vmatpush2.bf16.msk.msra.mxu0 %vm10942_vm10, %v10246_v42  ;;  %4678 = vmatpush2.bf16.msk.msra.mxu1 %vm10944_vm1, %v10246_v42  ;;  %vm10961_vm10 = vnez %v10960_v7  ;;  %vm10965_vm1 = vnez %v10964_v6  ;;  %v10971_v7 = vld [vmem:[#allocation99_spill] sm:$0xff] }
 0x350   : > { %4620 = vmatprep.subr.msk.bf16.mxu0 %vm10946_vm3, %v10246_v42  ;;  %4680 = vmatprep.subr.msk.bf16.mxu1 %vm10948_vm7, %v10246_v42  ;;  %vm10967_vm3 = vnez %v10966_v46  ;;  %vm10970_vm7 = vnez %v10969_v35  ;;  %v10974_v6 = vld [vmem:[#allocation103_spill] sm:$0xff]  ;;  %v10976_v46 = vld [vmem:[#allocation100_spill] sm:$0xff] }
 0x351   : > { %v10978_v35 = vld [vmem:[#allocation91_spill] sm:$0xff] }
 0x353   : > { %4622 = vmatpush2.bf16.msk.msra.mxu0 %vm10950_vm15, %v10246_v42  ;;  %4682 = vmatpush2.bf16.msk.msra.mxu1 %vm10952_vm12, %v10246_v42  ;;  %vm10972_vm15 = vnez %v10971_v7  ;;  %vm10975_vm12 = vnez %v10974_v6  ;;  %v10980_v7 = vld [vmem:[#allocation105_spill] sm:$0xff] }
 0x354   : > { %4624 = vmatprep.subr.msk.bf16.mxu0 %vm10955_vm13, %v10246_v42  ;;  %4684 = vmatprep.subr.msk.bf16.mxu1 %vm10957_vm4, %v10246_v42  ;;  %vm10977_vm13 = vnez %v10976_v46  ;;  %vm10981_vm4 = vnez %v10980_v7  ;;  %v10984_v46 = vld [vmem:[#allocation107_spill] sm:$0xff] }
 0x357   : > { %4626 = vmatpush2.bf16.msk.msra.mxu0 %vm10959_vm6, %v10246_v42  ;;  %4686 = vmatpush2.bf16.msk.msra.mxu1 %vm10961_vm10, %v10246_v42  ;;  %vm10983_vm6 = vnez %v10982_v58  ;;  %vm10985_vm10 = vnez %v10984_v46  ;;  %v10990_v58 = vld [vmem:[#allocation109_spill] sm:$0xff] }
 0x358   : > { %4688 = vmatprep.subr.msk.bf16.mxu1 %vm10965_vm1, %v10246_v42  ;;  %4692 = vmatprep.subr.msk.bf16.mxu0 %vm10967_vm3, %v10246_v42  ;;  %vm10987_vm1 = vnez %v10986_v55  ;;  %vm10991_vm3 = vnez %v10990_v58  ;;  %v10994_v55 = vld [vmem:[#allocation111_spill] sm:$0xff]  ;;  %v11005_v58 = vld [vmem:[#allocation114_spill] sm:$0xff] }
 0x35a   : > { %v2690_v21 = vpop.f32.mrf.mxu0  ;;  %2947 = vmatmul.mubr.bf16.vlgmr.msra.gmra.mxu0 %v10968_v10 }
 0x35b   : > { %4690 = vmatpush2.bf16.msk.msra.mxu1 %vm10970_vm7, %v10246_v42  ;;  %4694 = vmatpush1.bf16.msk.msra.mxu0 %vm10972_vm15, %v10246_v42  ;;  %vm10995_vm15 = vnez %v10994_v55  ;;  %v11007_v55 = vld [vmem:[#allocation117_spill] sm:$0xff] }
 0x35c   : > { %v2692_v56 = vpop.f32.mrf.mxu0  ;;  %4696 = vmatprep.subr.msk.bf16.mxu0 %vm10975_vm12, %v10246_v42  ;;  %4756 = vmatprep.subr.msk.bf16.mxu1 %vm10977_vm13, %v10246_v42 }
 0x35d   : > { %3032 = vmatprep.mubr.bf16.mxu0 %v10842_v3 }
 0x35e   : > { %v2733_v16 = vpop.f32.mrf.mxu1  ;;  %2990 = vmatmul.mubr.bf16.vlgmr.msra.gmra.mxu1 %v10978_v35  ;;  %v2694_v6 = vpop.f32.mrf.mxu0 }
 0x35f   : > { %v8781_v13 = vadd.f32 %v2733_v16, %v2690_v21  ;;  %4698 = vmatpush1.bf16.msk.msra.mxu0 %vm10981_vm4, %v10246_v42  ;;  %4758 = vmatpush1.bf16.msk.msra.mxu1 %vm10983_vm6, %v10246_v42 }
 0x360   : > { %v2735_v38 = vpop.f32.mrf.mxu1  ;;  %4700 = vmatprep.subr.msk.bf16.mxu0 %vm10985_vm10, %v10246_v42  ;;  %4760 = vmatprep.subr.msk.bf16.mxu1 %vm10987_vm1, %v10246_v42  ;;  %v2696_v46 = vpop.f32.mrf.mxu0  ;;  %vm11006_vm10 = vnez %v11005_v58  ;;  %vm11008_vm1 = vnez %v11007_v55  ;;  %v11021_v58 = vld [vmem:[#allocation122_spill] sm:$0xff]  ;;  %v11023_v55 = vld [vmem:[#allocation125_spill] sm:$0xff] }
 0x361   : > { %10979 = vst [vmem:[#allocation23_spill] sm:$0xff] %v8781_v13  ;;  %v8795_v16 = vadd.f32 %v2735_v38, %v2692_v56  ;;  %3075 = vmatprep.mubr.bf16.mxu1 %v10852_v62  ;;  %v10992_v13 = vld [vmem:[#allocation108_spill] sm:$0xff]  ;;  %v10996_v38 = vld [vmem:[#allocation110_spill] sm:$0xff] }
 0x362   : > { %v2737_v21 = vpop.f32.mrf.mxu1  ;;  %vm10993_vm7 = vnez %v10992_v13  ;;  %vm10997_vm12 = vnez %v10996_v38  ;;  %v11003_v13 = vld [vmem:[#allocation115_spill] sm:$0xff]  ;;  %v11013_v38 = vld [vmem:[#allocation118_spill] sm:$0xff] }
 0x363   : > { %10988 = vst [vmem:[#allocation21_spill] sm:$0xff] %v8795_v16  ;;  %v8798_v7 = vadd.f32 %v2737_v21, %v2694_v6  ;;  %4702 = vmatpush1.bf16.msk.msra.mxu0 %vm10991_vm3, %v10246_v42  ;;  %4762 = vmatpush1.bf16.msk.msra.mxu1 %vm10993_vm7, %v10246_v42  ;;  %v10999_v6 = vld [vmem:[#allocation113_spill] sm:$0xff]  ;;  %v11001_v21 = vld [vmem:[#allocation112_spill] sm:$0xff]  ;;  %vm11004_vm6 = vnez %v11003_v13  ;;  %v11019_v13 = vld [vmem:[#allocation123_spill] sm:$0xff] }
 0x364   : > { %v2739_v2 = vpop.f32.mrf.mxu1  ;;  %4704 = vmatprep.subr.msk.bf16.mxu0 %vm10995_vm15, %v10246_v42  ;;  %4764 = vmatprep.subr.msk.bf16.mxu1 %vm10997_vm12, %v10246_v42  ;;  %vm11000_vm13 = vnez %v10999_v6  ;;  %vm11002_vm4 = vnez %v11001_v21  ;;  %vm11014_vm15 = vnez %v11013_v38  ;;  %v11015_v6 = vld [vmem:[#allocation121_spill] sm:$0xff]  ;;  %v11017_v21 = vld [vmem:[#allocation120_spill] sm:$0xff]  ;;  %v11029_v38 = vld [vmem:[#allocation126_spill] sm:$0xff] }
 0x365   : > { %10989 = vst [vmem:[#allocation13_spill] sm:$0xff] %v8798_v7  ;;  %v8812_v56 = vadd.f32 %v2739_v2, %v2696_v46  ;;  %v11009_v2 = vld [vmem:[#allocation116_spill] sm:$0xff]  ;;  %v11011_v46 = vld [vmem:[#allocation119_spill] sm:$0xff]  ;;  %vm11016_vm12 = vnez %v11015_v6  ;;  %v11031_v6 = vld [vmem:[#allocation129_spill] sm:$0xff] }
 0x366   : > { %vm11010_vm3 = vnez %v11009_v2  ;;  %vm11012_vm7 = vnez %v11011_v46  ;;  %v11025_v2 = vld [vmem:[#allocation124_spill] sm:$0xff]  ;;  %v11027_v46 = vld [vmem:[#allocation127_spill] sm:$0xff]  ;;  %v11118_v7 = vld [vmem:[#allocation170_spill] sm:$0xff] }
 0x367   : > { %10998 = vst [vmem:[#allocation24_spill] sm:$0xff] %v8812_v56  ;;  %4706 = vmatpush1.bf16.msk.msra.mxu0 %vm11000_vm13, %v10246_v42  ;;  %4766 = vmatpush1.bf16.msk.msra.mxu1 %vm11002_vm4, %v10246_v42  ;;  %vm11018_vm13 = vnez %v11017_v21  ;;  %vm11020_vm4 = vnez %v11019_v13  ;;  %v11033_v21 = vld [vmem:[#allocation128_spill] sm:$0xff]  ;;  %v11035_v13 = vld [vmem:[#allocation131_spill] sm:$0xff]  ;;  %v11116_v56 = vld [vmem:[#allocation169_spill] sm:$0xff] }
 0x368   : > { %4708 = vmatprep.subr.msk.bf16.mxu0 %vm11004_vm6, %v10246_v42  ;;  %4768 = vmatprep.subr.msk.bf16.mxu1 %vm11006_vm10, %v10246_v42  ;;  %vm11022_vm6 = vnez %v11021_v58  ;;  %vm11024_vm10 = vnez %v11023_v55  ;;  %v11037_v58 = vld [vmem:[#allocation130_spill] sm:$0xff]  ;;  %v11039_v55 = vld [vmem:[#allocation133_spill] sm:$0xff] }
 0x36b   : > { %4710 = vmatpush1.bf16.msk.msra.mxu0 %vm11008_vm1, %v10246_v42  ;;  %4770 = vmatpush1.bf16.msk.msra.mxu1 %vm11010_vm3, %v10246_v42  ;;  %vm11026_vm1 = vnez %v11025_v2  ;;  %vm11028_vm3 = vnez %v11027_v46  ;;  %v11041_v2 = vld [vmem:[#allocation132_spill] sm:$0xff]  ;;  %v11043_v46 = vld [vmem:[#allocation135_spill] sm:$0xff] }
 0x36c   : > { %4712 = vmatprep.subr.msk.bf16.mxu0 %vm11012_vm7, %v10246_v42  ;;  %4772 = vmatprep.subr.msk.bf16.mxu1 %vm11014_vm15, %v10246_v42  ;;  %vm11030_vm7 = vnez %v11029_v38  ;;  %vm11032_vm15 = vnez %v11031_v6  ;;  %v11045_v38 = vld [vmem:[#allocation134_spill] sm:$0xff]  ;;  %v11047_v6 = vld [vmem:[#allocation137_spill] sm:$0xff] }
 0x36f   : > { %4714 = vmatpush1.bf16.msk.msra.mxu0 %vm11016_vm12, %v10246_v42  ;;  %4774 = vmatpush1.bf16.msk.msra.mxu1 %vm11018_vm13, %v10246_v42  ;;  %vm11034_vm12 = vnez %v11033_v21  ;;  %vm11036_vm13 = vnez %v11035_v13  ;;  %v11049_v21 = vld [vmem:[#allocation136_spill] sm:$0xff]  ;;  %v11051_v13 = vld [vmem:[#allocation139_spill] sm:$0xff] }
 0x370   : > { %4716 = vmatprep.subr.msk.bf16.mxu0 %vm11020_vm4, %v10246_v42  ;;  %4776 = vmatprep.subr.msk.bf16.mxu1 %vm11022_vm6, %v10246_v42  ;;  %vm11038_vm4 = vnez %v11037_v58  ;;  %vm11040_vm6 = vnez %v11039_v55  ;;  %v11053_v58 = vld [vmem:[#allocation138_spill] sm:$0xff]  ;;  %v11055_v55 = vld [vmem:[#allocation141_spill] sm:$0xff] }
 0x373   : > { %4718 = vmatpush1.bf16.msk.msra.mxu0 %vm11024_vm10, %v10246_v42  ;;  %4778 = vmatpush1.bf16.msk.msra.mxu1 %vm11026_vm1, %v10246_v42  ;;  %vm11042_vm10 = vnez %v11041_v2  ;;  %vm11044_vm1 = vnez %v11043_v46  ;;  %v11057_v2 = vld [vmem:[#allocation140_spill] sm:$0xff]  ;;  %v11059_v46 = vld [vmem:[#allocation143_spill] sm:$0xff] }
 0x374   : > { %4720 = vmatprep.subr.msk.bf16.mxu0 %vm11028_vm3, %v10246_v42  ;;  %4780 = vmatprep.subr.msk.bf16.mxu1 %vm11030_vm7, %v10246_v42  ;;  %vm11046_vm3 = vnez %v11045_v38  ;;  %vm11048_vm7 = vnez %v11047_v6  ;;  %v11061_v38 = vld [vmem:[#allocation142_spill] sm:$0xff]  ;;  %v11063_v6 = vld [vmem:[#allocation145_spill] sm:$0xff] }
 0x377   : > { %4722 = vmatpush1.bf16.msk.msra.mxu0 %vm11032_vm15, %v10246_v42  ;;  %4782 = vmatpush1.bf16.msk.msra.mxu1 %vm11034_vm12, %v10246_v42  ;;  %vm11050_vm15 = vnez %v11049_v21  ;;  %vm11052_vm12 = vnez %v11051_v13  ;;  %v11065_v21 = vld [vmem:[#allocation144_spill] sm:$0xff]  ;;  %v11067_v13 = vld [vmem:[#allocation147_spill] sm:$0xff] }
 0x378   : > { %4724 = vmatprep.subr.msk.bf16.mxu0 %vm11036_vm13, %v10246_v42  ;;  %4784 = vmatprep.subr.msk.bf16.mxu1 %vm11038_vm4, %v10246_v42  ;;  %vm11054_vm13 = vnez %v11053_v58  ;;  %vm11056_vm4 = vnez %v11055_v55  ;;  %v11069_v58 = vld [vmem:[#allocation146_spill] sm:$0xff]  ;;  %v11071_v55 = vld [vmem:[#allocation149_spill] sm:$0xff] }
 0x37b   : > { %4726 = vmatpush2.bf16.msk.msra.mxu0 %vm11040_vm6, %v10246_v42  ;;  %4786 = vmatpush1.bf16.msk.msra.mxu1 %vm11042_vm10, %v10246_v42  ;;  %vm11058_vm6 = vnez %v11057_v2  ;;  %vm11060_vm10 = vnez %v11059_v46  ;;  %v11073_v2 = vld [vmem:[#allocation148_spill] sm:$0xff]  ;;  %v11075_v46 = vld [vmem:[#allocation151_spill] sm:$0xff] }
 0x37c   : > { %4728 = vmatprep.subr.msk.bf16.mxu0 %vm11044_vm1, %v10246_v42  ;;  %4788 = vmatprep.subr.msk.bf16.mxu1 %vm11046_vm3, %v10246_v42  ;;  %vm11062_vm1 = vnez %v11061_v38  ;;  %vm11064_vm3 = vnez %v11063_v6  ;;  %v11077_v38 = vld [vmem:[#allocation150_spill] sm:$0xff]  ;;  %v11079_v6 = vld [vmem:[#allocation153_spill] sm:$0xff] }
 0x37f   : > { %4730 = vmatpush2.bf16.msk.msra.mxu0 %vm11048_vm7, %v10246_v42  ;;  %4790 = vmatpush2.bf16.msk.msra.mxu1 %vm11050_vm15, %v10246_v42  ;;  %vm11066_vm7 = vnez %v11065_v21  ;;  %vm11068_vm15 = vnez %v11067_v13  ;;  %v11081_v21 = vld [vmem:[#allocation152_spill] sm:$0xff]  ;;  %v11083_v13 = vld [vmem:[#allocation155_spill] sm:$0xff] }
 0x380   : > { %4732 = vmatprep.subr.msk.bf16.mxu0 %vm11052_vm12, %v10246_v42  ;;  %4792 = vmatprep.subr.msk.bf16.mxu1 %vm11054_vm13, %v10246_v42  ;;  %vm11070_vm12 = vnez %v11069_v58  ;;  %vm11072_vm13 = vnez %v11071_v55  ;;  %v11085_v58 = vld [vmem:[#allocation154_spill] sm:$0xff]  ;;  %v11087_v55 = vld [vmem:[#allocation157_spill] sm:$0xff] }
 0x383   : > { %4734 = vmatpush2.bf16.msk.msra.mxu0 %vm11056_vm4, %v10246_v42  ;;  %4794 = vmatpush2.bf16.msk.msra.mxu1 %vm11058_vm6, %v10246_v42  ;;  %vm11074_vm4 = vnez %v11073_v2  ;;  %vm11076_vm6 = vnez %v11075_v46  ;;  %v11089_v2 = vld [vmem:[#allocation156_spill] sm:$0xff]  ;;  %v11091_v46 = vld [vmem:[#allocation159_spill] sm:$0xff] }
 0x384   : > { %4736 = vmatprep.subr.msk.bf16.mxu0 %vm11060_vm10, %v10246_v42  ;;  %4796 = vmatprep.subr.msk.bf16.mxu1 %vm11062_vm1, %v10246_v42  ;;  %vm11078_vm10 = vnez %v11077_v38  ;;  %vm11080_vm1 = vnez %v11079_v6  ;;  %v11093_v38 = vld [vmem:[#allocation158_spill] sm:$0xff] }
 0x385   : > { %v11095_v6 = vld [vmem:[#allocation14_spill] sm:$0xff] }
 0x387   : > { %4738 = vmatpush2.bf16.msk.msra.mxu0 %vm11064_vm3, %v10246_v42  ;;  %4798 = vmatpush2.bf16.msk.msra.mxu1 %vm11066_vm7, %v10246_v42  ;;  %vm11082_vm3 = vnez %v11081_v21  ;;  %vm11084_vm7 = vnez %v11083_v13  ;;  %v11097_v21 = vld [vmem:[#allocation160_spill] sm:$0xff]  ;;  %v11099_v13 = vld [vmem:[#allocation161_spill] sm:$0xff] }
 0x388   : > { %4740 = vmatprep.subr.msk.bf16.mxu0 %vm11068_vm15, %v10246_v42  ;;  %4800 = vmatprep.subr.msk.bf16.mxu1 %vm11070_vm12, %v10246_v42  ;;  %vm11086_vm15 = vnez %v11085_v58  ;;  %vm11088_vm12 = vnez %v11087_v55  ;;  %v11101_v58 = vld [vmem:[#allocation162_spill] sm:$0xff] }
 0x38b   : > { %4742 = vmatpush2.bf16.msk.msra.mxu0 %vm11072_vm13, %v10246_v42  ;;  %4802 = vmatpush2.bf16.msk.msra.mxu1 %vm11074_vm4, %v10246_v42  ;;  %vm11090_vm13 = vnez %v11089_v2  ;;  %vm11092_vm4 = vnez %v11091_v46  ;;  %v11103_v2 = vld [vmem:[#allocation163_spill] sm:$0xff]  ;;  %v11105_v46 = vld [vmem:[#allocation164_spill] sm:$0xff] }
 0x38c   : > { %4744 = vmatprep.subr.msk.bf16.mxu0 %vm11076_vm6, %v10246_v42  ;;  %4804 = vmatprep.subr.msk.bf16.mxu1 %vm11078_vm10, %v10246_v42  ;;  %vm11094_vm6 = vnez %v11093_v38  ;;  %vm11096_vm10 = vnez %v11095_v6  ;;  %v11107_v6 = vld [vmem:[#allocation165_spill] sm:$0xff] }
 0x38f   : > { %4746 = vmatpush2.bf16.msk.msra.mxu0 %vm11080_vm1, %v10246_v42  ;;  %4806 = vmatpush2.bf16.msk.msra.mxu1 %vm11082_vm3, %v10246_v42  ;;  %vm11098_vm1 = vnez %v11097_v21  ;;  %vm11100_vm3 = vnez %v11099_v13  ;;  %v11109_v21 = vld [vmem:[#allocation166_spill] sm:$0xff] }
 0x390   : > { %4748 = vmatprep.subr.msk.bf16.mxu0 %vm11084_vm7, %v10246_v42  ;;  %4808 = vmatprep.subr.msk.bf16.mxu1 %vm11086_vm15, %v10246_v42  ;;  %vm11102_vm7 = vnez %v11101_v58  ;;  %vm11104_vm15 = vnez %v11103_v2  ;;  %v11112_v2 = vld [vmem:[#allocation167_spill] sm:$0xff] }
 0x393   : > { %4750 = vmatpush2.bf16.msk.msra.mxu0 %vm11088_vm12, %v10246_v42  ;;  %4810 = vmatpush2.bf16.msk.msra.mxu1 %vm11090_vm13, %v10246_v42  ;;  %vm11106_vm12 = vnez %v11105_v46  ;;  %vm11108_vm13 = vnez %v11107_v6  ;;  %v11114_v46 = vld [vmem:[#allocation168_spill] sm:$0xff] }
 0x394   : > { %4752 = vmatprep.subr.msk.bf16.mxu0 %vm11092_vm4, %v10246_v42  ;;  %4812 = vmatprep.subr.msk.bf16.mxu1 %vm11094_vm6, %v10246_v42  ;;  %vm11110_vm4 = vnez %v11109_v21  ;;  %vm11113_vm6 = vnez %v11112_v2 }
 0x397   : > { %4754 = vmatpush2.bf16.msk.msra.mxu0 %vm11096_vm10, %v10246_v42  ;;  %4814 = vmatpush2.bf16.msk.msra.mxu1 %vm11098_vm1, %v10246_v42  ;;  %vm11115_vm10 = vnez %v11114_v46  ;;  %vm11117_vm1 = vnez %v11116_v56  ;;  %v11120_v46 = vld [vmem:[#allocation171_spill] sm:$0xff] }
 0x398   : > { %4816 = vmatprep.subr.msk.bf16.mxu1 %vm11100_vm3, %v10246_v42  ;;  %4820 = vmatprep.subr.msk.bf16.mxu0 %vm11102_vm7, %v10246_v42  ;;  %vm11119_vm3 = vnez %v11118_v7  ;;  %vm11121_vm7 = vnez %v11120_v46  ;;  %v11122_v7 = vld [vmem:[#allocation172_spill] sm:$0xff]  ;;  %v11136_v46 = vld [vmem:[#allocation179_spill] sm:$0xff] }
 0x39a   : > { %v2776_v55 = vpop.f32.mrf.mxu0  ;;  %3033 = vmatmul.mubr.bf16.vlgmr.msra.gmra.mxu0 %v10968_v10 }
 0x39b   : > { %4818 = vmatpush2.bf16.msk.msra.mxu1 %vm11104_vm15, %v10246_v42  ;;  %4822 = vmatpush1.bf16.msk.msra.mxu0 %vm11106_vm12, %v10246_v42  ;;  %vm11123_vm15 = vnez %v11122_v7  ;;  %vm11125_vm12 = vnez %v11124_v28  ;;  %v11134_v28 = vld [vmem:[#allocation178_spill] sm:$0xff] }
 0x39c   : > { %v2778_v38 = vpop.f32.mrf.mxu0  ;;  %4824 = vmatprep.subr.msk.bf16.mxu0 %vm11108_vm13, %v10246_v42  ;;  %4884 = vmatprep.subr.msk.bf16.mxu1 %vm11110_vm4, %v10246_v42  ;;  %v11142_v7 = vld [vmem:[#allocation182_spill] sm:$0xff] }
 0x39d   : > { %3118 = vmatprep.mubr.bf16.mxu0 %v10842_v3 }
 0x39e   : > { %v2819_v13 = vpop.f32.mrf.mxu1  ;;  %3076 = vmatmul.mubr.bf16.vlgmr.msra.gmra.mxu1 %v10978_v35  ;;  %v2780_v6 = vpop.f32.mrf.mxu0 }
 0x39f   : > { %v8991_v58 = vadd.f32 %v2819_v13, %v2776_v55  ;;  %4826 = vmatpush1.bf16.msk.msra.mxu0 %vm11113_vm6, %v10246_v42  ;;  %4886 = vmatpush1.bf16.msk.msra.mxu1 %vm11115_vm10, %v10246_v42  ;;  %v5272_v55 = vmov 0.0  }
 0x3a0   : > { %v2821_v21 = vpop.f32.mrf.mxu1  ;;  %4828 = vmatprep.subr.msk.bf16.mxu0 %vm11117_vm1, %v10246_v42  ;;  %4888 = vmatprep.subr.msk.bf16.mxu1 %vm11119_vm3, %v10246_v42  ;;  %257 = vst [vmem:[%s8987_s22 + $0x40] sm:$0xf] %v5272_v55  ;;  %258 = vst [vmem:[%s8987_s22 + $0x48] sm:$0xf] %v5272_v55  ;;  %vm11135_vm1 = vnez %v11134_v28  ;;  %vm11137_vm3 = vnez %v11136_v46  ;;  %v11152_v28 = vld [vmem:[#allocation187_spill] sm:$0xff]  ;;  %v11154_v46 = vld [vmem:[#allocation188_spill] sm:$0xff] }
 0x3a1   : > { %11111 = vst [vmem:[#allocation22_spill] sm:$0xff] %v8991_v58  ;;  %259 = vst [vmem:[%s8987_s22 + $0x50] sm:$0xf] %v5272_v55  ;;  %v9013_v13 = vadd.f32 %v2821_v21, %v2778_v38  ;;  %3161 = vmatprep.mubr.bf16.mxu1 %v10852_v62  ;;  %v2782_v58 = vpop.f32.mrf.mxu0  ;;  %v11126_v38 = vld [vmem:[#allocation174_spill] sm:$0xff]  ;;  %v11128_v21 = vld [vmem:[#allocation175_spill] sm:$0xff] }
 0x3a2   : > { %260 = vst [vmem:[%s8987_s22 + $0x58] sm:$0xf] %v5272_v55  ;;  %261 = vst [vmem:[%s8987_s22 + $0x60] sm:$0xf] %v5272_v55  ;;  %v2823_v2 = vpop.f32.mrf.mxu1  ;;  %vm11127_vm13 = vnez %v11126_v38  ;;  %vm11129_vm4 = vnez %v11128_v21  ;;  %v11144_v38 = vld [vmem:[#allocation183_spill] sm:$0xff]  ;;  %v11146_v21 = vld [vmem:[#allocation184_spill] sm:$0xff] }
 0x3a3   : > { %262 = vst [vmem:[%s8987_s22 + $0x68] sm:$0xf] %v5272_v55  ;;  %263 = vst [vmem:[%s8987_s22 + $0x70] sm:$0xf] %v5272_v55  ;;  %v9016_v56 = vadd.f32 %v2823_v2, %v2780_v6  ;;  %4830 = vmatpush1.bf16.msk.msra.mxu0 %vm11121_vm7, %v10246_v42  ;;  %4890 = vmatpush1.bf16.msk.msra.mxu1 %vm11123_vm15, %v10246_v42  ;;  %v11132_v2 = vld [vmem:[#allocation177_spill] sm:$0xff] }
 0x3a4   : > { %264 = vst [vmem:[%s8987_s22 + $0x78] sm:$0xf] %v5272_v55  ;;  %v2825_v16 = vpop.f32.mrf.mxu1  ;;  %4832 = vmatprep.subr.msk.bf16.mxu0 %vm11125_vm12, %v10246_v42  ;;  %4892 = vmatprep.subr.msk.bf16.mxu1 %vm11127_vm13, %v10246_v42  ;;  %v11130_v55 = vld [vmem:[#allocation176_spill] sm:$0xff]  ;;  %vm11133_vm10 = vnez %v11132_v2  ;;  %vm11143_vm12 = vnez %v11142_v7  ;;  %vm11145_vm13 = vnez %v11144_v38  ;;  %v11150_v2 = vld [vmem:[#allocation186_spill] sm:$0xff]  ;;  %v11160_v7 = vld [vmem:[#allocation191_spill] sm:$0xff] }
 0x3a5   : > { %v9030_v6 = vadd.f32 %v2825_v16, %v2782_v58  ;;  %vm11131_vm6 = vnez %v11130_v55  ;;  %v11138_v16 = vld [vmem:[#allocation180_spill] sm:$0xff]  ;;  %v11140_v58 = vld [vmem:[#allocation181_spill] sm:$0xff] }
 0x3a6   : > { %vm11139_vm7 = vnez %v11138_v16  ;;  %vm11141_vm15 = vnez %v11140_v58  ;;  %v11148_v55 = vld [vmem:[#allocation185_spill] sm:$0xff]  ;;  %v11158_v58 = vld [vmem:[#allocation190_spill] sm:$0xff]  ;;  %v11162_v38 = vld [vmem:[#allocation192_spill] sm:$0xff] }
 0x3a7   : > { %4834 = vmatpush1.bf16.msk.msra.mxu0 %vm11129_vm4, %v10246_v42  ;;  %4894 = vmatpush1.bf16.msk.msra.mxu1 %vm11131_vm6, %v10246_v42  ;;  %vm11147_vm4 = vnez %v11146_v21  ;;  %vm11149_vm6 = vnez %v11148_v55  ;;  %v11156_v16 = vld [vmem:[#allocation189_spill] sm:$0xff]  ;;  %v11166_v55 = vld [vmem:[#allocation194_spill] sm:$0xff] }
 0x3a8   : > { %4836 = vmatprep.subr.msk.bf16.mxu0 %vm11133_vm10, %v10246_v42  ;;  %4896 = vmatprep.subr.msk.bf16.mxu1 %vm11135_vm1, %v10246_v42  ;;  %vm11151_vm10 = vnez %v11150_v2  ;;  %vm11153_vm1 = vnez %v11152_v28  ;;  %v11164_v21 = vld [vmem:[#allocation193_spill] sm:$0xff]  ;;  %v11168_v2 = vld [vmem:[#allocation195_spill] sm:$0xff]  ;;  %v11170_v28 = vld [vmem:[#allocation196_spill] sm:$0xff] }
 0x3ab   : > { %4838 = vmatpush1.bf16.msk.msra.mxu0 %vm11137_vm3, %v10246_v42  ;;  %4898 = vmatpush1.bf16.msk.msra.mxu1 %vm11139_vm7, %v10246_v42  ;;  %vm11155_vm3 = vnez %v11154_v46  ;;  %vm11157_vm7 = vnez %v11156_v16  ;;  %v11172_v46 = vld [vmem:[#allocation197_spill] sm:$0xff]  ;;  %v11174_v16 = vld [vmem:[#allocation198_spill] sm:$0xff] }
 0x3ac   : > { %4840 = vmatprep.subr.msk.bf16.mxu0 %vm11141_vm15, %v10246_v42  ;;  %4900 = vmatprep.subr.msk.bf16.mxu1 %vm11143_vm12, %v10246_v42  ;;  %vm11159_vm15 = vnez %v11158_v58  ;;  %vm11161_vm12 = vnez %v11160_v7  ;;  %v11176_v58 = vld [vmem:[#allocation199_spill] sm:$0xff]  ;;  %v11178_v7 = vld [vmem:[#allocation200_spill] sm:$0xff] }
 0x3af   : > { %4842 = vmatpush1.bf16.msk.msra.mxu0 %vm11145_vm13, %v10246_v42  ;;  %4902 = vmatpush1.bf16.msk.msra.mxu1 %vm11147_vm4, %v10246_v42  ;;  %vm11163_vm13 = vnez %v11162_v38  ;;  %vm11165_vm4 = vnez %v11164_v21  ;;  %v11180_v38 = vld [vmem:[#allocation201_spill] sm:$0xff]  ;;  %v11182_v21 = vld [vmem:[#allocation202_spill] sm:$0xff] }
 0x3b0   : > { %4844 = vmatprep.subr.msk.bf16.mxu0 %vm11149_vm6, %v10246_v42  ;;  %4904 = vmatprep.subr.msk.bf16.mxu1 %vm11151_vm10, %v10246_v42  ;;  %vm11167_vm6 = vnez %v11166_v55  ;;  %vm11169_vm10 = vnez %v11168_v2  ;;  %v11184_v55 = vld [vmem:[#allocation203_spill] sm:$0xff]  ;;  %v11186_v2 = vld [vmem:[#allocation204_spill] sm:$0xff] }
 0x3b3   : > { %4846 = vmatpush1.bf16.msk.msra.mxu0 %vm11153_vm1, %v10246_v42  ;;  %4906 = vmatpush1.bf16.msk.msra.mxu1 %vm11155_vm3, %v10246_v42  ;;  %vm11171_vm1 = vnez %v11170_v28  ;;  %vm11173_vm3 = vnez %v11172_v46  ;;  %v11188_v28 = vld [vmem:[#allocation205_spill] sm:$0xff]  ;;  %v11190_v46 = vld [vmem:[#allocation206_spill] sm:$0xff] }
 0x3b4   : > { %4848 = vmatprep.subr.msk.bf16.mxu0 %vm11157_vm7, %v10246_v42  ;;  %4908 = vmatprep.subr.msk.bf16.mxu1 %vm11159_vm15, %v10246_v42  ;;  %vm11175_vm7 = vnez %v11174_v16  ;;  %vm11177_vm15 = vnez %v11176_v58  ;;  %v11192_v16 = vld [vmem:[#allocation207_spill] sm:$0xff]  ;;  %v11194_v58 = vld [vmem:[#allocation208_spill] sm:$0xff] }
 0x3b7   : > { %4850 = vmatpush1.bf16.msk.msra.mxu0 %vm11161_vm12, %v10246_v42  ;;  %4910 = vmatpush1.bf16.msk.msra.mxu1 %vm11163_vm13, %v10246_v42  ;;  %vm11179_vm12 = vnez %v11178_v7  ;;  %vm11181_vm13 = vnez %v11180_v38  ;;  %v11196_v7 = vld [vmem:[#allocation209_spill] sm:$0xff] }
 0x3b8   : > { %4852 = vmatprep.subr.msk.bf16.mxu0 %vm11165_vm4, %v10246_v42  ;;  %4912 = vmatprep.subr.msk.bf16.mxu1 %vm11167_vm6, %v10246_v42  ;;  %vm11183_vm4 = vnez %v11182_v21  ;;  %vm11185_vm6 = vnez %v11184_v55  ;;  %v11198_v38 = vld [vmem:[#allocation53_spill] sm:$0xff]  ;;  %v11200_v21 = vld [vmem:[#allocation210_spill] sm:$0xff]  ;;  %v11202_v55 = vld [vmem:[#allocation76_spill] sm:$0xff] }
 0x3bb   : > { %4854 = vmatpush2.bf16.msk.msra.mxu0 %vm11169_vm10, %v10246_v42  ;;  %4914 = vmatpush1.bf16.msk.msra.mxu1 %vm11171_vm1, %v10246_v42  ;;  %vm11187_vm10 = vnez %v11186_v2  ;;  %vm11189_vm1 = vnez %v11188_v28  ;;  %v11204_v2 = vld [vmem:[#allocation211_spill] sm:$0xff]  ;;  %v11206_v28 = vld [vmem:[#allocation62_spill] sm:$0xff] }
 0x3bc   : > { %4856 = vmatprep.subr.msk.bf16.mxu0 %vm11173_vm3, %v10246_v42  ;;  %4916 = vmatprep.subr.msk.bf16.mxu1 %vm11175_vm7, %v10246_v42  ;;  %vm11191_vm3 = vnez %v11190_v46  ;;  %vm11193_vm7 = vnez %v11192_v16  ;;  %v11208_v46 = vld [vmem:[#allocation212_spill] sm:$0xff]  ;;  %v11210_v16 = vld [vmem:[#allocation83_spill] sm:$0xff] }
 0x3bf   : > { %4858 = vmatpush2.bf16.msk.msra.mxu0 %vm11177_vm15, %v10246_v42  ;;  %4918 = vmatpush2.bf16.msk.msra.mxu1 %vm11179_vm12, %v10246_v42  ;;  %vm11195_vm15 = vnez %v11194_v58  ;;  %vm11197_vm12 = vnez %v11196_v7  ;;  %v11212_v58 = vld [vmem:[#allocation213_spill] sm:$0xff]  ;;  %v11214_v7 = vld [vmem:[#allocation214_spill] sm:$0xff] }
 0x3c0   : > { %4860 = vmatprep.subr.msk.bf16.mxu0 %vm11181_vm13, %v10246_v42  ;;  %4920 = vmatprep.subr.msk.bf16.mxu1 %vm11183_vm4, %v10246_v42  ;;  %vm11199_vm13 = vnez %v11198_v38  ;;  %vm11201_vm4 = vnez %v11200_v21  ;;  %v11216_v38 = vld [vmem:[#allocation215_spill] sm:$0xff]  ;;  %v11218_v21 = vld [vmem:[#allocation92_spill] sm:$0xff] }
 0x3c3   : > { %4862 = vmatpush2.bf16.msk.msra.mxu0 %vm11185_vm6, %v10246_v42  ;;  %4922 = vmatpush2.bf16.msk.msra.mxu1 %vm11187_vm10, %v10246_v42  ;;  %vm11203_vm6 = vnez %v11202_v55  ;;  %vm11205_vm10 = vnez %v11204_v2  ;;  %v11220_v55 = vld [vmem:[#allocation216_spill] sm:$0xff] }
 0x3c4   : > { %4864 = vmatprep.subr.msk.bf16.mxu0 %vm11189_vm1, %v10246_v42  ;;  %4924 = vmatprep.subr.msk.bf16.mxu1 %vm11191_vm3, %v10246_v42  ;;  %vm11207_vm1 = vnez %v11206_v28  ;;  %vm11209_vm3 = vnez %v11208_v46  ;;  %v11222_v2 = vld [vmem:[#allocation84_spill] sm:$0xff] }
 0x3c7   : > { %4866 = vmatpush2.bf16.msk.msra.mxu0 %vm11193_vm7, %v10246_v42  ;;  %4926 = vmatpush2.bf16.msk.msra.mxu1 %vm11195_vm15, %v10246_v42  ;;  %vm11211_vm7 = vnez %v11210_v16  ;;  %vm11213_vm15 = vnez %v11212_v58  ;;  %v3266_v16 = vld [vmem:[%s8987_s22 + $0x40] sm:$0xf] }
 0x3c8   : > { %4868 = vmatprep.subr.msk.bf16.mxu0 %vm11197_vm12, %v10246_v42  ;;  %4928 = vmatprep.subr.msk.bf16.mxu1 %vm11199_vm13, %v10246_v42  ;;  %vm11215_vm12 = vnez %v11214_v7  ;;  %vm11217_vm13 = vnez %v11216_v38  ;;  %v3267_v38 = vld [vmem:[%s8987_s22 + $0x48] sm:$0xf] }
 0x3cb   : > { %4870 = vmatpush2.bf16.msk.msra.mxu0 %vm11201_vm4, %v10246_v42  ;;  %4930 = vmatpush2.bf16.msk.msra.mxu1 %vm11203_vm6, %v10246_v42  ;;  %vm11219_vm4 = vnez %v11218_v21  ;;  %vm11221_vm6 = vnez %v11220_v55 }
 0x3cc   : > { %4872 = vmatprep.subr.msk.bf16.mxu0 %vm11205_vm10, %v10246_v42  ;;  %4932 = vmatprep.subr.msk.bf16.mxu1 %vm11207_vm1, %v10246_v42  ;;  %vm11223_vm10 = vnez %v11222_v2  ;;  %vm11224_vm1 = vnez %v10669_v51 }
 0x3cf   : > { %4874 = vmatpush2.bf16.msk.msra.mxu0 %vm11209_vm3, %v10246_v42  ;;  %4934 = vmatpush2.bf16.msk.msra.mxu1 %vm11211_vm7, %v10246_v42  ;;  %vm11225_vm3 = vnez %v10671_v40  ;;  %vm11226_vm7 = vnez %v10673_v45 }
 0x3d0   : > { %4876 = vmatprep.subr.msk.bf16.mxu0 %vm11213_vm15, %v10246_v42  ;;  %4936 = vmatprep.subr.msk.bf16.mxu1 %vm11215_vm12, %v10246_v42  ;;  %vm11227_vm15 = vnez %v10675_v24  ;;  %vm11228_vm12 = vnez %v10677_v31 }
 0x3d3   : > { %4878 = vmatpush2.bf16.msk.msra.mxu0 %vm11217_vm13, %v10246_v42  ;;  %4938 = vmatpush2.bf16.msk.msra.mxu1 %vm11219_vm4, %v10246_v42  ;;  %vm11229_vm13 = vnez %v10679_v11  ;;  %vm11230_vm4 = vnez %v10681_v61 }
 0x3d4   : > { %4880 = vmatprep.subr.msk.bf16.mxu0 %vm11221_vm6, %v10246_v42  ;;  %4940 = vmatprep.subr.msk.bf16.mxu1 %vm11223_vm10, %v10246_v42  ;;  %vm11231_vm6 = vnez %v10683_v12  ;;  %vm11232_vm10 = vnez %v10685_v52 }
 0x3d7   : > { %4882 = vmatpush2.bf16.msk.msra.mxu0 %vm11224_vm1, %v10246_v42  ;;  %4942 = vmatpush2.bf16.msk.msra.mxu1 %vm11225_vm3, %v10246_v42  ;;  %vm11233_vm1 = vnez %v10687_v14  ;;  %vm11234_vm3 = vnez %v10689_v59 }
 0x3d8   : > { %4944 = vmatprep.subr.msk.bf16.mxu1 %vm11226_vm7, %v10246_v42  ;;  %4948 = vmatprep.subr.msk.bf16.mxu0 %vm11227_vm15, %v10246_v42  ;;  %vm11235_vm7 = vnez %v10691_v30  ;;  %vm11236_vm15 = vnez %v10693_v44  ;;  %v11266_v30 = vld [vmem:[#allocation217_spill] sm:$0xff]  ;;  %v11268_v44 = vld [vmem:[#allocation218_spill] sm:$0xff] }
 0x3da   : > { %v2862_v28 = vpop.f32.mrf.mxu0  ;;  %3119 = vmatmul.mubr.bf16.vlgmr.msra.gmra.mxu0 %v10968_v10 }
 0x3db   : > { %4946 = vmatpush2.bf16.msk.msra.mxu1 %vm11228_vm12, %v10246_v42  ;;  %4950 = vmatpush1.bf16.msk.msra.mxu0 %vm11229_vm13, %v10246_v42  ;;  %vm11237_vm12 = vnez %v10695_v33  ;;  %vm11238_vm13 = vnez %v10697_v63  ;;  %v11271_v33 = vld [vmem:[#allocation65_spill] sm:$0xff] }
 0x3dc   : > { %v2864_v51 = vpop.f32.mrf.mxu0  ;;  %4952 = vmatprep.subr.msk.bf16.mxu0 %vm11230_vm4, %v10246_v42  ;;  %5012 = vmatprep.subr.msk.bf16.mxu1 %vm11231_vm6, %v10246_v42  ;;  %vm11239_vm4 = vnez %v10699_v23  ;;  %vm11240_vm6 = vnez %v10701_v57  ;;  %v11273_v63 = vld [vmem:[#allocation61_spill] sm:$0xff]  ;;  %v11275_v23 = vld [vmem:[#allocation50_spill] sm:$0xff]  ;;  %v11279_v57 = vld [vmem:[#allocation47_spill] sm:$0xff] }
 0x3dd   : > { %3204 = vmatprep.mubr.bf16.mxu0 %v10842_v3  ;;  %v11311_v3 = vld [vmem:[#allocation18_spill] sm:$0xff] }
 0x3de   : > { %v2905_v45 = vpop.f32.mrf.mxu1  ;;  %3162 = vmatmul.mubr.bf16.vlgmr.msra.gmra.mxu1 %v10978_v35  ;;  %v2866_v24 = vpop.f32.mrf.mxu0 }
 0x3df   : > { %v9203_v40 = vadd.f32 %v2905_v45, %v2862_v28  ;;  %4954 = vmatpush1.bf16.msk.msra.mxu0 %vm11232_vm10, %v10246_v42  ;;  %5014 = vmatpush1.bf16.msk.msra.mxu1 %vm11233_vm1, %v10246_v42  ;;  %vm11241_vm10 = vnez %v10703_v53  ;;  %vm11242_vm1 = vnez %v10705_v4  ;;  %v11281_v53 = vld [vmem:[#allocation72_spill] sm:$0xff]  ;;  %v11284_v4 = vld [vmem:[#allocation69_spill] sm:$0xff] }
 0x3e0   : > { %v2907_v31 = vpop.f32.mrf.mxu1  ;;  %4956 = vmatprep.subr.msk.bf16.mxu0 %vm11234_vm3, %v10246_v42  ;;  %5016 = vmatprep.subr.msk.bf16.mxu1 %vm11235_vm7, %v10246_v42  ;;  %v2868_v52 = vpop.f32.mrf.mxu0  ;;  %vm11243_vm3 = vnez %v10707_v47  ;;  %vm11244_vm7 = vnez %v10709_v8  ;;  %v11286_v47 = vld [vmem:[#allocation58_spill] sm:$0xff]  ;;  %v11288_v8 = vld [vmem:[#allocation80_spill] sm:$0xff] }
 0x3e1   : > { %v9217_v11 = vadd.f32 %v2907_v31, %v2864_v51  ;;  %3247 = vmatprep.mubr.bf16.mxu1 %v10852_v62  ;;  %v11312_v51 = vld [vmem:[#allocation23_spill] sm:$0xff]  ;;  %v11313_v31 = vld [vmem:[#allocation21_spill] sm:$0xff] }
 0x3e2   : > { %v2909_v61 = vpop.f32.mrf.mxu1 }
 0x3e3   : > { %v9220_v12 = vadd.f32 %v2909_v61, %v2866_v24  ;;  %4958 = vmatpush1.bf16.msk.msra.mxu0 %vm11236_vm15, %v10246_v42  ;;  %5018 = vmatpush1.bf16.msk.msra.mxu1 %vm11237_vm12, %v10246_v42  ;;  %vm11245_vm15 = vnez %v10711_v1  ;;  %vm11246_vm12 = vnez %v10713_v41  ;;  %v11291_v1 = vld [vmem:[#allocation68_spill] sm:$0xff] }
 0x3e4   : > { %v2911_v14 = vpop.f32.mrf.mxu1  ;;  %4960 = vmatprep.subr.msk.bf16.mxu0 %vm11238_vm13, %v10246_v42  ;;  %5020 = vmatprep.subr.msk.bf16.mxu1 %vm11239_vm4, %v10246_v42  ;;  %vm11247_vm13 = vnez %v10715_v60  ;;  %vm11248_vm4 = vnez %v10717_v27  ;;  %v11293_v41 = vld [vmem:[#allocation88_spill] sm:$0xff] }
 0x3e5   : > { %v9234_v59 = vadd.f32 %v2911_v14, %v2868_v52  ;;  %v3269_v60 = vld [vmem:[%s8987_s22 + $0x58] sm:$0xf] }
 0x3e7   : > { %4962 = vmatpush1.bf16.msk.msra.mxu0 %vm11240_vm6, %v10246_v42  ;;  %5022 = vmatpush1.bf16.msk.msra.mxu1 %vm11241_vm10, %v10246_v42  ;;  %vm11249_vm6 = vnez %v10719_v9  ;;  %vm11250_vm10 = vnez %v10721_v15  ;;  %v11297_v9 = vld [vmem:[#allocation95_spill] sm:$0xff] }
 0x3e8   : > { %4964 = vmatprep.subr.msk.bf16.mxu0 %vm11242_vm1, %v10246_v42  ;;  %5024 = vmatprep.subr.msk.bf16.mxu1 %vm11243_vm3, %v10246_v42  ;;  %vm11251_vm1 = vnez %v10723_v36  ;;  %vm11252_vm3 = vnez %v10725_v5  ;;  %v11300_v36 = vld [vmem:[#allocation220_spill] sm:$0xff]  ;;  %v11316_v5 = vld [vmem:[#allocation22_spill] sm:$0xff] }
 0x3eb   : > { %4966 = vmatpush1.bf16.msk.msra.mxu0 %vm11244_vm7, %v10246_v42  ;;  %5026 = vmatpush1.bf16.msk.msra.mxu1 %vm11245_vm15, %v10246_v42  ;;  %vm11253_vm7 = vnez %v10727_v22  ;;  %vm11254_vm15 = vnez %v10729_v17 }
 0x3ec   : > { %4968 = vmatprep.subr.msk.bf16.mxu0 %vm11246_vm12, %v10246_v42  ;;  %5028 = vmatprep.subr.msk.bf16.mxu1 %vm11247_vm13, %v10246_v42  ;;  %vm11255_vm12 = vnez %v10731_v37  ;;  %vm11256_vm13 = vnez %v10733_v34  ;;  %v11305_v34 = vld [vmem:[#allocation16_spill] sm:$0xff] }
 0x3ef   : > { %4970 = vmatpush1.bf16.msk.msra.mxu0 %vm11248_vm4, %v10246_v42  ;;  %5030 = vmatpush1.bf16.msk.msra.mxu1 %vm11249_vm6, %v10246_v42  ;;  %vm11257_vm4 = vnez %v10735_v0  ;;  %vm11258_vm6 = vnez %v10737_v39 }
 0x3f0   : > { %4972 = vmatprep.subr.msk.bf16.mxu0 %vm11250_vm10, %v10246_v42  ;;  %5032 = vmatprep.subr.msk.bf16.mxu1 %vm11251_vm1, %v10246_v42  ;;  %vm11259_vm10 = vnez %v10739_v19  ;;  %vm11260_vm1 = vnez %v10741_v26  ;;  %v11307_v26 = vld [vmem:[#allocation19_spill] sm:$0xff] }
 0x3f3   : > { %4974 = vmatpush1.bf16.msk.msra.mxu0 %vm11252_vm3, %v10246_v42  ;;  %5034 = vmatpush1.bf16.msk.msra.mxu1 %vm11253_vm7, %v10246_v42  ;;  %vm11261_vm3 = vnez %v10743_v25  ;;  %vm11262_vm7 = vnez %v10745_v48 }
 0x3f4   : > { %4976 = vmatprep.subr.msk.bf16.mxu0 %vm11254_vm15, %v10246_v42  ;;  %5036 = vmatprep.subr.msk.bf16.mxu1 %vm11255_vm12, %v10246_v42  ;;  %vm11263_vm15 = vnez %v10747_v32  ;;  %vm11264_vm12 = vnez %v10749_v20  ;;  %v11308_v20 = vld [vmem:[#allocation17_spill] sm:$0xff] }
 0x3f7   : > { %4978 = vmatpush1.bf16.msk.msra.mxu0 %vm11256_vm13, %v10246_v42  ;;  %5038 = vmatpush1.bf16.msk.msra.mxu1 %vm11257_vm4, %v10246_v42  ;;  %vm11265_vm13 = vnez %v10751_v29  ;;  %vm11267_vm4 = vnez %v11266_v30  ;;  %v11309_v29 = vld [vmem:[#allocation20_spill] sm:$0xff] }
 0x3f8   : > { %4980 = vmatprep.subr.msk.bf16.mxu0 %vm11258_vm6, %v10246_v42  ;;  %5040 = vmatprep.subr.msk.bf16.mxu1 %vm11259_vm10, %v10246_v42  ;;  %vm11269_vm6 = vnez %v11268_v44  ;;  %vm11270_vm10 = vnez %v10760_v43  ;;  %v2652_v43 = vadd.f32 %v11309_v29, %v11308_v20  ;;  %v3270_v20 = vld [vmem:[%s8987_s22 + $0x60] sm:$0xf] }
 0x3fb   : > { %4982 = vmatpush2.bf16.msk.msra.mxu0 %vm11260_vm1, %v10246_v42  ;;  %5042 = vmatpush1.bf16.msk.msra.mxu1 %vm11261_vm3, %v10246_v42  ;;  %vm11272_vm1 = vnez %v11271_v33  ;;  %vm11274_vm3 = vnez %v11273_v63  ;;  %v11314_v63 = vld [vmem:[#allocation13_spill] sm:$0xff] }
 0x3fc   : > { %4984 = vmatprep.subr.msk.bf16.mxu0 %vm11262_vm7, %v10246_v42  ;;  %5044 = vmatprep.subr.msk.bf16.mxu1 %vm11263_vm15, %v10246_v42  ;;  %vm11276_vm7 = vnez %v11275_v23  ;;  %vm11277_vm15 = vnez %v10775_v18 }
 0x3ff   : > { %4986 = vmatpush2.bf16.msk.msra.mxu0 %vm11264_vm12, %v10246_v42  ;;  %5046 = vmatpush2.bf16.msk.msra.mxu1 %vm11265_vm13, %v10246_v42  ;;  %vm11278_vm12 = vnez %v10778_v49  ;;  %vm11280_vm13 = vnez %v11279_v57 }
 0x400   : > { %4988 = vmatprep.subr.msk.bf16.mxu0 %vm11267_vm4, %v10246_v42  ;;  %5048 = vmatprep.subr.msk.bf16.mxu1 %vm11269_vm6, %v10246_v42  ;;  %vm11282_vm4 = vnez %v11281_v53  ;;  %vm11283_vm6 = vnez %v10788_v54 }
 0x403   : > { %4990 = vmatpush2.bf16.msk.msra.mxu0 %vm11270_vm10, %v10246_v42  ;;  %5050 = vmatpush2.bf16.msk.msra.mxu1 %vm11272_vm1, %v10246_v42  ;;  %vm11285_vm10 = vnez %v11284_v4  ;;  %vm11287_vm1 = vnez %v11286_v47  ;;  %v3268_v4 = vld [vmem:[%s8987_s22 + $0x50] sm:$0xf]  ;;  %v11315_v47 = vld [vmem:[#allocation24_spill] sm:$0xff] }
 0x404   : > { %4992 = vmatprep.subr.msk.bf16.mxu0 %vm11274_vm3, %v10246_v42  ;;  %5052 = vmatprep.subr.msk.bf16.mxu1 %vm11276_vm7, %v10246_v42  ;;  %vm11289_vm3 = vnez %v11288_v8  ;;  %vm11290_vm7 = vnez %v10801_v50  ;;  %v11310_v50 = vld [vmem:[#allocation12_spill] sm:$0xff] }
 0x407   : > { %4994 = vmatpush2.bf16.msk.msra.mxu0 %vm11277_vm15, %v10246_v42  ;;  %5054 = vmatpush2.bf16.msk.msra.mxu1 %vm11278_vm12, %v10246_v42  ;;  %vm11292_vm15 = vnez %v11291_v1  ;;  %vm11294_vm12 = vnez %v11293_v41 }
 0x408   : > { %4996 = vmatprep.subr.msk.bf16.mxu0 %vm11280_vm13, %v10246_v42  ;;  %5056 = vmatprep.subr.msk.bf16.mxu1 %vm11282_vm4, %v10246_v42  ;;  %vm11298_vm13 = vnez %v11297_v9  ;;  %vm11301_vm4 = vnez %v11300_v36 }
 0x40b   : > { %4998 = vmatpush2.bf16.msk.msra.mxu0 %vm11283_vm6, %v10246_v42  ;;  %5058 = vmatpush2.bf16.msk.msra.mxu1 %vm11285_vm10, %v10246_v42 }
 0x40c   : > { %5000 = vmatprep.subr.msk.bf16.mxu0 %vm11287_vm1, %v10246_v42  ;;  %5060 = vmatprep.subr.msk.bf16.mxu1 %vm11289_vm3, %v10246_v42 }
 0x40f   : > { %5002 = vmatpush2.bf16.msk.msra.mxu0 %vm11290_vm7, %v10246_v42  ;;  %5062 = vmatpush2.bf16.msk.msra.mxu1 %vm11292_vm15, %v10246_v42 }
 0x410   : > { %5004 = vmatprep.subr.msk.bf16.mxu0 %vm11294_vm12, %v10246_v42  ;;  %5064 = vmatprep.subr.msk.bf16.mxu1 %vm8464_vm11, %v10246_v42 }
 0x413   : > { %5006 = vmatpush2.bf16.msk.msra.mxu0 %vm8478_vm9, %v10246_v42  ;;  %5066 = vmatpush2.bf16.msk.msra.mxu1 %vm11298_vm13, %v10246_v42 }
 0x414   : > { %5008 = vmatprep.subr.msk.bf16.mxu0 %vm8492_vm14, %v10246_v42  ;;  %5068 = vmatprep.subr.msk.bf16.mxu1 %vm11301_vm4, %v10246_v42 }
 0x417   : > { %5010 = vmatpush2.bf16.msk.msra.mxu0 %vm8522_vm2, %v10246_v42  ;;  %5070 = vmatpush2.bf16.msk.msra.mxu1 %vm8528_vm5, %v10246_v42 }
 0x418   : > { %5072 = vmatprep.subr.msk.bf16.mxu1 %vm8540_vm8, %v10246_v42 }
 0x41a   : > { %v2948_v37 = vpop.f32.mrf.mxu0  ;;  %3205 = vmatmul.mubr.bf16.vlgmr.msra.gmra.mxu0 %v10968_v10 }
 0x41b   : > { %v2949_v0 = vadd.f32 %v2948_v37, %v11305_v34  ;;  %5074 = vmatpush2.bf16.msk.msra.mxu1 %vm8555_vm0, %v10246_v42  ;;  %v2654_v42 = vadd.f32 %v11311_v3, %v11310_v50 }
 0x41c   : > { %v2950_v19 = vpop.f32.mrf.mxu0 }
 0x41d   : > { %v2951_v25 = vadd.f32 %v2950_v19, %v11307_v26 }
 0x41e   : > { %v2952_v48 = vpop.f32.mrf.mxu0  ;;  %v2991_v32 = vpop.f32.mrf.mxu1  ;;  %3248 = vmatmul.mubr.bf16.vlgmr.msra.gmra.mxu1 %v10978_v35 }
 0x41f   : > { %v9398_v49 = vadd.f32 %v2991_v32, %v2949_v0  ;;  %v2953_v10 = vadd.f32 %v2952_v48, %v2652_v43 }
 0x420   : > { %v2954_v18 = vpop.f32.mrf.mxu0  ;;  %v2993_v54 = vpop.f32.mrf.mxu1 }
 0x421   : > { %v9402_v62 = vadd.f32 %v2993_v54, %v2951_v25  ;;  %v2955_v58 = vadd.f32 %v2954_v18, %v2654_v42 }
 0x422   : > { %v2995_v46 = vpop.f32.mrf.mxu1 }
 0x423   : > { %v2996_v7 = vadd.f32 %v2995_v46, %v2953_v10 }
 0x424   : > { %v2997_v35 = vpop.f32.mrf.mxu1 }
 0x425   : > { %v3282_v21 = vadd.f32 %v3266_v16, %v2996_v7  ;;  %v2998_v55 = vadd.f32 %v2997_v35, %v2955_v58  ;;  %v3272_v35 = vld [vmem:[%s8987_s22 + $0x70] sm:$0xf] }
 0x427   : > { %3298 = vst [vmem:[%s8987_s22 + $0x40] sm:$0xf] %v3282_v21  ;;  %v3283_v2 = vadd.f32 %v3267_v38, %v2998_v55 }
 0x429   : > { %3299 = vst [vmem:[%s8987_s22 + $0x48] sm:$0xf] %v3283_v2  ;;  %v3273_v2 = vld [vmem:[%s8987_s22 + $0x78] sm:$0xf] }
 0x45a   : > { %v3034_v28 = vpop.f32.mrf.mxu0 }
 0x45b   : > { %v3035_v45 = vadd.f32 %v3034_v28, %v11312_v51 }
 0x45c   : > { %v3036_v24 = vpop.f32.mrf.mxu0 }
 0x45d   : > { %v3037_v61 = vadd.f32 %v3036_v24, %v11313_v31 }
 0x45e   : > { %v3038_v52 = vpop.f32.mrf.mxu0  ;;  %v3077_v14 = vpop.f32.mrf.mxu1 }
 0x45f   : > { %v9410_v30 = vadd.f32 %v3077_v14, %v3035_v45  ;;  %v3039_v23 = vadd.f32 %v3038_v52, %v11314_v63 }
 0x460   : > { %v3040_v44 = vpop.f32.mrf.mxu0  ;;  %v3079_v33 = vpop.f32.mrf.mxu1 }
 0x461   : > { %v9413_v57 = vadd.f32 %v3079_v33, %v3037_v61  ;;  %v3041_v8 = vadd.f32 %v3040_v44, %v11315_v47 }
 0x462   : > { %v3081_v53 = vpop.f32.mrf.mxu1 }
 0x463   : > { %v3082_v1 = vadd.f32 %v3081_v53, %v3039_v23 }
 0x464   : > { %v3083_v41 = vpop.f32.mrf.mxu1 }
 0x465   : > { %v3284_v27 = vadd.f32 %v3268_v4, %v3082_v1  ;;  %v3084_v9 = vadd.f32 %v3083_v41, %v3041_v8  ;;  %v11318_v1 = vld [vmem:[#allocation10_spill] sm:$0xff] }
 0x467   : > { %3300 = vst [vmem:[%s8987_s22 + $0x50] sm:$0xf] %v3284_v27  ;;  %v3285_v15 = vadd.f32 %v3269_v60, %v3084_v9  ;;  %v11319_v9 = vld [vmem:[#allocation11_spill] sm:$0xff] }
 0x469   : > { %3301 = vst [vmem:[%s8987_s22 + $0x58] sm:$0xf] %v3285_v15 }
 0x470   : > { %v5075_v24 = vld [vmem:[%s8987_s22 + $0x43] ss:$8 sm:$0xf] }
 0x49a   : > { %v3120_v36 = vpop.f32.mrf.mxu0 }
 0x49b   : > { %v3121_v22 = vadd.f32 %v3120_v36, %v11316_v5 }
 0x49c   : > { %v3122_v17 = vpop.f32.mrf.mxu0 }
 0x49d   : > { %v3123_v37 = vadd.f32 %v3122_v17, %v9013_v13  ;;  %v3271_v13 = vld [vmem:[%s8987_s22 + $0x68] sm:$0xf]  ;;  %v3324_v17 = vld [vmem:[%s8987_s22 + $0x40] sm:$0xf] }
 0x49e   : > { %v3124_v34 = vpop.f32.mrf.mxu0  ;;  %v3163_v0 = vpop.f32.mrf.mxu1 }
 0x49f   : > { %v9422_v39 = vadd.f32 %v3163_v0, %v3121_v22  ;;  %v3125_v25 = vadd.f32 %v3124_v34, %v9016_v56 }
 0x4a0   : > { %v3126_v19 = vpop.f32.mrf.mxu0  ;;  %v3165_v26 = vpop.f32.mrf.mxu1 }
 0x4a1   : > { %v9425_v48 = vadd.f32 %v3165_v26, %v3123_v37  ;;  %v3127_v29 = vadd.f32 %v3126_v19, %v9030_v6  ;;  %v3325_v37 = vld [vmem:[%s8987_s22 + $0x48] sm:$0xf] }
 0x4a2   : > { %v3167_v32 = vpop.f32.mrf.mxu1 }
 0x4a3   : > { %v3168_v43 = vadd.f32 %v3167_v32, %v3125_v25  ;;  %v3326_v25 = vld [vmem:[%s8987_s22 + $0x50] sm:$0xf]  ;;  %v3327_v32 = vld [vmem:[%s8987_s22 + $0x58] sm:$0xf] }
 0x4a4   : > { %v3169_v18 = vpop.f32.mrf.mxu1 }
 0x4a5   : > { %v3286_v54 = vadd.f32 %v3270_v20, %v3168_v43  ;;  %v3170_v50 = vadd.f32 %v3169_v18, %v3127_v29 }
 0x4a7   : > { %3302 = vst [vmem:[%s8987_s22 + $0x60] sm:$0xf] %v3286_v54  ;;  %v3287_v3 = vadd.f32 %v3271_v13, %v3170_v50 }
 0x4a9   : > { %3303 = vst [vmem:[%s8987_s22 + $0x68] sm:$0xf] %v3287_v3 }
 0x4ae   : > { %v3328_v20 = vld [vmem:[%s8987_s22 + $0x60] sm:$0xf] }
 0x4da   : > { %v3206_v42 = vpop.f32.mrf.mxu0 }
 0x4db   : > { %v3207_v14 = vadd.f32 %v3206_v42, %v9203_v40 }
 0x4dc   : > { %v3208_v10 = vpop.f32.mrf.mxu0 }
 0x4de   : > { %v3210_v56 = vpop.f32.mrf.mxu0  ;;  %v3249_v46 = vpop.f32.mrf.mxu1 }
 0x4df   : > { %v3211_v58 = vadd.f32 %v3210_v56, %v9220_v12  ;;  %v3209_v12 = vadd.f32 %v3208_v10, %v9217_v11  ;;  %v3250_v44 = vadd.f32 %v3249_v46, %v3207_v14 }
 0x4e0   : > { %v3212_v16 = vpop.f32.mrf.mxu0  ;;  %v3251_v6 = vpop.f32.mrf.mxu1 }
 0x4e1   : > { %v3213_v38 = vadd.f32 %v3212_v16, %v9234_v59  ;;  %v3252_v33 = vadd.f32 %v3251_v6, %v3209_v12  ;;  %v11317_v59 = vld [vmem:[#allocation9_spill] sm:$0xff] }
 0x4e2   : > { %v3253_v7 = vpop.f32.mrf.mxu1  ;;  %v3339_v63 = vsub.s32 1, %v11317_v59  ;;  %v3343_v23 = vsub.s32 2, %v11317_v59  ;;  %v3347_v53 = vsub.s32 3, %v11317_v59  ;;  %v3355_v4 = vsub.s32 5, %v11317_v59 }
 0x4e3   : > { %v3254_v21 = vadd.f32 %v3253_v7, %v3211_v58  ;;  %v3359_v47 = vsub.s32 6, %v11317_v59  ;;  %v3363_v8 = vsub.s32 7, %v11317_v59 }
 0x4e4   : > { %v3255_v55 = vpop.f32.mrf.mxu1 }
 0x4e5   : > { %v3288_v28 = vadd.f32 %v3272_v35, %v3254_v21  ;;  %v3256_v51 = vadd.f32 %v3255_v55, %v3213_v38 }
 0x4e7   : > { %3304 = vst [vmem:[%s8987_s22 + $0x70] sm:$0xf] %v3288_v28  ;;  %v3289_v45 = vadd.f32 %v3273_v2, %v3256_v51 }
 0x4e9   : > { %3305 = vst [vmem:[%s8987_s22 + $0x78] sm:$0xf] %v3289_v45 }
 0x4f0   : > { %v5076_v31 = vld [vmem:[%s8987_s22 + $0x43] ss:$8 sm:$0xf0] }
 0x4f1   : > { %v3312_v61 = vor.u32 %v5076_v31, %v5075_v24 }
 0x4f3   : > { %v3313_v52 = vmax.f32 %v3312_v61, 1.0 }
 0x4f5   : > { %5158 = vrcp.f32 %v3313_v52 }
 0x502   : > { %v5159_v40 = vpop.eup %5158 }
 0x503   : > { %v3336_v11 = vrot.slane %v5159_v40, %v11318_v1  ;;  %v3340_v41 = vrot.slane %v5159_v40, %v3339_v63  ;;  %v3344_v60 = vrot.slane %v5159_v40, %v3343_v23  ;;  %v3348_v27 = vrot.slane %v5159_v40, %v3347_v53 }
 0x504   : > { %v3352_v15 = vrot.slane %v5159_v40, %v11319_v9  ;;  %v3356_v36 = vrot.slane %v5159_v40, %v3355_v4  ;;  %v3360_v5 = vrot.slane %v5159_v40, %v3359_v47  ;;  %v3364_v22 = vrot.slane %v5159_v40, %v3363_v8 }
 0x505   : > { %v3373_v34 = vmul.f32 %v3336_v11, %v9398_v49  ;;  %v3374_v0 = vmul.f32 %v3340_v41, %v9402_v62  ;;  %v3375_v19 = vmul.f32 %v3344_v60, %v9410_v30  ;;  %v3376_v26 = vmul.f32 %v3348_v27, %v9413_v57  ;;  %v3329_v49 = vld [vmem:[%s8987_s22 + $0x68] sm:$0xf]  ;;  %v3330_v62 = vld [vmem:[%s8987_s22 + $0x70] sm:$0xf]  ;;  %v3331_v30 = vld [vmem:[%s8987_s22 + $0x78] sm:$0xf] }
 0x506   : > { %v3377_v29 = vmul.f32 %v3352_v15, %v9422_v39  ;;  %v3378_v43 = vmul.f32 %v3356_v36, %v9425_v48  ;;  %v3379_v18 = vmul.f32 %v3360_v5, %v3250_v44  ;;  %v3380_v13 = vmul.f32 %v3364_v22, %v3252_v33 }
 0x507   : > { %v3381_v57 = vmul.f32 %v3336_v11, %v3324_v17  ;;  %v3382_v54 = vmul.f32 %v3340_v41, %v3325_v37  ;;  %v3383_v50 = vmul.f32 %v3344_v60, %v3326_v25  ;;  %v3384_v3 = vmul.f32 %v3348_v27, %v3327_v32  ;;  %3389 = vst [vmem:[%s8987_s22] sm:$0xff] %v3373_v34 }
 0x508   : > { %3390 = vst [vmem:[%s8987_s22 + $0x8] sm:$0xff] %v3374_v0  ;;  %3391 = vst [vmem:[%s8987_s22 + $0x10] sm:$0xff] %v3375_v19  ;;  %v3385_v39 = vmul.f32 %v3352_v15, %v3328_v20  ;;  %v3386_v48 = vmul.f32 %v3356_v36, %v3329_v49  ;;  %v3387_v42 = vmul.f32 %v3360_v5, %v3330_v62 }
 0x509   : > { %3392 = vst [vmem:[%s8987_s22 + $0x18] sm:$0xff] %v3376_v26  ;;  %v3388_v10 = vmul.f32 %v3364_v22, %v3331_v30  ;;  %3393 = vst [vmem:[%s8987_s22 + $0x20] sm:$0xff] %v3377_v29 }
 0x50a   : > { %3394 = vst [vmem:[%s8987_s22 + $0x28] sm:$0xff] %v3378_v43  ;;  %3395 = vst [vmem:[%s8987_s22 + $0x30] sm:$0xff] %v3379_v18 }
 0x50b   : > { %3396 = vst [vmem:[%s8987_s22 + $0x38] sm:$0xff] %v3380_v13  ;;  %3397 = vst [vmem:[%s8987_s22 + $0x40] sm:$0xf] %v3381_v57 }
 0x50c   : > { %3398 = vst [vmem:[%s8987_s22 + $0x48] sm:$0xf] %v3382_v54  ;;  %3399 = vst [vmem:[%s8987_s22 + $0x50] sm:$0xf] %v3383_v50 }
 0x50d   : > { %3400 = vst [vmem:[%s8987_s22 + $0x58] sm:$0xf] %v3384_v3  ;;  %3401 = vst [vmem:[%s8987_s22 + $0x60] sm:$0xf] %v3385_v39 }
 0x50e   : > { %3402 = vst [vmem:[%s8987_s22 + $0x68] sm:$0xf] %v3386_v48  ;;  %3403 = vst [vmem:[%s8987_s22 + $0x70] sm:$0xf] %v3387_v42 }
 0x50f   : > { %3404 = vst [vmem:[%s8987_s22 + $0x78] sm:$0xf] %v3388_v10 }
 0x510 PF: > { %s27_s28 = sadd.s32 1, %s5265_s28   ;;  %s11320_s1 = smov %s5249_s24 }
 0x511   : > { %p24_p3 = scmp.ge.s32.totalorder %s27_s28, 4   ;;  %s11321_s24 = smov %s5253_s25 }
 0x512   : > { %s11322_s25 = smov %s5353_s9  ;;  %s11323_s26 = smov %s5261_s27 }
 0x513   : > { %s11324_s27 = smov %s11326_s30  ;;  %26 = sbr.rel (!%p24_p3) target bundleno = 29 (0x1d), region = 80 }
 0x518   :  { %3435 = vsyncpa [#allocation6], 1 }
 0x519   :  { %3437 = vsyncpa [#allocation6 + $0x1], 1 }

</bundles_post_ra>
